<compile_context>
chip_gen: v7x
topology: tpu7x:2x2x1
jax: 0.10.0
libtpu: 0.0.40
codegen_flags: <defaults>
</compile_context>

<pallas_src>
import math

import jax
import jax.numpy as jnp
from jax.experimental import pallas as pl
from jax.experimental.pallas import tpu as pltpu

HIDDEN = 800
BN_EPS = 1e-5
DROP_P = 0.3
LEAK = 0.2


def critic_kernel(
    x_ref,
    w1_ref, g1_ref, be1_ref, m1_ref,
    w2_ref, g2_ref, be2_ref, m2_ref,
    w3_ref, g3_ref, be3_ref, m3_ref,
    w4_ref, b4_ref,
    out_ref,
):
    def block(h_bf16, w_ref, g_ref, be_ref, m_ref):
        # Linear (bias omitted: no-op before training-mode BatchNorm).
        z = jnp.dot(h_bf16, w_ref[...], preferred_element_type=jnp.float32)
        # BatchNorm1d, training mode: biased batch statistics over axis 0 (f32).
        mean = jnp.mean(z, axis=0, keepdims=True)
        var = jnp.mean((z - mean) ** 2, axis=0, keepdims=True)
        zn = (z - mean) * jax.lax.rsqrt(var + BN_EPS)
        zn = zn * g_ref[...] + be_ref[...]
        # LeakyReLU(0.2)
        a = jnp.where(zn > 0, zn, LEAK * zn)
        # Dropout(0.3): mask pre-scaled by 1/(1-p) in the wrapper.
        return a * m_ref[...]

    h = block(x_ref[...], w1_ref, g1_ref, be1_ref, m1_ref)
    h = block(h.astype(jnp.bfloat16), w2_ref, g2_ref, be2_ref, m2_ref)
    h = block(h.astype(jnp.bfloat16), w3_ref, g3_ref, be3_ref, m3_ref)
    # Final Linear(800 -> 1): N=1 matmul wastes the MXU; use VPU multiply + lane reduce.
    out_ref[...] = (
        jnp.sum(h * w4_ref[...], axis=1, keepdims=True) + b4_ref[...]
    )


def spectral_normalize(w, key, n_iters=10):
    """Power-iteration spectral norm of a (out_features, in_features) weight."""
    out_f, _ = w.shape
    u = jax.random.normal(key, (out_f,), dtype=jnp.float32)
    u = u / (jnp.linalg.norm(u) + 1e-12)
    v = None
    for _ in range(n_iters):
        v = w.T @ u
        v = v / (jnp.linalg.norm(v) + 1e-12)
        u = w @ v
        u = u / (jnp.linalg.norm(u) + 1e-12)
    sigma = u @ (w @ v)
    return w / sigma


def init_linear(key, in_f, out_f):
    """Deterministic init mimicking nn.Linear defaults (uniform +-1/sqrt(in))."""
    kw, kb = jax.random.split(key)
    bound = 1.0 / math.sqrt(float(in_f))
    w = jax.random.uniform(kw, (out_f, in_f), jnp.float32, -bound, bound)
    b = jax.random.uniform(kb, (out_f,), jnp.float32, -bound, bound)
    return w, b


def make_params(input_shape, key):
    d_in = math.prod(input_shape)
    dims = [(d_in, HIDDEN), (HIDDEN, HIDDEN), (HIDDEN, HIDDEN), (HIDDEN, 1)]
    keys = jax.random.split(key, 11)
    linear = []
    for i, (fi, fo) in enumerate(dims):
        w, b = init_linear(keys[2 * i], fi, fo)            # (fo, fi)
        w_sn = spectral_normalize(w, keys[2 * i + 1])      # (fo, fi)
        # Pass weight transposed: (in_features, out_features).
        linear.append((w_sn.T, b.reshape(1, fo)))
    # BatchNorm affine params for the three hidden layers (deterministic, non-trivial).
    bn = []
    for j in range(3):
        kg, kb = jax.random.split(keys[8 + j])
        gamma = 1.0 + 0.1 * jax.random.normal(kg, (1, HIDDEN), jnp.float32)
        beta = 0.1 * jax.random.normal(kb, (1, HIDDEN), jnp.float32)
        bn.append((gamma, beta))
    return tuple(linear) + tuple(bn)


@jax.jit
def critic_forward(x_flat, params, dropout_key):
    (w1, _b1), (w2, _b2), (w3, _b3), (w4, b4), (g1, be1), (g2, be2), (g3, be3) = params
    B, D = x_flat.shape

    # Training-mode dropout masks (keep prob 0.7, inverted scaling), generated
    # in plain JAX and passed into the kernel.
    keep = 1.0 - DROP_P
    k1, k2, k3 = jax.random.split(dropout_key, 3)
    m1 = jax.random.bernoulli(k1, keep, (B, HIDDEN)).astype(jnp.float32) * (1.0 / keep)
    m2 = jax.random.bernoulli(k2, keep, (B, HIDDEN)).astype(jnp.float32) * (1.0 / keep)
    m3 = jax.random.bernoulli(k3, keep, (B, HIDDEN)).astype(jnp.float32) * (1.0 / keep)

    # bf16 MXU operands, f32 accumulation / elementwise math.
    x_bf = x_flat.astype(jnp.bfloat16)
    w1_bf = w1.astype(jnp.bfloat16)
    w2_bf = w2.astype(jnp.bfloat16)
    w3_bf = w3.astype(jnp.bfloat16)
    w4_row = w4.reshape(1, HIDDEN)          # final layer handled on the VPU in f32

    return pl.pallas_call(
        critic_kernel,
        out_shape=jax.ShapeDtypeStruct((B, 1), jnp.float32),
        compiler_params=pltpu.CompilerParams(
            vmem_limit_bytes=32 * 1024 * 1024,
        ),
    )(
        x_bf,
        w1_bf, g1, be1, m1,
        w2_bf, g2, be2, m2,
        w3_bf, g3, be3, m3,
        w4_row, b4,
    )


if __name__ == "__main__":
    key = jax.random.PRNGKey(0)
    k_x, k_params, k_drop = jax.random.split(key, 3)

    # Small, input-shape-consistent example: "returns" of shape (B, 4, 16, 16)
    input_shape = (4, 16, 16)            # prod = 1024 flattened features
    B = 8
    x = jax.random.normal(k_x, (B,) + input_shape, dtype=jnp.float32)

    params = make_params(input_shape, k_params)

    x_flat = x.reshape(B, -1)            # returns.view(returns.size(0), -1)

    out = critic_forward(x_flat, params, k_drop)
    jax.block_until_ready(out)
    assert out.shape == (B, 1), out.shape
    print("KERNEL_OK")
</pallas_src>

<mosaic_0001>
module attributes {stable_mosaic.version = 11 : i64} {
  func.func @critic_kernel(%arg0: memref<8x1024xbf16, #tpu.memory_space<vmem>>, %arg1: memref<1024x800xbf16, #tpu.memory_space<vmem>>, %arg2: memref<1x800xf32, #tpu.memory_space<vmem>>, %arg3: memref<1x800xf32, #tpu.memory_space<vmem>>, %arg4: memref<8x800xf32, #tpu.memory_space<vmem>>, %arg5: memref<800x800xbf16, #tpu.memory_space<vmem>>, %arg6: memref<1x800xf32, #tpu.memory_space<vmem>>, %arg7: memref<1x800xf32, #tpu.memory_space<vmem>>, %arg8: memref<8x800xf32, #tpu.memory_space<vmem>>, %arg9: memref<800x800xbf16, #tpu.memory_space<vmem>>, %arg10: memref<1x800xf32, #tpu.memory_space<vmem>>, %arg11: memref<1x800xf32, #tpu.memory_space<vmem>>, %arg12: memref<8x800xf32, #tpu.memory_space<vmem>>, %arg13: memref<1x800xf32, #tpu.memory_space<vmem>>, %arg14: memref<1x1xf32, #tpu.memory_space<vmem>>, %arg15: memref<8x1xf32, #tpu.memory_space<vmem>>) attributes {dimension_semantics = [], scalar_prefetch = 0 : i64, scratch_operands = 0 : i64, tpu.core_type = #tpu.core_type<tc>} {
    %c0 = arith.constant 0 : index
    %c0_0 = arith.constant 0 : index
    %0 = vector.load %arg0[%c0, %c0_0] : memref<8x1024xbf16, #tpu.memory_space<vmem>>, vector<8x1024xbf16>
    %c0_1 = arith.constant 0 : index
    %c0_2 = arith.constant 0 : index
    %1 = vector.load %arg1[%c0_1, %c0_2] : memref<1024x800xbf16, #tpu.memory_space<vmem>>, vector<1024x800xbf16>
    %cst = arith.constant dense<0.000000e+00> : vector<8x800xf32>
    %2 = tpu.matmul %0, %1, %cst {dimension_numbers = #tpu.dot_dimension_numbers<[1], [0], [0], [1], [0, 0, 1, 1], [], []>} : vector<8x1024xbf16>, vector<1024x800xbf16>, vector<8x800xf32> -> vector<8x800xf32>
    %cst_3 = arith.constant dense<0.000000e+00> : vector<800xf32>
    %3 = vector.multi_reduction <add>, %2, %cst_3 [0] : vector<8x800xf32> to vector<800xf32>
    %4 = vector.shape_cast %3 : vector<800xf32> to vector<1x800xf32>
    %cst_4 = arith.constant 8.000000e+00 : f32
    %5 = vector.broadcast %cst_4 : f32 to vector<1x800xf32>
    %6 = arith.divf %4, %5 : vector<1x800xf32>
    %7 = vector.broadcast %6 : vector<1x800xf32> to vector<8x800xf32>
    %8 = arith.subf %2, %7 : vector<8x800xf32>
    %9 = arith.mulf %8, %8 : vector<8x800xf32>
    %cst_5 = arith.constant dense<0.000000e+00> : vector<800xf32>
    %10 = vector.multi_reduction <add>, %9, %cst_5 [0] : vector<8x800xf32> to vector<800xf32>
    %11 = vector.shape_cast %10 : vector<800xf32> to vector<1x800xf32>
    %cst_6 = arith.constant 8.000000e+00 : f32
    %12 = vector.broadcast %cst_6 : f32 to vector<1x800xf32>
    %13 = arith.divf %11, %12 : vector<1x800xf32>
    %14 = vector.broadcast %6 : vector<1x800xf32> to vector<8x800xf32>
    %15 = arith.subf %2, %14 : vector<8x800xf32>
    %cst_7 = arith.constant 9.99999974E-6 : f32
    %16 = vector.broadcast %cst_7 : f32 to vector<1x800xf32>
    %17 = arith.addf %13, %16 : vector<1x800xf32>
    %18 = math.rsqrt %17 : vector<1x800xf32>
    %19 = vector.broadcast %18 : vector<1x800xf32> to vector<8x800xf32>
    %20 = arith.mulf %15, %19 : vector<8x800xf32>
    %c0_8 = arith.constant 0 : index
    %c0_9 = arith.constant 0 : index
    %21 = vector.load %arg2[%c0_8, %c0_9] : memref<1x800xf32, #tpu.memory_space<vmem>>, vector<1x800xf32>
    %22 = vector.broadcast %21 : vector<1x800xf32> to vector<8x800xf32>
    %23 = arith.mulf %20, %22 : vector<8x800xf32>
    %c0_10 = arith.constant 0 : index
    %c0_11 = arith.constant 0 : index
    %24 = vector.load %arg3[%c0_10, %c0_11] : memref<1x800xf32, #tpu.memory_space<vmem>>, vector<1x800xf32>
    %25 = vector.broadcast %24 : vector<1x800xf32> to vector<8x800xf32>
    %26 = arith.addf %23, %25 : vector<8x800xf32>
    %cst_12 = arith.constant 0.000000e+00 : f32
    %27 = vector.broadcast %cst_12 : f32 to vector<8x800xf32>
    %28 = arith.cmpf ogt, %26, %27 : vector<8x800xf32>
    %cst_13 = arith.constant 2.000000e-01 : f32
    %29 = vector.broadcast %cst_13 : f32 to vector<8x800xf32>
    %30 = arith.mulf %29, %26 : vector<8x800xf32>
    %31 = arith.select %28, %26, %30 : vector<8x800xi1>, vector<8x800xf32>
    %c0_14 = arith.constant 0 : index
    %c0_15 = arith.constant 0 : index
    %32 = vector.load %arg4[%c0_14, %c0_15] : memref<8x800xf32, #tpu.memory_space<vmem>>, vector<8x800xf32>
    %33 = arith.mulf %31, %32 : vector<8x800xf32>
    %34 = arith.truncf %33 : vector<8x800xf32> to vector<8x800xbf16>
    %c0_16 = arith.constant 0 : index
    %c0_17 = arith.constant 0 : index
    %35 = vector.load %arg5[%c0_16, %c0_17] : memref<800x800xbf16, #tpu.memory_space<vmem>>, vector<800x800xbf16>
    %cst_18 = arith.constant dense<0.000000e+00> : vector<8x800xf32>
    %36 = tpu.matmul %34, %35, %cst_18 {dimension_numbers = #tpu.dot_dimension_numbers<[1], [0], [0], [1], [0, 0, 1, 1], [], []>} : vector<8x800xbf16>, vector<800x800xbf16>, vector<8x800xf32> -> vector<8x800xf32>
    %cst_19 = arith.constant dense<0.000000e+00> : vector<800xf32>
    %37 = vector.multi_reduction <add>, %36, %cst_19 [0] : vector<8x800xf32> to vector<800xf32>
    %38 = vector.shape_cast %37 : vector<800xf32> to vector<1x800xf32>
    %cst_20 = arith.constant 8.000000e+00 : f32
    %39 = vector.broadcast %cst_20 : f32 to vector<1x800xf32>
    %40 = arith.divf %38, %39 : vector<1x800xf32>
    %41 = vector.broadcast %40 : vector<1x800xf32> to vector<8x800xf32>
    %42 = arith.subf %36, %41 : vector<8x800xf32>
    %43 = arith.mulf %42, %42 : vector<8x800xf32>
    %cst_21 = arith.constant dense<0.000000e+00> : vector<800xf32>
    %44 = vector.multi_reduction <add>, %43, %cst_21 [0] : vector<8x800xf32> to vector<800xf32>
    %45 = vector.shape_cast %44 : vector<800xf32> to vector<1x800xf32>
    %cst_22 = arith.constant 8.000000e+00 : f32
    %46 = vector.broadcast %cst_22 : f32 to vector<1x800xf32>
    %47 = arith.divf %45, %46 : vector<1x800xf32>
    %48 = vector.broadcast %40 : vector<1x800xf32> to vector<8x800xf32>
    %49 = arith.subf %36, %48 : vector<8x800xf32>
    %cst_23 = arith.constant 9.99999974E-6 : f32
    %50 = vector.broadcast %cst_23 : f32 to vector<1x800xf32>
    %51 = arith.addf %47, %50 : vector<1x800xf32>
    %52 = math.rsqrt %51 : vector<1x800xf32>
    %53 = vector.broadcast %52 : vector<1x800xf32> to vector<8x800xf32>
    %54 = arith.mulf %49, %53 : vector<8x800xf32>
    %c0_24 = arith.constant 0 : index
    %c0_25 = arith.constant 0 : index
    %55 = vector.load %arg6[%c0_24, %c0_25] : memref<1x800xf32, #tpu.memory_space<vmem>>, vector<1x800xf32>
    %56 = vector.broadcast %55 : vector<1x800xf32> to vector<8x800xf32>
    %57 = arith.mulf %54, %56 : vector<8x800xf32>
    %c0_26 = arith.constant 0 : index
    %c0_27 = arith.constant 0 : index
    %58 = vector.load %arg7[%c0_26, %c0_27] : memref<1x800xf32, #tpu.memory_space<vmem>>, vector<1x800xf32>
    %59 = vector.broadcast %58 : vector<1x800xf32> to vector<8x800xf32>
    %60 = arith.addf %57, %59 : vector<8x800xf32>
    %cst_28 = arith.constant 0.000000e+00 : f32
    %61 = vector.broadcast %cst_28 : f32 to vector<8x800xf32>
    %62 = arith.cmpf ogt, %60, %61 : vector<8x800xf32>
    %cst_29 = arith.constant 2.000000e-01 : f32
    %63 = vector.broadcast %cst_29 : f32 to vector<8x800xf32>
    %64 = arith.mulf %63, %60 : vector<8x800xf32>
    %65 = arith.select %62, %60, %64 : vector<8x800xi1>, vector<8x800xf32>
    %c0_30 = arith.constant 0 : index
    %c0_31 = arith.constant 0 : index
    %66 = vector.load %arg8[%c0_30, %c0_31] : memref<8x800xf32, #tpu.memory_space<vmem>>, vector<8x800xf32>
    %67 = arith.mulf %65, %66 : vector<8x800xf32>
    %68 = arith.truncf %67 : vector<8x800xf32> to vector<8x800xbf16>
    %c0_32 = arith.constant 0 : index
    %c0_33 = arith.constant 0 : index
    %69 = vector.load %arg9[%c0_32, %c0_33] : memref<800x800xbf16, #tpu.memory_space<vmem>>, vector<800x800xbf16>
    %cst_34 = arith.constant dense<0.000000e+00> : vector<8x800xf32>
    %70 = tpu.matmul %68, %69, %cst_34 {dimension_numbers = #tpu.dot_dimension_numbers<[1], [0], [0], [1], [0, 0, 1, 1], [], []>} : vector<8x800xbf16>, vector<800x800xbf16>, vector<8x800xf32> -> vector<8x800xf32>
    %cst_35 = arith.constant dense<0.000000e+00> : vector<800xf32>
    %71 = vector.multi_reduction <add>, %70, %cst_35 [0] : vector<8x800xf32> to vector<800xf32>
    %72 = vector.shape_cast %71 : vector<800xf32> to vector<1x800xf32>
    %cst_36 = arith.constant 8.000000e+00 : f32
    %73 = vector.broadcast %cst_36 : f32 to vector<1x800xf32>
    %74 = arith.divf %72, %73 : vector<1x800xf32>
    %75 = vector.broadcast %74 : vector<1x800xf32> to vector<8x800xf32>
    %76 = arith.subf %70, %75 : vector<8x800xf32>
    %77 = arith.mulf %76, %76 : vector<8x800xf32>
    %cst_37 = arith.constant dense<0.000000e+00> : vector<800xf32>
    %78 = vector.multi_reduction <add>, %77, %cst_37 [0] : vector<8x800xf32> to vector<800xf32>
    %79 = vector.shape_cast %78 : vector<800xf32> to vector<1x800xf32>
    %cst_38 = arith.constant 8.000000e+00 : f32
    %80 = vector.broadcast %cst_38 : f32 to vector<1x800xf32>
    %81 = arith.divf %79, %80 : vector<1x800xf32>
    %82 = vector.broadcast %74 : vector<1x800xf32> to vector<8x800xf32>
    %83 = arith.subf %70, %82 : vector<8x800xf32>
    %cst_39 = arith.constant 9.99999974E-6 : f32
    %84 = vector.broadcast %cst_39 : f32 to vector<1x800xf32>
    %85 = arith.addf %81, %84 : vector<1x800xf32>
    %86 = math.rsqrt %85 : vector<1x800xf32>
    %87 = vector.broadcast %86 : vector<1x800xf32> to vector<8x800xf32>
    %88 = arith.mulf %83, %87 : vector<8x800xf32>
    %c0_40 = arith.constant 0 : index
    %c0_41 = arith.constant 0 : index
    %89 = vector.load %arg10[%c0_40, %c0_41] : memref<1x800xf32, #tpu.memory_space<vmem>>, vector<1x800xf32>
    %90 = vector.broadcast %89 : vector<1x800xf32> to vector<8x800xf32>
    %91 = arith.mulf %88, %90 : vector<8x800xf32>
    %c0_42 = arith.constant 0 : index
    %c0_43 = arith.constant 0 : index
    %92 = vector.load %arg11[%c0_42, %c0_43] : memref<1x800xf32, #tpu.memory_space<vmem>>, vector<1x800xf32>
    %93 = vector.broadcast %92 : vector<1x800xf32> to vector<8x800xf32>
    %94 = arith.addf %91, %93 : vector<8x800xf32>
    %cst_44 = arith.constant 0.000000e+00 : f32
    %95 = vector.broadcast %cst_44 : f32 to vector<8x800xf32>
    %96 = arith.cmpf ogt, %94, %95 : vector<8x800xf32>
    %cst_45 = arith.constant 2.000000e-01 : f32
    %97 = vector.broadcast %cst_45 : f32 to vector<8x800xf32>
    %98 = arith.mulf %97, %94 : vector<8x800xf32>
    %99 = arith.select %96, %94, %98 : vector<8x800xi1>, vector<8x800xf32>
    %c0_46 = arith.constant 0 : index
    %c0_47 = arith.constant 0 : index
    %100 = vector.load %arg12[%c0_46, %c0_47] : memref<8x800xf32, #tpu.memory_space<vmem>>, vector<8x800xf32>
    %101 = arith.mulf %99, %100 : vector<8x800xf32>
    %c0_48 = arith.constant 0 : index
    %c0_49 = arith.constant 0 : index
    %102 = vector.load %arg13[%c0_48, %c0_49] : memref<1x800xf32, #tpu.memory_space<vmem>>, vector<1x800xf32>
    %103 = vector.broadcast %102 : vector<1x800xf32> to vector<8x800xf32>
    %104 = arith.mulf %101, %103 : vector<8x800xf32>
    %cst_50 = arith.constant dense<0.000000e+00> : vector<8xf32>
    %105 = vector.multi_reduction <add>, %104, %cst_50 [1] : vector<8x800xf32> to vector<8xf32>
    %106 = vector.shape_cast %105 : vector<8xf32> to vector<8x1xf32>
    %c0_51 = arith.constant 0 : index
    %c0_52 = arith.constant 0 : index
    %107 = vector.load %arg14[%c0_51, %c0_52] : memref<1x1xf32, #tpu.memory_space<vmem>>, vector<1x1xf32>
    %108 = vector.broadcast %107 : vector<1x1xf32> to vector<8x1xf32>
    %109 = arith.addf %106, %108 : vector<8x1xf32>
    %c0_53 = arith.constant 0 : index
    %c0_54 = arith.constant 0 : index
    %110 = vector.load %arg15[%c0_53, %c0_54] : memref<8x1xf32, #tpu.memory_space<vmem>>, vector<8x1xf32>
    tpu.vector_store %arg15[%c0_53, %c0_54], %109 {strides = array<i32>} : memref<8x1xf32, #tpu.memory_space<vmem>>, vector<8x1xf32>,
    return
  }
}

</mosaic_0001>

<bundles_post_ra>
// kernel: critic_forward.3
= control target key start
LH: loop header
LB: loop body
LE: loop exit
PB: predicated region body
PF: predicated region fallthrough
CT: control target
= control target key end

     0   :  { %vm3589_vm4 = vcmask 261120   ;;  %vm13330_vm8 = vmmov 0   ;;  %s17365_s1 = inlined_call_operand.vmem [shape: bf16[1024,800], index: 1, kind: input, shape index: {}]   ;;  %s17366_s0 = inlined_call_operand.vmem [shape: bf16[8,1024], index: 0, kind: input, shape index: {}]   ;;  %s17367_s5 = inlined_call_operand.vmem [shape: bf16[800,800], index: 5, kind: input, shape index: {}]   ;;  %s17368_s2 = inlined_call_operand.vmem [shape: f32[1,800], index: 2, kind: input, shape index: {}]   ;;  %s17369_s3 = inlined_call_operand.vmem [shape: f32[1,800], index: 3, kind: input, shape index: {}]   ;;  %s17370_s4 = inlined_call_operand.vmem [shape: f32[8,800], index: 4, kind: input, shape index: {}]   ;;  %s17371_s9 = inlined_call_operand.vmem [shape: bf16[800,800], index: 9, kind: input, shape index: {}]   ;;  %s17372_s6 = inlined_call_operand.vmem [shape: f32[1,800], index: 6, kind: input, shape index: {}]   ;;  %s17373_s7 = inlined_call_operand.vmem [shape: f32[1,800], index: 7, kind: input, shape index: {}]   ;;  %s17374_s8 = inlined_call_operand.vmem [shape: f32[8,800], index: 8, kind: input, shape index: {}]   ;;  %s17375_s10 = inlined_call_operand.vmem [shape: f32[1,800], index: 10, kind: input, shape index: {}]   ;;  %s17376_s11 = inlined_call_operand.vmem [shape: f32[1,800], index: 11, kind: input, shape index: {}]   ;;  %s17377_s13 = inlined_call_operand.vmem [shape: f32[1,800], index: 13, kind: input, shape index: {}]   ;;  %s17378_s12 = inlined_call_operand.vmem [shape: f32[8,800], index: 12, kind: input, shape index: {}]   ;;  %s17379_s14 = inlined_call_operand.<no memory space> [shape: f32[1,1], index: 14, kind: input, shape index: {}]   ;;  %s17380_s15 = inlined_call_operand.vmem [shape: f32[8,1], index: 15, kind: output, shape index: {}]  }
   0x1   :  { %v11636_v0 = vld [vmem:[%s17365_s1 + $0x4] ss:$28 sps:$4 sm:$0xff]   ;;  %v11638_v1 = vld [vmem:[%s17365_s1 + $0xc] ss:$28 sps:$4 sm:$0xff]   ;;  %v11642_v4 = vld [vmem:[%s17365_s1 + $0x3c] ss:$28 sps:$4 sm:$0xff]  }
   0x2   :  { %2901 = vmatprep.subr.bf16.mxu0 %v11636_v0  ;;  %v11640_v2 = vld [vmem:[%s17365_s1] ss:$28 sps:$4 sm:$0xff]   ;;  %v11641_v3 = vld [vmem:[%s17365_s1 + $0x8] ss:$28 sps:$4 sm:$0xff]   ;;  %3065 = vmatprep.subr.bf16.mxu1 %v11638_v1  ;;  %v11646_v6 = vld [vmem:[%s17365_s1 + $0x38] ss:$28 sps:$4 sm:$0xff]  }
   0x3   :  { %2902 = vmatpush1.bf16.msra.mxu0 %v11640_v2  ;;  %3066 = vmatpush1.bf16.msra.mxu1 %v11641_v3  ;;  %v11644_v5 = vld [vmem:[%s17365_s1 + $0x44] ss:$28 sps:$4 sm:$0xff]   ;;  %v11648_v8 = vld [vmem:[%s17365_s1 + $0x74] ss:$28 sps:$4 sm:$0xff]   ;;  %v11650_v9 = vld [vmem:[%s17365_s1 + $0x7c] ss:$28 sps:$4 sm:$0xff]  }
   0x4   :  { %2903 = vmatprep.subr.bf16.mxu0 %v11642_v4  ;;  %v11647_v7 = vld [vmem:[%s17365_s1 + $0x40] ss:$28 sps:$4 sm:$0xff]   ;;  %3067 = vmatprep.subr.bf16.mxu1 %v11644_v5  ;;  %v11652_v10 = vld [vmem:[%s17365_s1 + $0x70] ss:$28 sps:$4 sm:$0xff]   ;;  %v11653_v11 = vld [vmem:[%s17365_s1 + $0x78] ss:$28 sps:$4 sm:$0xff]  }
   0x5   :  { %v11654_v12 = vld [vmem:[%s17365_s1 + $0xac] ss:$28 sps:$4 sm:$0xff]   ;;  %v11656_v13 = vld [vmem:[%s17365_s1 + $0xb4] ss:$28 sps:$4 sm:$0xff]   ;;  %v11660_v16 = vld [vmem:[%s17365_s1 + $0xe4] ss:$28 sps:$4 sm:$0xff]  }
   0x6   :  { %v11658_v14 = vld [vmem:[%s17365_s1 + $0xa8] ss:$28 sps:$4 sm:$0xff]   ;;  %v11659_v15 = vld [vmem:[%s17365_s1 + $0xb0] ss:$28 sps:$4 sm:$0xff]   ;;  %v11664_v18 = vld [vmem:[%s17365_s1 + $0xe0] ss:$28 sps:$4 sm:$0xff]  }
   0x7   :  { %2904 = vmatpush1.bf16.msra.mxu0 %v11646_v6  ;;  %3068 = vmatpush1.bf16.msra.mxu1 %v11647_v7  ;;  %v11662_v17 = vld [vmem:[%s17365_s1 + $0xec] ss:$28 sps:$4 sm:$0xff]   ;;  %v11666_v20 = vld [vmem:[%s17365_s1 + $0x11c] ss:$28 sps:$4 sm:$0xff]   ;;  %v11668_v21 = vld [vmem:[%s17365_s1 + $0x124] ss:$28 sps:$4 sm:$0xff]  }
   0x8   :  { %2905 = vmatprep.subr.bf16.mxu0 %v11648_v8  ;;  %3069 = vmatprep.subr.bf16.mxu1 %v11650_v9  ;;  %v11665_v19 = vld [vmem:[%s17365_s1 + $0xe8] ss:$28 sps:$4 sm:$0xff]   ;;  %v11670_v22 = vld [vmem:[%s17365_s1 + $0x118] ss:$28 sps:$4 sm:$0xff]   ;;  %v11671_v23 = vld [vmem:[%s17365_s1 + $0x120] ss:$28 sps:$4 sm:$0xff]  }
   0x9   :  { %v11672_v24 = vld [vmem:[%s17365_s1 + $0x154] ss:$28 sps:$4 sm:$0xff]   ;;  %v11674_v25 = vld [vmem:[%s17365_s1 + $0x15c] ss:$28 sps:$4 sm:$0xff]   ;;  %v11678_v28 = vld [vmem:[%s17365_s1 + $0x18c] ss:$28 sps:$4 sm:$0xff]  }
   0xa   :  { %v11676_v26 = vld [vmem:[%s17365_s1 + $0x150] ss:$28 sps:$4 sm:$0xff]   ;;  %v11677_v27 = vld [vmem:[%s17365_s1 + $0x158] ss:$28 sps:$4 sm:$0xff]   ;;  %v11682_v30 = vld [vmem:[%s17365_s1 + $0x188] ss:$28 sps:$4 sm:$0xff]  }
   0xb   :  { %2906 = vmatpush1.bf16.msra.mxu0 %v11652_v10  ;;  %3070 = vmatpush1.bf16.msra.mxu1 %v11653_v11  ;;  %v11680_v29 = vld [vmem:[%s17365_s1 + $0x194] ss:$28 sps:$4 sm:$0xff]   ;;  %v11684_v32 = vld [vmem:[%s17365_s1 + $0x1c4] ss:$28 sps:$4 sm:$0xff]   ;;  %v11686_v33 = vld [vmem:[%s17365_s1 + $0x1cc] ss:$28 sps:$4 sm:$0xff]  }
   0xc   :  { %2907 = vmatprep.subr.bf16.mxu0 %v11654_v12  ;;  %3071 = vmatprep.subr.bf16.mxu1 %v11656_v13  ;;  %v11683_v31 = vld [vmem:[%s17365_s1 + $0x190] ss:$28 sps:$4 sm:$0xff]   ;;  %v11688_v34 = vld [vmem:[%s17365_s1 + $0x1c0] ss:$28 sps:$4 sm:$0xff]   ;;  %v11689_v35 = vld [vmem:[%s17365_s1 + $0x1c8] ss:$28 sps:$4 sm:$0xff]  }
   0xd   :  { %v11690_v36 = vld [vmem:[%s17365_s1 + $0x1fc] ss:$28 sps:$4 sm:$0xff]   ;;  %v11692_v37 = vld [vmem:[%s17365_s1 + $0x204] ss:$28 sps:$4 sm:$0xff]   ;;  %v11696_v40 = vld [vmem:[%s17365_s1 + $0x234] ss:$28 sps:$4 sm:$0xff]  }
   0xe   :  { %v11694_v38 = vld [vmem:[%s17365_s1 + $0x1f8] ss:$28 sps:$4 sm:$0xff]   ;;  %v11695_v39 = vld [vmem:[%s17365_s1 + $0x200] ss:$28 sps:$4 sm:$0xff]   ;;  %v11700_v42 = vld [vmem:[%s17365_s1 + $0x230] ss:$28 sps:$4 sm:$0xff]  }
   0xf   :  { %2908 = vmatpush1.bf16.msra.mxu0 %v11658_v14  ;;  %3072 = vmatpush1.bf16.msra.mxu1 %v11659_v15  ;;  %v11698_v41 = vld [vmem:[%s17365_s1 + $0x23c] ss:$28 sps:$4 sm:$0xff]   ;;  %v11702_v44 = vld [vmem:[%s17365_s1 + $0x26c] ss:$28 sps:$4 sm:$0xff]   ;;  %v11704_v45 = vld [vmem:[%s17365_s1 + $0x274] ss:$28 sps:$4 sm:$0xff]  }
  0x10   :  { %2909 = vmatprep.subr.bf16.mxu0 %v11660_v16  ;;  %3073 = vmatprep.subr.bf16.mxu1 %v11662_v17  ;;  %v11701_v43 = vld [vmem:[%s17365_s1 + $0x238] ss:$28 sps:$4 sm:$0xff]   ;;  %v53_v46 = vld [vmem:[%s17366_s0] sm:$0xff]  ;;  %v11707_v49 = vld [vmem:[%s17365_s1 + $0x270] ss:$28 sps:$4 sm:$0xff]  }
  0x11   :  { %v11706_v47 = vld [vmem:[%s17365_s1 + $0x268] ss:$28 sps:$4 sm:$0xff]   ;;  %v13555_v48 = vcombine.high %v53_v46, %v53_v46  ;;  %v11712_v52 = vld [vmem:[%s17365_s1 + $0x2a0] ss:$28 sps:$4 sm:$0xff]   ;;  %v11718_v56 = vld [vmem:[%s17365_s1 + $0x2d8] ss:$28 sps:$4 sm:$0xff]   ;;  %v13619_v5 = vcombine.low %v53_v46, %v53_v46 }
  0x12   :  { %v11708_v50 = vld [vmem:[%s17365_s1 + $0x2a4] ss:$28 sps:$4 sm:$0xff]   ;;  %v11710_v51 = vld [vmem:[%s17365_s1 + $0x2ac] ss:$28 sps:$4 sm:$0xff]   ;;  %v11714_v54 = vld [vmem:[%s17365_s1 + $0x2dc] ss:$28 sps:$4 sm:$0xff]  }
  0x13   :  { %2910 = vmatpush1.bf16.msra.mxu0 %v11664_v18  ;;  %3074 = vmatpush1.bf16.msra.mxu1 %v11665_v19  ;;  %v11713_v53 = vld [vmem:[%s17365_s1 + $0x2a8] ss:$28 sps:$4 sm:$0xff]   ;;  %v11719_v57 = vld [vmem:[%s17365_s1 + $0x2e0] ss:$28 sps:$4 sm:$0xff]   ;;  %v11720_v58 = vld [vmem:[%s17365_s1 + $0x314] ss:$28 sps:$4 sm:$0xff]  }
  0x14   :  { %2911 = vmatprep.subr.bf16.mxu0 %v11666_v20  ;;  %3075 = vmatprep.subr.bf16.mxu1 %v11668_v21  ;;  %v11716_v55 = vld [vmem:[%s17365_s1 + $0x2e4] ss:$28 sps:$4 sm:$0xff]   ;;  %v11722_v59 = vld [vmem:[%s17365_s1 + $0x31c] ss:$28 sps:$4 sm:$0xff]   ;;  %v11724_v60 = vld [vmem:[%s17365_s1 + $0x310] ss:$28 sps:$4 sm:$0xff]  }
  0x15   :  { %2933 = vmatprep.mubr.bf16.mxu0 %v13555_v48  ;;  %3097 = vmatprep.mubr.bf16.mxu1 %v13555_v48  ;;  %v11725_v61 = vld [vmem:[%s17365_s1 + $0x318] ss:$28 sps:$4 sm:$0xff]   ;;  %v11726_v62 = vld [vmem:[%s17365_s1 + $0x34c] ss:$28 sps:$4 sm:$0xff]   ;;  %v11735_v2 = vld [vmem:[%s17365_s1 + $0x384] ss:$28 sps:$4 sm:$0xff]  }
  0x16   :  { %v11728_v63 = vld [vmem:[%s17365_s1 + $0x354] ss:$28 sps:$4 sm:$0xff]   ;;  %v11730_v0 = vld [vmem:[%s17365_s1 + $0x348] ss:$28 sps:$4 sm:$0xff]   ;;  %v11733_v4 = vld [vmem:[%s17365_s1 + $0x380] ss:$28 sps:$4 sm:$0xff]  }
  0x17   :  { %2912 = vmatpush1.bf16.msra.mxu0 %v11670_v22  ;;  %3076 = vmatpush1.bf16.msra.mxu1 %v11671_v23  ;;  %v11731_v1 = vld [vmem:[%s17365_s1 + $0x350] ss:$28 sps:$4 sm:$0xff]   ;;  %v11736_v6 = vld [vmem:[%s17365_s1 + $0x388] ss:$28 sps:$4 sm:$0xff]   ;;  %v11742_v7 = vld [vmem:[%s17365_s1 + $0x3bc] ss:$28 sps:$4 sm:$0xff]  }
  0x18   :  { %2913 = vmatprep.subr.bf16.mxu0 %v11672_v24  ;;  %3077 = vmatprep.subr.bf16.mxu1 %v11674_v25  ;;  %v11738_v3 = vld [vmem:[%s17365_s1 + $0x38c] ss:$28 sps:$4 sm:$0xff]   ;;  %v11745_v8 = vld [vmem:[%s17365_s1 + $0x3c4] ss:$28 sps:$4 sm:$0xff]   ;;  %v11740_v9 = vld [vmem:[%s17365_s1 + $0x3b8] ss:$28 sps:$4 sm:$0xff]  }
  0x19   :  { %v11743_v10 = vld [vmem:[%s17365_s1 + $0x3c0] ss:$28 sps:$4 sm:$0xff]   ;;  %v11748_v11 = vld [vmem:[%s17365_s1 + $0x3f4] ss:$28 sps:$4 sm:$0xff]   ;;  %v11754_v15 = vld [vmem:[%s17365_s1 + $0x42c] ss:$28 sps:$4 sm:$0xff]  }
  0x1a   :  { %v11751_v12 = vld [vmem:[%s17365_s1 + $0x3fc] ss:$28 sps:$4 sm:$0xff]   ;;  %v11746_v13 = vld [vmem:[%s17365_s1 + $0x3f0] ss:$28 sps:$4 sm:$0xff]   ;;  %v11752_v17 = vld [vmem:[%s17365_s1 + $0x428] ss:$28 sps:$4 sm:$0xff]  }
  0x1b   :  { %2914 = vmatpush1.bf16.msra.mxu0 %v11676_v26  ;;  %3078 = vmatpush1.bf16.msra.mxu1 %v11677_v27  ;;  %v11749_v14 = vld [vmem:[%s17365_s1 + $0x3f8] ss:$28 sps:$4 sm:$0xff]   ;;  %v11755_v18 = vld [vmem:[%s17365_s1 + $0x430] ss:$28 sps:$4 sm:$0xff]   ;;  %v11760_v19 = vld [vmem:[%s17365_s1 + $0x464] ss:$28 sps:$4 sm:$0xff]  }
  0x1c   :  { %2915 = vmatprep.subr.bf16.mxu0 %v11678_v28  ;;  %3079 = vmatprep.subr.bf16.mxu1 %v11680_v29  ;;  %v11757_v16 = vld [vmem:[%s17365_s1 + $0x434] ss:$28 sps:$4 sm:$0xff]   ;;  %v11763_v20 = vld [vmem:[%s17365_s1 + $0x46c] ss:$28 sps:$4 sm:$0xff]   ;;  %v11758_v21 = vld [vmem:[%s17365_s1 + $0x460] ss:$28 sps:$4 sm:$0xff]  }
  0x1d   :  { %v11761_v22 = vld [vmem:[%s17365_s1 + $0x468] ss:$28 sps:$4 sm:$0xff]   ;;  %v11766_v23 = vld [vmem:[%s17365_s1 + $0x49c] ss:$28 sps:$4 sm:$0xff]   ;;  %v11772_v27 = vld [vmem:[%s17365_s1 + $0x4d4] ss:$28 sps:$4 sm:$0xff]  }
  0x1e   :  { %v11769_v24 = vld [vmem:[%s17365_s1 + $0x4a4] ss:$28 sps:$4 sm:$0xff]   ;;  %v11764_v25 = vld [vmem:[%s17365_s1 + $0x498] ss:$28 sps:$4 sm:$0xff]   ;;  %v13695_v29 = vld [vmem:[%s17366_s0 + $0x8] sm:$0xff] }
  0x1f   :  { %2916 = vmatpush1.bf16.msra.mxu0 %v11682_v30  ;;  %3080 = vmatpush1.bf16.msra.mxu1 %v11683_v31  ;;  %v11767_v26 = vld [vmem:[%s17365_s1 + $0x4a0] ss:$28 sps:$4 sm:$0xff]   ;;  %v13699_v30 = vcombine.high %v13695_v29, %v13695_v29  ;;  %v11770_v31 = vld [vmem:[%s17365_s1 + $0x4d0] ss:$28 sps:$4 sm:$0xff]  }
  0x20   :  { %2917 = vmatprep.subr.bf16.mxu0 %v11684_v32  ;;  %3081 = vmatprep.subr.bf16.mxu1 %v11686_v33  ;;  %v11775_v28 = vld [vmem:[%s17365_s1 + $0x4dc] ss:$28 sps:$4 sm:$0xff]   ;;  %v11778_v33 = vld [vmem:[%s17365_s1 + $0x50c] ss:$28 sps:$4 sm:$0xff]  }
  0x21   :  { %v11773_v32 = vld [vmem:[%s17365_s1 + $0x4d8] ss:$28 sps:$4 sm:$0xff]  }
  0x22   :  { %v11799_v46 = vld [vmem:[%s17365_s1 + $0x5bc] ss:$28 sps:$4 sm:$0xff]  }
  0x23   :  { %2918 = vmatpush1.bf16.msra.mxu0 %v11688_v34  ;;  %3082 = vmatpush1.bf16.msra.mxu1 %v11689_v35  ;;  %v11781_v34 = vld [vmem:[%s17365_s1 + $0x514] ss:$28 sps:$4 sm:$0xff]   ;;  %v11776_v35 = vld [vmem:[%s17365_s1 + $0x508] ss:$28 sps:$4 sm:$0xff]  }
  0x24   :  { %2919 = vmatprep.subr.bf16.mxu0 %v11690_v36  ;;  %3083 = vmatprep.subr.bf16.mxu1 %v11692_v37  ;;  %v11779_v36 = vld [vmem:[%s17365_s1 + $0x510] ss:$28 sps:$4 sm:$0xff]   ;;  %v11784_v37 = vld [vmem:[%s17365_s1 + $0x544] ss:$28 sps:$4 sm:$0xff]  }
  0x27   :  { %2920 = vmatpush1.bf16.msra.mxu0 %v11694_v38  ;;  %3084 = vmatpush1.bf16.msra.mxu1 %v11695_v39  ;;  %v11787_v38 = vld [vmem:[%s17365_s1 + $0x54c] ss:$28 sps:$4 sm:$0xff]   ;;  %v11782_v39 = vld [vmem:[%s17365_s1 + $0x540] ss:$28 sps:$4 sm:$0xff]  }
  0x28   :  { %2921 = vmatprep.subr.bf16.mxu0 %v11696_v40  ;;  %3085 = vmatprep.subr.bf16.mxu1 %v11698_v41  ;;  %v11785_v40 = vld [vmem:[%s17365_s1 + $0x548] ss:$28 sps:$4 sm:$0xff]   ;;  %v11790_v41 = vld [vmem:[%s17365_s1 + $0x57c] ss:$28 sps:$4 sm:$0xff]  }
  0x2b   :  { %2922 = vmatpush1.bf16.msra.mxu0 %v11700_v42  ;;  %3086 = vmatpush1.bf16.msra.mxu1 %v11701_v43  ;;  %v11793_v42 = vld [vmem:[%s17365_s1 + $0x584] ss:$28 sps:$4 sm:$0xff]   ;;  %v11788_v43 = vld [vmem:[%s17365_s1 + $0x578] ss:$28 sps:$4 sm:$0xff]  }
  0x2c   :  { %2923 = vmatprep.subr.bf16.mxu0 %v11702_v44  ;;  %3087 = vmatprep.subr.bf16.mxu1 %v11704_v45  ;;  %v11791_v44 = vld [vmem:[%s17365_s1 + $0x580] ss:$28 sps:$4 sm:$0xff]   ;;  %v11796_v45 = vld [vmem:[%s17365_s1 + $0x5b4] ss:$28 sps:$4 sm:$0xff]  }
  0x2f   :  { %2924 = vmatpush1.bf16.msra.mxu0 %v11706_v47  ;;  %3088 = vmatpush1.bf16.msra.mxu1 %v11707_v49  ;;  %v11794_v47 = vld [vmem:[%s17365_s1 + $0x5b0] ss:$28 sps:$4 sm:$0xff]   ;;  %v11797_v49 = vld [vmem:[%s17365_s1 + $0x5b8] ss:$28 sps:$4 sm:$0xff]  }
  0x30   :  { %2925 = vmatprep.subr.bf16.mxu0 %v11708_v50  ;;  %3089 = vmatprep.subr.bf16.mxu1 %v11710_v51  ;;  %v11802_v50 = vld [vmem:[%s17365_s1 + $0x5ec] ss:$28 sps:$4 sm:$0xff]   ;;  %v11805_v51 = vld [vmem:[%s17365_s1 + $0x5f4] ss:$28 sps:$4 sm:$0xff]  }
  0x33   :  { %2926 = vmatpush1.bf16.msra.mxu0 %v11712_v52  ;;  %3090 = vmatpush1.bf16.msra.mxu1 %v11713_v53  ;;  %v11800_v52 = vld [vmem:[%s17365_s1 + $0x5e8] ss:$28 sps:$4 sm:$0xff]   ;;  %v11803_v53 = vld [vmem:[%s17365_s1 + $0x5f0] ss:$28 sps:$4 sm:$0xff]  }
  0x34   :  { %2927 = vmatprep.subr.bf16.mxu0 %v11714_v54  ;;  %3091 = vmatprep.subr.bf16.mxu1 %v11716_v55  ;;  %v11808_v54 = vld [vmem:[%s17365_s1 + $0x624] ss:$28 sps:$4 sm:$0xff]   ;;  %v11811_v55 = vld [vmem:[%s17365_s1 + $0x62c] ss:$28 sps:$4 sm:$0xff]  }
  0x37   :  { %2928 = vmatpush1.bf16.msra.mxu0 %v11718_v56  ;;  %3092 = vmatpush1.bf16.msra.mxu1 %v11719_v57  ;;  %v11806_v56 = vld [vmem:[%s17365_s1 + $0x620] ss:$28 sps:$4 sm:$0xff]   ;;  %v11809_v57 = vld [vmem:[%s17365_s1 + $0x628] ss:$28 sps:$4 sm:$0xff]  }
  0x38   :  { %2929 = vmatprep.subr.bf16.mxu0 %v11720_v58  ;;  %3093 = vmatprep.subr.bf16.mxu1 %v11722_v59  ;;  %v11814_v58 = vld [vmem:[%s17365_s1 + $0x65c] ss:$28 sps:$4 sm:$0xff]   ;;  %v11817_v59 = vld [vmem:[%s17365_s1 + $0x664] ss:$28 sps:$4 sm:$0xff]  }
  0x3b   :  { %2930 = vmatpush1.bf16.msra.mxu0 %v11724_v60  ;;  %3094 = vmatpush1.bf16.msra.mxu1 %v11725_v61  ;;  %v11812_v60 = vld [vmem:[%s17365_s1 + $0x658] ss:$28 sps:$4 sm:$0xff]   ;;  %v11815_v61 = vld [vmem:[%s17365_s1 + $0x660] ss:$28 sps:$4 sm:$0xff]  }
  0x3c   :  { %2931 = vmatprep.subr.bf16.mxu0 %v11726_v62  ;;  %3095 = vmatprep.subr.bf16.mxu1 %v11728_v63  ;;  %v11820_v62 = vld [vmem:[%s17365_s1 + $0x694] ss:$28 sps:$4 sm:$0xff]   ;;  %v11823_v63 = vld [vmem:[%s17365_s1 + $0x69c] ss:$28 sps:$4 sm:$0xff]  }
  0x3f   :  { %2932 = vmatpush1.bf16.msra.mxu0 %v11730_v0  ;;  %3096 = vmatpush1.bf16.msra.mxu1 %v11731_v1  ;;  %v11818_v0 = vld [vmem:[%s17365_s1 + $0x690] ss:$28 sps:$4 sm:$0xff]   ;;  %v11821_v1 = vld [vmem:[%s17365_s1 + $0x698] ss:$28 sps:$4 sm:$0xff]  }
  0x40   :  { %2942 = vmatprep.subr.bf16.mxu0 %v11735_v2  ;;  %3106 = vmatprep.subr.bf16.mxu1 %v11738_v3  ;;  %v11826_v2 = vld [vmem:[%s17365_s1 + $0x6cc] ss:$28 sps:$4 sm:$0xff]   ;;  %v11829_v3 = vld [vmem:[%s17365_s1 + $0x6d4] ss:$28 sps:$4 sm:$0xff]  }
  0x42   :  { %2934 = vmatmul.mubr.bf16.vlgmr.msra.gmra.mrb[0].mxu0 %v13619_v5  ;;  %3098 = vmatmul.mubr.bf16.vlgmr.msra.gmra.mrb[0].mxu1 %v13619_v5 }
  0x43   :  { %2943 = vmatpush1.bf16.msra.mxu0 %v11733_v4  ;;  %3107 = vmatpush1.bf16.msra.mxu1 %v11736_v6  ;;  %v11824_v4 = vld [vmem:[%s17365_s1 + $0x6c8] ss:$28 sps:$4 sm:$0xff]   ;;  %v11827_v6 = vld [vmem:[%s17365_s1 + $0x6d0] ss:$28 sps:$4 sm:$0xff]  }
  0x44   :  { %2944 = vmatprep.subr.bf16.mxu0 %v11742_v7  ;;  %3108 = vmatprep.subr.bf16.mxu1 %v11745_v8  ;;  %v11833_v7 = vld [vmem:[%s17365_s1 + $0x704] ss:$28 sps:$4 sm:$0xff]   ;;  %v11836_v8 = vld [vmem:[%s17365_s1 + $0x70c] ss:$28 sps:$4 sm:$0xff]  }
  0x45   :  { %2974 = vmatprep.mubr.bf16.mxu0 %v13699_v30  ;;  %3138 = vmatprep.mubr.bf16.mxu1 %v13699_v30 }
  0x47   :  { %2945 = vmatpush1.bf16.msra.mxu0 %v11740_v9  ;;  %3109 = vmatpush1.bf16.msra.mxu1 %v11743_v10  ;;  %v11831_v9 = vld [vmem:[%s17365_s1 + $0x700] ss:$28 sps:$4 sm:$0xff]   ;;  %v13828_v10 = vcombine.low %v13695_v29, %v13695_v29  ;;  %v11859_v29 = vld [vmem:[%s17365_s1 + $0x7e8] ss:$28 sps:$4 sm:$0xff]  }
  0x48   :  { %2946 = vmatprep.subr.bf16.mxu0 %v11748_v11  ;;  %3110 = vmatprep.subr.bf16.mxu1 %v11751_v12  ;;  %v11834_v11 = vld [vmem:[%s17365_s1 + $0x708] ss:$28 sps:$4 sm:$0xff]   ;;  %v11840_v12 = vld [vmem:[%s17365_s1 + $0x73c] ss:$28 sps:$4 sm:$0xff]  }
  0x4b   :  { %2947 = vmatpush1.bf16.msra.mxu0 %v11746_v13  ;;  %3111 = vmatpush1.bf16.msra.mxu1 %v11749_v14  ;;  %v13839_v13 = vld [vmem:[%s17366_s0 + $0x10] sm:$0xff]  ;;  %v11843_v14 = vld [vmem:[%s17365_s1 + $0x744] ss:$28 sps:$4 sm:$0xff]  }
  0x4c   :  { %2948 = vmatprep.subr.bf16.mxu0 %v11754_v15  ;;  %3112 = vmatprep.subr.bf16.mxu1 %v11757_v16  ;;  %v13846_v15 = vcombine.high %v13839_v13, %v13839_v13  ;;  %v11838_v16 = vld [vmem:[%s17365_s1 + $0x738] ss:$28 sps:$4 sm:$0xff]  }
  0x4f   :  { %2949 = vmatpush1.bf16.msra.mxu0 %v11752_v17  ;;  %3113 = vmatpush1.bf16.msra.mxu1 %v11755_v18  ;;  %v11841_v17 = vld [vmem:[%s17365_s1 + $0x740] ss:$28 sps:$4 sm:$0xff]   ;;  %v11846_v18 = vld [vmem:[%s17365_s1 + $0x774] ss:$28 sps:$4 sm:$0xff]  }
  0x50   :  { %2950 = vmatprep.subr.bf16.mxu0 %v11760_v19  ;;  %3114 = vmatprep.subr.bf16.mxu1 %v11763_v20  ;;  %v11849_v19 = vld [vmem:[%s17365_s1 + $0x77c] ss:$28 sps:$4 sm:$0xff]   ;;  %v11844_v20 = vld [vmem:[%s17365_s1 + $0x770] ss:$28 sps:$4 sm:$0xff]  }
  0x53   :  { %2951 = vmatpush1.bf16.msra.mxu0 %v11758_v21  ;;  %3115 = vmatpush1.bf16.msra.mxu1 %v11761_v22  ;;  %v11847_v21 = vld [vmem:[%s17365_s1 + $0x778] ss:$28 sps:$4 sm:$0xff]   ;;  %v11852_v22 = vld [vmem:[%s17365_s1 + $0x7ac] ss:$28 sps:$4 sm:$0xff]  }
  0x54   :  { %2952 = vmatprep.subr.bf16.mxu0 %v11766_v23  ;;  %3116 = vmatprep.subr.bf16.mxu1 %v11769_v24  ;;  %v11855_v23 = vld [vmem:[%s17365_s1 + $0x7b4] ss:$28 sps:$4 sm:$0xff]   ;;  %v11850_v24 = vld [vmem:[%s17365_s1 + $0x7a8] ss:$28 sps:$4 sm:$0xff]  }
  0x57   :  { %2953 = vmatpush1.bf16.msra.mxu0 %v11764_v25  ;;  %3117 = vmatpush1.bf16.msra.mxu1 %v11767_v26  ;;  %v11853_v25 = vld [vmem:[%s17365_s1 + $0x7b0] ss:$28 sps:$4 sm:$0xff]   ;;  %v11858_v26 = vld [vmem:[%s17365_s1 + $0x7e4] ss:$28 sps:$4 sm:$0xff]  }
  0x58   :  { %2954 = vmatprep.subr.bf16.mxu0 %v11772_v27  ;;  %3118 = vmatprep.subr.bf16.mxu1 %v11775_v28  ;;  %v11861_v27 = vld [vmem:[%s17365_s1 + $0x7ec] ss:$28 sps:$4 sm:$0xff]   ;;  %v11856_v28 = vld [vmem:[%s17365_s1 + $0x7e0] ss:$28 sps:$4 sm:$0xff]  }
  0x5b   :  { %2955 = vmatpush1.bf16.msra.mxu0 %v11770_v31  ;;  %3119 = vmatpush1.bf16.msra.mxu1 %v11773_v32  ;;  %v11864_v31 = vld [vmem:[%s17365_s1 + $0x81c] ss:$28 sps:$4 sm:$0xff]   ;;  %v11867_v32 = vld [vmem:[%s17365_s1 + $0x824] ss:$28 sps:$4 sm:$0xff]  }
  0x5c   :  { %2956 = vmatprep.subr.bf16.mxu0 %v11778_v33  ;;  %3120 = vmatprep.subr.bf16.mxu1 %v11781_v34  ;;  %v11862_v33 = vld [vmem:[%s17365_s1 + $0x818] ss:$28 sps:$4 sm:$0xff]   ;;  %v11865_v34 = vld [vmem:[%s17365_s1 + $0x820] ss:$28 sps:$4 sm:$0xff]  }
  0x5f   :  { %2957 = vmatpush1.bf16.msra.mxu0 %v11776_v35  ;;  %3121 = vmatpush1.bf16.msra.mxu1 %v11779_v36  ;;  %v11870_v35 = vld [vmem:[%s17365_s1 + $0x854] ss:$28 sps:$4 sm:$0xff]   ;;  %v11873_v36 = vld [vmem:[%s17365_s1 + $0x85c] ss:$28 sps:$4 sm:$0xff]  }
  0x60   :  { %2958 = vmatprep.subr.bf16.mxu0 %v11784_v37  ;;  %3122 = vmatprep.subr.bf16.mxu1 %v11787_v38  ;;  %v11868_v37 = vld [vmem:[%s17365_s1 + $0x850] ss:$28 sps:$4 sm:$0xff]   ;;  %v11871_v38 = vld [vmem:[%s17365_s1 + $0x858] ss:$28 sps:$4 sm:$0xff]  }
  0x63   :  { %2959 = vmatpush1.bf16.msra.mxu0 %v11782_v39  ;;  %3123 = vmatpush1.bf16.msra.mxu1 %v11785_v40  ;;  %v11876_v39 = vld [vmem:[%s17365_s1 + $0x88c] ss:$28 sps:$4 sm:$0xff]   ;;  %v11879_v40 = vld [vmem:[%s17365_s1 + $0x894] ss:$28 sps:$4 sm:$0xff]  }
  0x64   :  { %2960 = vmatprep.subr.bf16.mxu0 %v11790_v41  ;;  %3124 = vmatprep.subr.bf16.mxu1 %v11793_v42  ;;  %v11874_v41 = vld [vmem:[%s17365_s1 + $0x888] ss:$28 sps:$4 sm:$0xff]   ;;  %v11877_v42 = vld [vmem:[%s17365_s1 + $0x890] ss:$28 sps:$4 sm:$0xff]  }
  0x67   :  { %2961 = vmatpush1.bf16.msra.mxu0 %v11788_v43  ;;  %3125 = vmatpush1.bf16.msra.mxu1 %v11791_v44  ;;  %v11882_v43 = vld [vmem:[%s17365_s1 + $0x8c4] ss:$28 sps:$4 sm:$0xff]   ;;  %v11885_v44 = vld [vmem:[%s17365_s1 + $0x8cc] ss:$28 sps:$4 sm:$0xff]  }
  0x68   :  { %2962 = vmatprep.subr.bf16.mxu0 %v11796_v45  ;;  %3126 = vmatprep.subr.bf16.mxu1 %v11799_v46  ;;  %v11880_v45 = vld [vmem:[%s17365_s1 + $0x8c0] ss:$28 sps:$4 sm:$0xff]   ;;  %v11883_v46 = vld [vmem:[%s17365_s1 + $0x8c8] ss:$28 sps:$4 sm:$0xff]  }
  0x6b   :  { %2963 = vmatpush1.bf16.msra.mxu0 %v11794_v47  ;;  %3127 = vmatpush1.bf16.msra.mxu1 %v11797_v49  ;;  %v11888_v47 = vld [vmem:[%s17365_s1 + $0x8fc] ss:$28 sps:$4 sm:$0xff]   ;;  %v11891_v49 = vld [vmem:[%s17365_s1 + $0x904] ss:$28 sps:$4 sm:$0xff]  }
  0x6c   :  { %2964 = vmatprep.subr.bf16.mxu0 %v11802_v50  ;;  %3128 = vmatprep.subr.bf16.mxu1 %v11805_v51  ;;  %v11886_v50 = vld [vmem:[%s17365_s1 + $0x8f8] ss:$28 sps:$4 sm:$0xff]   ;;  %v11889_v51 = vld [vmem:[%s17365_s1 + $0x900] ss:$28 sps:$4 sm:$0xff]  }
  0x6f   :  { %2965 = vmatpush1.bf16.msra.mxu0 %v11800_v52  ;;  %3129 = vmatpush1.bf16.msra.mxu1 %v11803_v53  ;;  %v11894_v52 = vld [vmem:[%s17365_s1 + $0x934] ss:$28 sps:$4 sm:$0xff]   ;;  %v11897_v53 = vld [vmem:[%s17365_s1 + $0x93c] ss:$28 sps:$4 sm:$0xff]  }
  0x70   :  { %2966 = vmatprep.subr.bf16.mxu0 %v11808_v54  ;;  %3130 = vmatprep.subr.bf16.mxu1 %v11811_v55  ;;  %v11892_v54 = vld [vmem:[%s17365_s1 + $0x930] ss:$28 sps:$4 sm:$0xff]   ;;  %v11895_v55 = vld [vmem:[%s17365_s1 + $0x938] ss:$28 sps:$4 sm:$0xff]  }
  0x73   :  { %2967 = vmatpush1.bf16.msra.mxu0 %v11806_v56  ;;  %3131 = vmatpush1.bf16.msra.mxu1 %v11809_v57  ;;  %v11900_v56 = vld [vmem:[%s17365_s1 + $0x96c] ss:$28 sps:$4 sm:$0xff]   ;;  %v11903_v57 = vld [vmem:[%s17365_s1 + $0x974] ss:$28 sps:$4 sm:$0xff]  }
  0x74   :  { %2968 = vmatprep.subr.bf16.mxu0 %v11814_v58  ;;  %3132 = vmatprep.subr.bf16.mxu1 %v11817_v59  ;;  %v11898_v58 = vld [vmem:[%s17365_s1 + $0x968] ss:$28 sps:$4 sm:$0xff]   ;;  %v11901_v59 = vld [vmem:[%s17365_s1 + $0x970] ss:$28 sps:$4 sm:$0xff]  }
  0x77   :  { %2969 = vmatpush1.bf16.msra.mxu0 %v11812_v60  ;;  %3133 = vmatpush1.bf16.msra.mxu1 %v11815_v61  ;;  %v11906_v60 = vld [vmem:[%s17365_s1 + $0x9a4] ss:$28 sps:$4 sm:$0xff]   ;;  %v11909_v61 = vld [vmem:[%s17365_s1 + $0x9ac] ss:$28 sps:$4 sm:$0xff]  }
  0x78   :  { %2970 = vmatprep.subr.bf16.mxu0 %v11820_v62  ;;  %3134 = vmatprep.subr.bf16.mxu1 %v11823_v63  ;;  %v11904_v62 = vld [vmem:[%s17365_s1 + $0x9a0] ss:$28 sps:$4 sm:$0xff]   ;;  %v11907_v63 = vld [vmem:[%s17365_s1 + $0x9a8] ss:$28 sps:$4 sm:$0xff]  }
  0x7b   :  { %2971 = vmatpush1.bf16.msra.mxu0 %v11818_v0  ;;  %3135 = vmatpush1.bf16.msra.mxu1 %v11821_v1  ;;  %v11912_v0 = vld [vmem:[%s17365_s1 + $0x9dc] ss:$28 sps:$4 sm:$0xff]   ;;  %v11915_v1 = vld [vmem:[%s17365_s1 + $0x9e4] ss:$28 sps:$4 sm:$0xff]  }
  0x7c   :  { %2972 = vmatprep.subr.bf16.mxu0 %v11826_v2  ;;  %3136 = vmatprep.subr.bf16.mxu1 %v11829_v3  ;;  %v11910_v2 = vld [vmem:[%s17365_s1 + $0x9d8] ss:$28 sps:$4 sm:$0xff]   ;;  %v11913_v3 = vld [vmem:[%s17365_s1 + $0x9e0] ss:$28 sps:$4 sm:$0xff]  }
  0x7f   :  { %2973 = vmatpush1.bf16.msra.mxu0 %v11824_v4  ;;  %3137 = vmatpush1.bf16.msra.mxu1 %v11827_v6  ;;  %v11918_v4 = vld [vmem:[%s17365_s1 + $0xa14] ss:$28 sps:$4 sm:$0xff]   ;;  %v11921_v6 = vld [vmem:[%s17365_s1 + $0xa1c] ss:$28 sps:$4 sm:$0xff]  }
  0x80   :  { %2983 = vmatprep.subr.bf16.mxu0 %v11833_v7  ;;  %3147 = vmatprep.subr.bf16.mxu1 %v11836_v8  ;;  %v11916_v7 = vld [vmem:[%s17365_s1 + $0xa10] ss:$28 sps:$4 sm:$0xff]   ;;  %v11919_v8 = vld [vmem:[%s17365_s1 + $0xa18] ss:$28 sps:$4 sm:$0xff]  }
  0x82   :  { %2975 = vmatmul.mubr.bf16.vlgmr.msra.gmra.mrb[0].mxu0 %v13828_v10  ;;  %3139 = vmatmul.mubr.bf16.vlgmr.msra.gmra.mrb[0].mxu1 %v13828_v10 }
  0x83   :  { %2984 = vmatpush1.bf16.msra.mxu0 %v11831_v9  ;;  %3148 = vmatpush1.bf16.msra.mxu1 %v11834_v11  ;;  %v11924_v9 = vld [vmem:[%s17365_s1 + $0xa4c] ss:$28 sps:$4 sm:$0xff]   ;;  %v11927_v11 = vld [vmem:[%s17365_s1 + $0xa54] ss:$28 sps:$4 sm:$0xff]  }
  0x84   :  { %2985 = vmatprep.subr.bf16.mxu0 %v11840_v12  ;;  %3149 = vmatprep.subr.bf16.mxu1 %v11843_v14  ;;  %v11922_v12 = vld [vmem:[%s17365_s1 + $0xa48] ss:$28 sps:$4 sm:$0xff]   ;;  %v11925_v14 = vld [vmem:[%s17365_s1 + $0xa50] ss:$28 sps:$4 sm:$0xff]  }
  0x85   :  { %3015 = vmatprep.mubr.bf16.mxu0 %v13846_v15  ;;  %3179 = vmatprep.mubr.bf16.mxu1 %v13846_v15 }
  0x87   :  { %2986 = vmatpush1.bf16.msra.mxu0 %v11838_v16  ;;  %3150 = vmatpush1.bf16.msra.mxu1 %v11841_v17  ;;  %v11931_v16 = vld [vmem:[%s17365_s1 + $0xa84] ss:$28 sps:$4 sm:$0xff]   ;;  %v11934_v17 = vld [vmem:[%s17365_s1 + $0xa8c] ss:$28 sps:$4 sm:$0xff]  }
  0x88   :  { %2987 = vmatprep.subr.bf16.mxu0 %v11846_v18  ;;  %3151 = vmatprep.subr.bf16.mxu1 %v11849_v19  ;;  %v11929_v18 = vld [vmem:[%s17365_s1 + $0xa80] ss:$28 sps:$4 sm:$0xff]   ;;  %v11932_v19 = vld [vmem:[%s17365_s1 + $0xa88] ss:$28 sps:$4 sm:$0xff]  }
  0x8b   :  { %2988 = vmatpush1.bf16.msra.mxu0 %v11844_v20  ;;  %3152 = vmatpush1.bf16.msra.mxu1 %v11847_v21  ;;  %v14040_v20 = vcombine.low %v13839_v13, %v13839_v13  ;;  %v14045_v21 = vld [vmem:[%s17366_s0 + $0x18] sm:$0xff] }
  0x8c   :  { %2989 = vmatprep.subr.bf16.mxu0 %v11852_v22  ;;  %3153 = vmatprep.subr.bf16.mxu1 %v11855_v23  ;;  %v11938_v22 = vld [vmem:[%s17365_s1 + $0xabc] ss:$28 sps:$4 sm:$0xff]   ;;  %v11941_v23 = vld [vmem:[%s17365_s1 + $0xac4] ss:$28 sps:$4 sm:$0xff]  }
  0x8d   :  { %v11936_v13 = vld [vmem:[%s17365_s1 + $0xab8] ss:$28 sps:$4 sm:$0xff]  }
  0x8f   :  { %2990 = vmatpush1.bf16.msra.mxu0 %v11850_v24  ;;  %3154 = vmatpush1.bf16.msra.mxu1 %v11853_v25  ;;  %v11939_v24 = vld [vmem:[%s17365_s1 + $0xac0] ss:$28 sps:$4 sm:$0xff]   ;;  %v14061_v25 = vcombine.high %v14045_v21, %v14045_v21 }
  0x90   :  { %2991 = vmatprep.subr.bf16.mxu0 %v11858_v26  ;;  %3155 = vmatprep.subr.bf16.mxu1 %v11861_v27  ;;  %v11944_v26 = vld [vmem:[%s17365_s1 + $0xaf4] ss:$28 sps:$4 sm:$0xff]   ;;  %v11947_v27 = vld [vmem:[%s17365_s1 + $0xafc] ss:$28 sps:$4 sm:$0xff]  }
  0x93   :  { %2992 = vmatpush1.bf16.msra.mxu0 %v11856_v28  ;;  %3156 = vmatpush1.bf16.msra.mxu1 %v11859_v29  ;;  %v11942_v28 = vld [vmem:[%s17365_s1 + $0xaf0] ss:$28 sps:$4 sm:$0xff]   ;;  %v11945_v29 = vld [vmem:[%s17365_s1 + $0xaf8] ss:$28 sps:$4 sm:$0xff]  }
  0x94   :  { %2993 = vmatprep.subr.bf16.mxu0 %v11864_v31  ;;  %3157 = vmatprep.subr.bf16.mxu1 %v11867_v32  ;;  %v11950_v31 = vld [vmem:[%s17365_s1 + $0xb2c] ss:$28 sps:$4 sm:$0xff]   ;;  %v11953_v32 = vld [vmem:[%s17365_s1 + $0xb34] ss:$28 sps:$4 sm:$0xff]  }
  0x97   :  { %2994 = vmatpush1.bf16.msra.mxu0 %v11862_v33  ;;  %3158 = vmatpush1.bf16.msra.mxu1 %v11865_v34  ;;  %v11948_v33 = vld [vmem:[%s17365_s1 + $0xb28] ss:$28 sps:$4 sm:$0xff]   ;;  %v11951_v34 = vld [vmem:[%s17365_s1 + $0xb30] ss:$28 sps:$4 sm:$0xff]  }
  0x98   :  { %2995 = vmatprep.subr.bf16.mxu0 %v11870_v35  ;;  %3159 = vmatprep.subr.bf16.mxu1 %v11873_v36  ;;  %v11956_v35 = vld [vmem:[%s17365_s1 + $0xb64] ss:$28 sps:$4 sm:$0xff]   ;;  %v11959_v36 = vld [vmem:[%s17365_s1 + $0xb6c] ss:$28 sps:$4 sm:$0xff]  }
  0x9b   :  { %2996 = vmatpush1.bf16.msra.mxu0 %v11868_v37  ;;  %3160 = vmatpush1.bf16.msra.mxu1 %v11871_v38  ;;  %v11954_v37 = vld [vmem:[%s17365_s1 + $0xb60] ss:$28 sps:$4 sm:$0xff]   ;;  %v11957_v38 = vld [vmem:[%s17365_s1 + $0xb68] ss:$28 sps:$4 sm:$0xff]  }
  0x9c   :  { %2997 = vmatprep.subr.bf16.mxu0 %v11876_v39  ;;  %3161 = vmatprep.subr.bf16.mxu1 %v11879_v40  ;;  %v11962_v39 = vld [vmem:[%s17365_s1 + $0xb9c] ss:$28 sps:$4 sm:$0xff]   ;;  %v11965_v40 = vld [vmem:[%s17365_s1 + $0xba4] ss:$28 sps:$4 sm:$0xff]  }
  0x9f   :  { %2998 = vmatpush1.bf16.msra.mxu0 %v11874_v41  ;;  %3162 = vmatpush1.bf16.msra.mxu1 %v11877_v42  ;;  %v11960_v41 = vld [vmem:[%s17365_s1 + $0xb98] ss:$28 sps:$4 sm:$0xff]   ;;  %v11963_v42 = vld [vmem:[%s17365_s1 + $0xba0] ss:$28 sps:$4 sm:$0xff]  }
  0xa0   :  { %2999 = vmatprep.subr.bf16.mxu0 %v11882_v43  ;;  %3163 = vmatprep.subr.bf16.mxu1 %v11885_v44  ;;  %v11968_v43 = vld [vmem:[%s17365_s1 + $0xbd4] ss:$28 sps:$4 sm:$0xff]   ;;  %v11971_v44 = vld [vmem:[%s17365_s1 + $0xbdc] ss:$28 sps:$4 sm:$0xff]  }
  0xa3   :  { %3000 = vmatpush1.bf16.msra.mxu0 %v11880_v45  ;;  %3164 = vmatpush1.bf16.msra.mxu1 %v11883_v46  ;;  %v11966_v45 = vld [vmem:[%s17365_s1 + $0xbd0] ss:$28 sps:$4 sm:$0xff]   ;;  %v11969_v46 = vld [vmem:[%s17365_s1 + $0xbd8] ss:$28 sps:$4 sm:$0xff]  }
  0xa4   :  { %3001 = vmatprep.subr.bf16.mxu0 %v11888_v47  ;;  %3165 = vmatprep.subr.bf16.mxu1 %v11891_v49  ;;  %v11974_v47 = vld [vmem:[%s17365_s1 + $0xc0c] ss:$28 sps:$4 sm:$0xff]   ;;  %v11977_v49 = vld [vmem:[%s17365_s1 + $0xc14] ss:$28 sps:$4 sm:$0xff]  }
  0xa7   :  { %3002 = vmatpush1.bf16.msra.mxu0 %v11886_v50  ;;  %3166 = vmatpush1.bf16.msra.mxu1 %v11889_v51  ;;  %v11972_v50 = vld [vmem:[%s17365_s1 + $0xc08] ss:$28 sps:$4 sm:$0xff]   ;;  %v11975_v51 = vld [vmem:[%s17365_s1 + $0xc10] ss:$28 sps:$4 sm:$0xff]  }
  0xa8   :  { %3003 = vmatprep.subr.bf16.mxu0 %v11894_v52  ;;  %3167 = vmatprep.subr.bf16.mxu1 %v11897_v53  ;;  %v11980_v52 = vld [vmem:[%s17365_s1 + $0xc44] ss:$28 sps:$4 sm:$0xff]   ;;  %v11983_v53 = vld [vmem:[%s17365_s1 + $0xc4c] ss:$28 sps:$4 sm:$0xff]  }
  0xab   :  { %3004 = vmatpush1.bf16.msra.mxu0 %v11892_v54  ;;  %3168 = vmatpush1.bf16.msra.mxu1 %v11895_v55  ;;  %v11978_v54 = vld [vmem:[%s17365_s1 + $0xc40] ss:$28 sps:$4 sm:$0xff]   ;;  %v11981_v55 = vld [vmem:[%s17365_s1 + $0xc48] ss:$28 sps:$4 sm:$0xff]  }
  0xac   :  { %3005 = vmatprep.subr.bf16.mxu0 %v11900_v56  ;;  %3169 = vmatprep.subr.bf16.mxu1 %v11903_v57  ;;  %v11986_v56 = vld [vmem:[%s17365_s1 + $0xc7c] ss:$28 sps:$4 sm:$0xff]   ;;  %v11989_v57 = vld [vmem:[%s17365_s1 + $0xc84] ss:$28 sps:$4 sm:$0xff]  }
  0xaf   :  { %3006 = vmatpush1.bf16.msra.mxu0 %v11898_v58  ;;  %3170 = vmatpush1.bf16.msra.mxu1 %v11901_v59  ;;  %v11984_v58 = vld [vmem:[%s17365_s1 + $0xc78] ss:$28 sps:$4 sm:$0xff]   ;;  %v11987_v59 = vld [vmem:[%s17365_s1 + $0xc80] ss:$28 sps:$4 sm:$0xff]  }
  0xb0   :  { %3007 = vmatprep.subr.bf16.mxu0 %v11906_v60  ;;  %3171 = vmatprep.subr.bf16.mxu1 %v11909_v61  ;;  %v11992_v60 = vld [vmem:[%s17365_s1 + $0xcb4] ss:$28 sps:$4 sm:$0xff]   ;;  %v11995_v61 = vld [vmem:[%s17365_s1 + $0xcbc] ss:$28 sps:$4 sm:$0xff]  }
  0xb3   :  { %3008 = vmatpush1.bf16.msra.mxu0 %v11904_v62  ;;  %3172 = vmatpush1.bf16.msra.mxu1 %v11907_v63  ;;  %v11990_v62 = vld [vmem:[%s17365_s1 + $0xcb0] ss:$28 sps:$4 sm:$0xff]   ;;  %v11993_v63 = vld [vmem:[%s17365_s1 + $0xcb8] ss:$28 sps:$4 sm:$0xff]  }
  0xb4   :  { %3009 = vmatprep.subr.bf16.mxu0 %v11912_v0  ;;  %3173 = vmatprep.subr.bf16.mxu1 %v11915_v1  ;;  %v11998_v0 = vld [vmem:[%s17365_s1 + $0xcec] ss:$28 sps:$4 sm:$0xff]   ;;  %v12001_v1 = vld [vmem:[%s17365_s1 + $0xcf4] ss:$28 sps:$4 sm:$0xff]  }
  0xb7   :  { %3010 = vmatpush1.bf16.msra.mxu0 %v11910_v2  ;;  %3174 = vmatpush1.bf16.msra.mxu1 %v11913_v3  ;;  %v11996_v2 = vld [vmem:[%s17365_s1 + $0xce8] ss:$28 sps:$4 sm:$0xff]   ;;  %v11999_v3 = vld [vmem:[%s17365_s1 + $0xcf0] ss:$28 sps:$4 sm:$0xff]  }
  0xb8   :  { %3011 = vmatprep.subr.bf16.mxu0 %v11918_v4  ;;  %3175 = vmatprep.subr.bf16.mxu1 %v11921_v6  ;;  %v12004_v4 = vld [vmem:[%s17365_s1 + $0xd24] ss:$28 sps:$4 sm:$0xff]   ;;  %v12007_v6 = vld [vmem:[%s17365_s1 + $0xd2c] ss:$28 sps:$4 sm:$0xff]  }
  0xbb   :  { %3012 = vmatpush1.bf16.msra.mxu0 %v11916_v7  ;;  %3176 = vmatpush1.bf16.msra.mxu1 %v11919_v8  ;;  %v12002_v7 = vld [vmem:[%s17365_s1 + $0xd20] ss:$28 sps:$4 sm:$0xff]   ;;  %v12005_v8 = vld [vmem:[%s17365_s1 + $0xd28] ss:$28 sps:$4 sm:$0xff]  }
  0xbc   :  { %3013 = vmatprep.subr.bf16.mxu0 %v11924_v9  ;;  %3177 = vmatprep.subr.bf16.mxu1 %v11927_v11  ;;  %v12010_v9 = vld [vmem:[%s17365_s1 + $0xd5c] ss:$28 sps:$4 sm:$0xff]   ;;  %v12013_v11 = vld [vmem:[%s17365_s1 + $0xd64] ss:$28 sps:$4 sm:$0xff]  }
  0xbf   :  { %3014 = vmatpush1.bf16.msra.mxu0 %v11922_v12  ;;  %3178 = vmatpush1.bf16.msra.mxu1 %v11925_v14  ;;  %v12008_v12 = vld [vmem:[%s17365_s1 + $0xd58] ss:$28 sps:$4 sm:$0xff]   ;;  %v12011_v14 = vld [vmem:[%s17365_s1 + $0xd60] ss:$28 sps:$4 sm:$0xff]  }
  0xc0   :  { %3024 = vmatprep.subr.bf16.mxu0 %v11931_v16  ;;  %3188 = vmatprep.subr.bf16.mxu1 %v11934_v17  ;;  %v12016_v16 = vld [vmem:[%s17365_s1 + $0xd94] ss:$28 sps:$4 sm:$0xff]   ;;  %v12019_v17 = vld [vmem:[%s17365_s1 + $0xd9c] ss:$28 sps:$4 sm:$0xff]  }
  0xc2   :  { %3016 = vmatmul.mubr.bf16.vlgmr.msra.gmra.mrb[0].mxu0 %v14040_v20  ;;  %3180 = vmatmul.mubr.bf16.vlgmr.msra.gmra.mrb[0].mxu1 %v14040_v20 }
  0xc3   :  { %3025 = vmatpush1.bf16.msra.mxu0 %v11929_v18  ;;  %3189 = vmatpush1.bf16.msra.mxu1 %v11932_v19  ;;  %v12014_v18 = vld [vmem:[%s17365_s1 + $0xd90] ss:$28 sps:$4 sm:$0xff]   ;;  %v12017_v19 = vld [vmem:[%s17365_s1 + $0xd98] ss:$28 sps:$4 sm:$0xff]  }
  0xc4   :  { %3026 = vmatprep.subr.bf16.mxu0 %v11938_v22  ;;  %3190 = vmatprep.subr.bf16.mxu1 %v11941_v23  ;;  %v12022_v22 = vld [vmem:[%s17365_s1 + $0xdcc] ss:$28 sps:$4 sm:$0xff]   ;;  %v12025_v23 = vld [vmem:[%s17365_s1 + $0xdd4] ss:$28 sps:$4 sm:$0xff]  }
  0xc5   :  { %3056 = vmatprep.mubr.bf16.mxu0 %v14061_v25  ;;  %3220 = vmatprep.mubr.bf16.mxu1 %v14061_v25 }
  0xc7   :  { %3027 = vmatpush1.bf16.msra.mxu0 %v11936_v13  ;;  %3191 = vmatpush1.bf16.msra.mxu1 %v11939_v24  ;;  %v12020_v13 = vld [vmem:[%s17365_s1 + $0xdc8] ss:$28 sps:$4 sm:$0xff]   ;;  %v12023_v24 = vld [vmem:[%s17365_s1 + $0xdd0] ss:$28 sps:$4 sm:$0xff]  }
  0xc8   :  { %3028 = vmatprep.subr.bf16.mxu0 %v11944_v26  ;;  %3192 = vmatprep.subr.bf16.mxu1 %v11947_v27  ;;  %v12030_v26 = vld [vmem:[%s17365_s1 + $0x14] ss:$28 sps:$4 sm:$0xff]  }
  0xc9   :  { %v12112_v27 = vld [vmem:[%s17365_s1 + $0x558] ss:$28 sps:$4 sm:$0xff]  }
  0xcb   :  { %3029 = vmatpush1.bf16.msra.mxu0 %v11942_v28  ;;  %3193 = vmatpush1.bf16.msra.mxu1 %v11945_v29  ;;  %v14243_v28 = vcombine.low %v14045_v21, %v14045_v21  ;;  %v12028_v29 = vld [vmem:[%s17365_s1 + $0x10] ss:$28 sps:$4 sm:$0xff]  }
  0xcc   :  { %3030 = vmatprep.subr.bf16.mxu0 %v11950_v31  ;;  %3194 = vmatprep.subr.bf16.mxu1 %v11953_v32  ;;  %v12033_v31 = vld [vmem:[%s17365_s1 + $0x4c] ss:$28 sps:$4 sm:$0xff]   ;;  %v12116_v32 = vld [vmem:[%s17365_s1 + $0x398] ss:$28 sps:$4 sm:$0xff]  }
  0xcd   :  { %v12117_v21 = vld [vmem:[%s17365_s1 + $0x590] ss:$28 sps:$4 sm:$0xff]  }
  0xcf   :  { %3031 = vmatpush1.bf16.msra.mxu0 %v11948_v33  ;;  %3195 = vmatpush1.bf16.msra.mxu1 %v11951_v34  ;;  %v12031_v33 = vld [vmem:[%s17365_s1 + $0x48] ss:$28 sps:$4 sm:$0xff]  }
  0xd0   :  { %3032 = vmatprep.subr.bf16.mxu0 %v11956_v35  ;;  %3196 = vmatprep.subr.bf16.mxu1 %v11959_v36  ;;  %v12036_v34 = vld [vmem:[%s17365_s1 + $0x84] ss:$28 sps:$4 sm:$0xff]   ;;  %v12121_v35 = vld [vmem:[%s17365_s1 + $0x3d0] ss:$28 sps:$4 sm:$0xff]  }
  0xd1   :  { %v12122_v36 = vld [vmem:[%s17365_s1 + $0x5c8] ss:$28 sps:$4 sm:$0xff]  }
  0xd3   :  { %3033 = vmatpush1.bf16.msra.mxu0 %v11954_v37  ;;  %3197 = vmatpush1.bf16.msra.mxu1 %v11957_v38  ;;  %v12034_v37 = vld [vmem:[%s17365_s1 + $0x80] ss:$28 sps:$4 sm:$0xff]  }
  0xd4   :  { %3034 = vmatprep.subr.bf16.mxu0 %v11962_v39  ;;  %3198 = vmatprep.subr.bf16.mxu1 %v11965_v40  ;;  %v12039_v38 = vld [vmem:[%s17365_s1 + $0xbc] ss:$28 sps:$4 sm:$0xff]   ;;  %v12126_v39 = vld [vmem:[%s17365_s1 + $0x408] ss:$28 sps:$4 sm:$0xff]  }
  0xd5   :  { %v12127_v40 = vld [vmem:[%s17365_s1 + $0x600] ss:$28 sps:$4 sm:$0xff]  }
  0xd7   :  { %3035 = vmatpush1.bf16.msra.mxu0 %v11960_v41  ;;  %3199 = vmatpush1.bf16.msra.mxu1 %v11963_v42  ;;  %v12037_v41 = vld [vmem:[%s17365_s1 + $0xb8] ss:$28 sps:$4 sm:$0xff]  }
  0xd8   :  { %3036 = vmatprep.subr.bf16.mxu0 %v11968_v43  ;;  %3200 = vmatprep.subr.bf16.mxu1 %v11971_v44  ;;  %v12042_v42 = vld [vmem:[%s17365_s1 + $0xf4] ss:$28 sps:$4 sm:$0xff]   ;;  %v12131_v43 = vld [vmem:[%s17365_s1 + $0x440] ss:$28 sps:$4 sm:$0xff]  }
  0xd9   :  { %v12132_v44 = vld [vmem:[%s17365_s1 + $0x638] ss:$28 sps:$4 sm:$0xff]  }
  0xdb   :  { %3037 = vmatpush1.bf16.msra.mxu0 %v11966_v45  ;;  %3201 = vmatpush1.bf16.msra.mxu1 %v11969_v46  ;;  %v12040_v45 = vld [vmem:[%s17365_s1 + $0xf0] ss:$28 sps:$4 sm:$0xff]  }
  0xdc   :  { %3038 = vmatprep.subr.bf16.mxu0 %v11974_v47  ;;  %3202 = vmatprep.subr.bf16.mxu1 %v11977_v49  ;;  %v12045_v46 = vld [vmem:[%s17365_s1 + $0x12c] ss:$28 sps:$4 sm:$0xff]   ;;  %v12136_v47 = vld [vmem:[%s17365_s1 + $0x478] ss:$28 sps:$4 sm:$0xff]  }
  0xdd   :  { %v12137_v49 = vld [vmem:[%s17365_s1 + $0x670] ss:$28 sps:$4 sm:$0xff]  }
  0xdf   :  { %3039 = vmatpush1.bf16.msra.mxu0 %v11972_v50  ;;  %3203 = vmatpush1.bf16.msra.mxu1 %v11975_v51  ;;  %v12043_v50 = vld [vmem:[%s17365_s1 + $0x128] ss:$28 sps:$4 sm:$0xff]  }
  0xe0   :  { %3040 = vmatprep.subr.bf16.mxu0 %v11980_v52  ;;  %3204 = vmatprep.subr.bf16.mxu1 %v11983_v53  ;;  %v12048_v51 = vld [vmem:[%s17365_s1 + $0x164] ss:$28 sps:$4 sm:$0xff]   ;;  %v12141_v52 = vld [vmem:[%s17365_s1 + $0x4b0] ss:$28 sps:$4 sm:$0xff]  }
  0xe1   :  { %v12142_v53 = vld [vmem:[%s17365_s1 + $0x6a8] ss:$28 sps:$4 sm:$0xff]  }
  0xe3   :  { %3041 = vmatpush1.bf16.msra.mxu0 %v11978_v54  ;;  %3205 = vmatpush1.bf16.msra.mxu1 %v11981_v55  ;;  %v12046_v54 = vld [vmem:[%s17365_s1 + $0x160] ss:$28 sps:$4 sm:$0xff]  }
  0xe4   :  { %3042 = vmatprep.subr.bf16.mxu0 %v11986_v56  ;;  %3206 = vmatprep.subr.bf16.mxu1 %v11989_v57  ;;  %v12051_v55 = vld [vmem:[%s17365_s1 + $0x19c] ss:$28 sps:$4 sm:$0xff]   ;;  %v12146_v56 = vld [vmem:[%s17365_s1 + $0x4e8] ss:$28 sps:$4 sm:$0xff]  }
  0xe5   :  { %v12147_v57 = vld [vmem:[%s17365_s1 + $0x6e0] ss:$28 sps:$4 sm:$0xff]  }
  0xe7   :  { %3043 = vmatpush1.bf16.msra.mxu0 %v11984_v58  ;;  %3207 = vmatpush1.bf16.msra.mxu1 %v11987_v59  ;;  %v12049_v58 = vld [vmem:[%s17365_s1 + $0x198] ss:$28 sps:$4 sm:$0xff]  }
  0xe8   :  { %3044 = vmatprep.subr.bf16.mxu0 %v11992_v60  ;;  %3208 = vmatprep.subr.bf16.mxu1 %v11995_v61  ;;  %v12054_v59 = vld [vmem:[%s17365_s1 + $0x1d4] ss:$28 sps:$4 sm:$0xff]   ;;  %v12151_v60 = vld [vmem:[%s17365_s1 + $0x520] ss:$28 sps:$4 sm:$0xff]  }
  0xe9   :  { %v12152_v61 = vld [vmem:[%s17365_s1 + $0x8d8] ss:$28 sps:$4 sm:$0xff]  }
  0xeb   :  { %3045 = vmatpush1.bf16.msra.mxu0 %v11990_v62  ;;  %3209 = vmatpush1.bf16.msra.mxu1 %v11993_v63  ;;  %v12052_v62 = vld [vmem:[%s17365_s1 + $0x1d0] ss:$28 sps:$4 sm:$0xff]  }
  0xec   :  { %3046 = vmatprep.subr.bf16.mxu0 %v11998_v0  ;;  %3210 = vmatprep.subr.bf16.mxu1 %v12001_v1  ;;  %v12057_v63 = vld [vmem:[%s17365_s1 + $0x20c] ss:$28 sps:$4 sm:$0xff]   ;;  %v12156_v0 = vld [vmem:[%s17365_s1 + $0x718] ss:$28 sps:$4 sm:$0xff]  }
  0xed   :  { %v12157_v1 = vld [vmem:[%s17365_s1 + $0x910] ss:$28 sps:$4 sm:$0xff]  }
  0xef   :  { %3047 = vmatpush1.bf16.msra.mxu0 %v11996_v2  ;;  %3211 = vmatpush1.bf16.msra.mxu1 %v11999_v3  ;;  %v12055_v2 = vld [vmem:[%s17365_s1 + $0x208] ss:$28 sps:$4 sm:$0xff]  }
  0xf0   :  { %3048 = vmatprep.subr.bf16.mxu0 %v12004_v4  ;;  %3212 = vmatprep.subr.bf16.mxu1 %v12007_v6  ;;  %v12060_v3 = vld [vmem:[%s17365_s1 + $0x244] ss:$28 sps:$4 sm:$0xff]   ;;  %v12161_v4 = vld [vmem:[%s17365_s1 + $0x750] ss:$28 sps:$4 sm:$0xff]  }
  0xf1   :  { %v12162_v6 = vld [vmem:[%s17365_s1 + $0x948] ss:$28 sps:$4 sm:$0xff]  }
  0xf3   :  { %3049 = vmatpush1.bf16.msra.mxu0 %v12002_v7  ;;  %3213 = vmatpush1.bf16.msra.mxu1 %v12005_v8  ;;  %v12058_v7 = vld [vmem:[%s17365_s1 + $0x240] ss:$28 sps:$4 sm:$0xff]  }
  0xf4   :  { %3050 = vmatprep.subr.bf16.mxu0 %v12010_v9  ;;  %3214 = vmatprep.subr.bf16.mxu1 %v12013_v11  ;;  %v12063_v8 = vld [vmem:[%s17365_s1 + $0x27c] ss:$28 sps:$4 sm:$0xff]   ;;  %v12166_v9 = vld [vmem:[%s17365_s1 + $0x788] ss:$28 sps:$4 sm:$0xff]  }
  0xf5   :  { %v12167_v11 = vld [vmem:[%s17365_s1 + $0x980] ss:$28 sps:$4 sm:$0xff]  }
  0xf7   :  { %3051 = vmatpush1.bf16.msra.mxu0 %v12008_v12  ;;  %3215 = vmatpush1.bf16.msra.mxu1 %v12011_v14  ;;  %v12061_v12 = vld [vmem:[%s17365_s1 + $0x278] ss:$28 sps:$4 sm:$0xff]  }
  0xf8   :  { %3052 = vmatprep.subr.bf16.mxu0 %v12016_v16  ;;  %3216 = vmatprep.subr.bf16.mxu1 %v12019_v17  ;;  %v12066_v14 = vld [vmem:[%s17365_s1 + $0x2b4] ss:$28 sps:$4 sm:$0xff]   ;;  %v12171_v16 = vld [vmem:[%s17365_s1 + $0x7c0] ss:$28 sps:$4 sm:$0xff]  }
  0xf9   :  { %v12172_v17 = vld [vmem:[%s17365_s1 + $0x9b8] ss:$28 sps:$4 sm:$0xff]  }
  0xfb   :  { %3053 = vmatpush1.bf16.msra.mxu0 %v12014_v18  ;;  %3217 = vmatpush1.bf16.msra.mxu1 %v12017_v19  ;;  %v12064_v18 = vld [vmem:[%s17365_s1 + $0x2b0] ss:$28 sps:$4 sm:$0xff]  }
  0xfc   :  { %3054 = vmatprep.subr.bf16.mxu0 %v12022_v22  ;;  %3218 = vmatprep.subr.bf16.mxu1 %v12025_v23  ;;  %v12069_v19 = vld [vmem:[%s17365_s1 + $0x2ec] ss:$28 sps:$4 sm:$0xff]   ;;  %v12176_v22 = vld [vmem:[%s17365_s1 + $0x7f8] ss:$28 sps:$4 sm:$0xff]  }
  0xfd   :  { %v12177_v23 = vld [vmem:[%s17365_s1 + $0x9f0] ss:$28 sps:$4 sm:$0xff]  }
  0xff   :  { %3055 = vmatpush1.bf16.msra.mxu0 %v12020_v13  ;;  %3219 = vmatpush1.bf16.msra.mxu1 %v12023_v24  ;;  %v12067_v13 = vld [vmem:[%s17365_s1 + $0x2e8] ss:$28 sps:$4 sm:$0xff]  }
 0x100   :  { %3229 = vmatprep.subr.bf16.mxu0 %v12030_v26  ;;  %11307 = vmatprep.subr.bf16.mxu1 %v12112_v27  ;;  %v12072_v24 = vld [vmem:[%s17365_s1 + $0x324] ss:$28 sps:$4 sm:$0xff]   ;;  %v12181_v26 = vld [vmem:[%s17365_s1 + $0x830] ss:$28 sps:$4 sm:$0xff]  }
 0x101   :  { %v12182_v27 = vld [vmem:[%s17365_s1 + $0xa28] ss:$28 sps:$4 sm:$0xff]  }
 0x102   :  { %3057 = vmatmul.mubr.bf16.vlgmr.msra.gmra.mrb[0].mxu0 %v14243_v28  ;;  %3221 = vmatmul.mubr.bf16.vlgmr.msra.gmra.mrb[0].mxu1 %v14243_v28 }
 0x103   :  { %3230 = vmatpush1.bf16.msra.mxu0 %v12028_v29  ;;  %3261 = vmatprep.mubr.bf16.mxu0 %v13555_v48  ;;  %v12070_v29 = vld [vmem:[%s17365_s1 + $0x320] ss:$28 sps:$4 sm:$0xff]  }
 0x104   :  { %3231 = vmatprep.subr.bf16.mxu0 %v12033_v31  ;;  %11308 = vmatpush3.bf16.msra.mxu1 %v12116_v32  ;;  %v12075_v31 = vld [vmem:[%s17365_s1 + $0x35c] ss:$28 sps:$4 sm:$0xff]   ;;  %v12186_v32 = vld [vmem:[%s17365_s1 + $0x868] ss:$28 sps:$4 sm:$0xff]  }
 0x105   :  { %11309 = vmatprep.subr.bf16.mxu1 %v12117_v21  ;;  %3465 = vmatprep.mubr.bf16.mxu1 %v13699_v30  ;;  %v12187_v21 = vld [vmem:[%s17365_s1 + $0xa60] ss:$28 sps:$4 sm:$0xff]  }
 0x107   :  { %3232 = vmatpush1.bf16.msra.mxu0 %v12031_v33  ;;  %v12073_v33 = vld [vmem:[%s17365_s1 + $0x358] ss:$28 sps:$4 sm:$0xff]  }
 0x108   :  { %3233 = vmatprep.subr.bf16.mxu0 %v12036_v34  ;;  %11310 = vmatpush3.bf16.msra.mxu1 %v12121_v35  ;;  %v12078_v34 = vld [vmem:[%s17365_s1 + $0x394] ss:$28 sps:$4 sm:$0xff]   ;;  %v12191_v35 = vld [vmem:[%s17365_s1 + $0x8a0] ss:$28 sps:$4 sm:$0xff]  }
 0x109   :  { %11311 = vmatprep.subr.bf16.mxu1 %v12122_v36  ;;  %v12192_v36 = vld [vmem:[%s17365_s1 + $0xc58] ss:$28 sps:$4 sm:$0xff]  }
 0x10b   :  { %3234 = vmatpush1.bf16.msra.mxu0 %v12034_v37  ;;  %v12076_v37 = vld [vmem:[%s17365_s1 + $0x390] ss:$28 sps:$4 sm:$0xff]  }
 0x10c   :  { %3235 = vmatprep.subr.bf16.mxu0 %v12039_v38  ;;  %11312 = vmatpush3.bf16.msra.mxu1 %v12126_v39  ;;  %v12081_v38 = vld [vmem:[%s17365_s1 + $0x3cc] ss:$28 sps:$4 sm:$0xff]   ;;  %v12196_v39 = vld [vmem:[%s17365_s1 + $0xa98] ss:$28 sps:$4 sm:$0xff]  }
 0x10d   :  { %11313 = vmatprep.subr.bf16.mxu1 %v12127_v40  ;;  %v12197_v40 = vld [vmem:[%s17365_s1 + $0xc90] ss:$28 sps:$4 sm:$0xff]  }
 0x10f   :  { %3236 = vmatpush1.bf16.msra.mxu0 %v12037_v41  ;;  %v12079_v41 = vld [vmem:[%s17365_s1 + $0x3c8] ss:$28 sps:$4 sm:$0xff]  }
 0x110   :  { %3237 = vmatprep.subr.bf16.mxu0 %v12042_v42  ;;  %11314 = vmatpush3.bf16.msra.mxu1 %v12131_v43  ;;  %v12084_v42 = vld [vmem:[%s17365_s1 + $0x404] ss:$28 sps:$4 sm:$0xff]   ;;  %v12201_v43 = vld [vmem:[%s17365_s1 + $0xad0] ss:$28 sps:$4 sm:$0xff]  }
 0x111   :  { %11315 = vmatprep.subr.bf16.mxu1 %v12132_v44  ;;  %v12202_v44 = vld [vmem:[%s17365_s1 + $0xcc8] ss:$28 sps:$4 sm:$0xff]  }
 0x113   :  { %3238 = vmatpush1.bf16.msra.mxu0 %v12040_v45  ;;  %v12087_v45 = vld [vmem:[%s17365_s1 + $0x43c] ss:$28 sps:$4 sm:$0xff]  }
 0x114   :  { %3239 = vmatprep.subr.bf16.mxu0 %v12045_v46  ;;  %11316 = vmatpush3.bf16.msra.mxu1 %v12136_v47  ;;  %v12206_v46 = vld [vmem:[%s17365_s1 + $0xb08] ss:$28 sps:$4 sm:$0xff]   ;;  %v12207_v47 = vld [vmem:[%s17365_s1 + $0xd00] ss:$28 sps:$4 sm:$0xff]  }
 0x115   :  { %11317 = vmatprep.subr.bf16.mxu1 %v12137_v49  ;;  %v12085_v49 = vld [vmem:[%s17365_s1 + $0x438] ss:$28 sps:$4 sm:$0xff]  }
 0x117   :  { %3240 = vmatpush1.bf16.msra.mxu0 %v12043_v50  ;;  %v12090_v50 = vld [vmem:[%s17365_s1 + $0x474] ss:$28 sps:$4 sm:$0xff]  }
 0x118   :  { %3241 = vmatprep.subr.bf16.mxu0 %v12048_v51  ;;  %11318 = vmatpush3.bf16.msra.mxu1 %v12141_v52  ;;  %v12211_v51 = vld [vmem:[%s17365_s1 + $0xb40] ss:$28 sps:$4 sm:$0xff]   ;;  %v12212_v52 = vld [vmem:[%s17365_s1 + $0xd38] ss:$28 sps:$4 sm:$0xff]  }
 0x119   :  { %11319 = vmatprep.subr.bf16.mxu1 %v12142_v53  ;;  %v12088_v53 = vld [vmem:[%s17365_s1 + $0x470] ss:$28 sps:$4 sm:$0xff]  }
 0x11b   :  { %3242 = vmatpush1.bf16.msra.mxu0 %v12046_v54  ;;  %v12093_v54 = vld [vmem:[%s17365_s1 + $0x4ac] ss:$28 sps:$4 sm:$0xff]  }
 0x11c   :  { %3243 = vmatprep.subr.bf16.mxu0 %v12051_v55  ;;  %11320 = vmatpush3.bf16.msra.mxu1 %v12146_v56  ;;  %v12216_v55 = vld [vmem:[%s17365_s1 + $0xb78] ss:$28 sps:$4 sm:$0xff]   ;;  %v12217_v56 = vld [vmem:[%s17365_s1 + $0xd70] ss:$28 sps:$4 sm:$0xff]  }
 0x11d   :  { %11321 = vmatprep.subr.bf16.mxu1 %v12147_v57  ;;  %v12091_v57 = vld [vmem:[%s17365_s1 + $0x4a8] ss:$28 sps:$4 sm:$0xff]  }
 0x11f   :  { %3244 = vmatpush1.bf16.msra.mxu0 %v12049_v58  ;;  %v12096_v58 = vld [vmem:[%s17365_s1 + $0x4e4] ss:$28 sps:$4 sm:$0xff]  }
 0x120   :  { %3245 = vmatprep.subr.bf16.mxu0 %v12054_v59  ;;  %11322 = vmatpush3.bf16.msra.mxu1 %v12151_v60  ;;  %v12094_v59 = vld [vmem:[%s17365_s1 + $0x4e0] ss:$28 sps:$4 sm:$0xff]   ;;  %v12221_v60 = vld [vmem:[%s17365_s1 + $0xbb0] ss:$28 sps:$4 sm:$0xff]  }
 0x121   :  { %11329 = vmatprep.subr.bf16.mxu1 %v12152_v61  ;;  %v12222_v61 = vld [vmem:[%s17365_s1 + $0xda8] ss:$28 sps:$4 sm:$0xff]  }
 0x123   :  { %3246 = vmatpush1.bf16.msra.mxu0 %v12052_v62  ;;  %3466 = vmatmul.mubr.bf16.vlgmr.msra.gmra.mrb[4].mxu1 %v13828_v10  ;;  %v12099_v62 = vld [vmem:[%s17365_s1 + $0x51c] ss:$28 sps:$4 sm:$0xff]  }
 0x124   :  { %3247 = vmatprep.subr.bf16.mxu0 %v12057_v63  ;;  %11330 = vmatpush3.bf16.msra.mxu1 %v12156_v0  ;;  %v12226_v63 = vld [vmem:[%s17365_s1 + $0xbe8] ss:$28 sps:$4 sm:$0xff]   ;;  %v12097_v0 = vld [vmem:[%s17365_s1 + $0x518] ss:$28 sps:$4 sm:$0xff]  }
 0x125   :  { %11331 = vmatprep.subr.bf16.mxu1 %v12157_v1  ;;  %3505 = vmatprep.mubr.bf16.mxu1 %v13846_v15  ;;  %v12227_v1 = vld [vmem:[%s17365_s1 + $0xde0] ss:$28 sps:$4 sm:$0xff]  }
 0x127   :  { %3248 = vmatpush1.bf16.msra.mxu0 %v12055_v2  ;;  %v12102_v2 = vld [vmem:[%s17365_s1 + $0x554] ss:$28 sps:$4 sm:$0xff]  }
 0x128   :  { %3249 = vmatprep.subr.bf16.mxu0 %v12060_v3  ;;  %11332 = vmatpush3.bf16.msra.mxu1 %v12161_v4  ;;  %v12231_v3 = vld [vmem:[%s17365_s1 + $0xc20] ss:$28 sps:$4 sm:$0xff]   ;;  %v12100_v4 = vld [vmem:[%s17365_s1 + $0x550] ss:$28 sps:$4 sm:$0xff]  }
 0x129   :  { %11333 = vmatprep.subr.bf16.mxu1 %v12162_v6  ;;  %v12234_v6 = vld [vmem:[%s17367_s5 + $0x4] ss:$28 sps:$4 sm:$0xff]  }
 0x12b   :  { %3250 = vmatpush1.bf16.msra.mxu0 %v12058_v7  ;;  %v12105_v7 = vld [vmem:[%s17365_s1 + $0x58c] ss:$28 sps:$4 sm:$0xff]  }
 0x12c   :  { %3251 = vmatprep.subr.bf16.mxu0 %v12063_v8  ;;  %11334 = vmatpush3.bf16.msra.mxu1 %v12166_v9  ;;  %v12232_v8 = vld [vmem:[%s17367_s5] ss:$28 sps:$4 sm:$0xff]   ;;  %v12103_v9 = vld [vmem:[%s17365_s1 + $0x588] ss:$28 sps:$4 sm:$0xff]  }
 0x12d   :  { %11335 = vmatprep.subr.bf16.mxu1 %v12167_v11  ;;  %v12240_v11 = vld [vmem:[%s17367_s5 + $0x3c] ss:$28 sps:$4 sm:$0xff]  }
 0x12f   :  { %3252 = vmatpush1.bf16.msra.mxu0 %v12061_v12  ;;  %v12108_v12 = vld [vmem:[%s17365_s1 + $0x5c4] ss:$28 sps:$4 sm:$0xff]  }
 0x130   :  { %3253 = vmatprep.subr.bf16.mxu0 %v12066_v14  ;;  %11336 = vmatpush3.bf16.msra.mxu1 %v12171_v16  ;;  %v12238_v14 = vld [vmem:[%s17367_s5 + $0x38] ss:$28 sps:$4 sm:$0xff]   ;;  %v12106_v16 = vld [vmem:[%s17365_s1 + $0x5c0] ss:$28 sps:$4 sm:$0xff]  }
 0x131   :  { %11337 = vmatprep.subr.bf16.mxu1 %v12172_v17  ;;  %v12246_v17 = vld [vmem:[%s17367_s5 + $0x74] ss:$28 sps:$4 sm:$0xff]  }
 0x133   :  { %3254 = vmatpush1.bf16.msra.mxu0 %v12064_v18  ;;  %v12111_v18 = vld [vmem:[%s17365_s1 + $0x5fc] ss:$28 sps:$4 sm:$0xff]  }
 0x134   :  { %3255 = vmatprep.subr.bf16.mxu0 %v12069_v19  ;;  %11338 = vmatpush3.bf16.msra.mxu1 %v12176_v22  ;;  %v12244_v19 = vld [vmem:[%s17367_s5 + $0x70] ss:$28 sps:$4 sm:$0xff]   ;;  %v12109_v22 = vld [vmem:[%s17365_s1 + $0x5f8] ss:$28 sps:$4 sm:$0xff]  }
 0x135   :  { %11339 = vmatprep.subr.bf16.mxu1 %v12177_v23  ;;  %v12252_v23 = vld [vmem:[%s17367_s5 + $0xac] ss:$28 sps:$4 sm:$0xff]  }
 0x137   :  { %3256 = vmatpush1.bf16.msra.mxu0 %v12067_v13  ;;  %v12115_v13 = vld [vmem:[%s17365_s1 + $0x634] ss:$28 sps:$4 sm:$0xff]  }
 0x138   :  { %3257 = vmatprep.subr.bf16.mxu0 %v12072_v24  ;;  %11340 = vmatpush3.bf16.msra.mxu1 %v12181_v26  ;;  %v12250_v24 = vld [vmem:[%s17367_s5 + $0xa8] ss:$28 sps:$4 sm:$0xff]   ;;  %v12113_v26 = vld [vmem:[%s17365_s1 + $0x630] ss:$28 sps:$4 sm:$0xff]  }
 0x139   :  { %11341 = vmatprep.subr.bf16.mxu1 %v12182_v27  ;;  %v12258_v27 = vld [vmem:[%s17367_s5 + $0xe4] ss:$28 sps:$4 sm:$0xff]  }
 0x13b   :  { %3258 = vmatpush1.bf16.msra.mxu0 %v12070_v29  ;;  %v12120_v29 = vld [vmem:[%s17365_s1 + $0x66c] ss:$28 sps:$4 sm:$0xff]  }
 0x13c   :  { %3259 = vmatprep.subr.bf16.mxu0 %v12075_v31  ;;  %11342 = vmatpush3.bf16.msra.mxu1 %v12186_v32  ;;  %v12256_v31 = vld [vmem:[%s17367_s5 + $0xe0] ss:$28 sps:$4 sm:$0xff]   ;;  %v12118_v32 = vld [vmem:[%s17365_s1 + $0x668] ss:$28 sps:$4 sm:$0xff]  }
 0x13d   :  { %11343 = vmatprep.subr.bf16.mxu1 %v12187_v21  ;;  %v12264_v21 = vld [vmem:[%s17367_s5 + $0x11c] ss:$28 sps:$4 sm:$0xff]  }
 0x13f   :  { %3260 = vmatpush1.bf16.msra.mxu0 %v12073_v33  ;;  %v12125_v33 = vld [vmem:[%s17365_s1 + $0x6a4] ss:$28 sps:$4 sm:$0xff]  }
 0x140   :  { %3270 = vmatprep.subr.bf16.mxu0 %v12078_v34  ;;  %11344 = vmatpush3.bf16.msra.mxu1 %v12191_v35  ;;  %v12262_v34 = vld [vmem:[%s17367_s5 + $0x118] ss:$28 sps:$4 sm:$0xff]   ;;  %v12123_v35 = vld [vmem:[%s17365_s1 + $0x6a0] ss:$28 sps:$4 sm:$0xff]  }
 0x141   :  { %11351 = vmatprep.subr.bf16.mxu1 %v12192_v36  ;;  %v12270_v36 = vld [vmem:[%s17367_s5 + $0x154] ss:$28 sps:$4 sm:$0xff]  }
 0x142   :  { %3262 = vmatmul.mubr.bf16.vlgmr.msra.gmra.mrb[4].mxu0 %v13619_v5 }
 0x143   :  { %3271 = vmatpush1.bf16.msra.mxu0 %v12076_v37  ;;  %3302 = vmatprep.mubr.bf16.mxu0 %v13699_v30  ;;  %v12082_v30 = vld [vmem:[%s17365_s1 + $0x400] ss:$28 sps:$4 sm:$0xff]  }
 0x144   :  { %3272 = vmatprep.subr.bf16.mxu0 %v12081_v38  ;;  %3506 = vmatmul.mubr.bf16.vlgmr.msra.gmra.mrb[8].mxu1 %v14040_v20  ;;  %v12130_v37 = vld [vmem:[%s17365_s1 + $0x6dc] ss:$28 sps:$4 sm:$0xff]   ;;  %v12268_v38 = vld [vmem:[%s17367_s5 + $0x150] ss:$28 sps:$4 sm:$0xff]  }
 0x145   :  { %11352 = vmatpush3.bf16.msra.mxu1 %v12196_v39  ;;  %3545 = vmatprep.mubr.bf16.mxu1 %v14061_v25  ;;  %v12128_v39 = vld [vmem:[%s17365_s1 + $0x6d8] ss:$28 sps:$4 sm:$0xff]  }
 0x146   :  { %11353 = vmatprep.subr.bf16.mxu1 %v12197_v40  ;;  %v12276_v40 = vld [vmem:[%s17367_s5 + $0x18c] ss:$28 sps:$4 sm:$0xff]  }
 0x147   :  { %3273 = vmatpush1.bf16.msra.mxu0 %v12079_v41  ;;  %v12135_v41 = vld [vmem:[%s17365_s1 + $0x714] ss:$28 sps:$4 sm:$0xff]  }
 0x148   :  { %3274 = vmatprep.subr.bf16.mxu0 %v12084_v42  ;;  %v12274_v42 = vld [vmem:[%s17367_s5 + $0x188] ss:$28 sps:$4 sm:$0xff]  }
 0x149   :  { %11354 = vmatpush3.bf16.msra.mxu1 %v12201_v43  ;;  %v12133_v43 = vld [vmem:[%s17365_s1 + $0x710] ss:$28 sps:$4 sm:$0xff]  }
 0x14a   :  { %11355 = vmatprep.subr.bf16.mxu1 %v12202_v44  ;;  %v12282_v44 = vld [vmem:[%s17367_s5 + $0x1c4] ss:$28 sps:$4 sm:$0xff]  }
 0x14b   :  { %3275 = vmatpush1.bf16.msra.mxu0 %v12082_v30  ;;  %v12140_v30 = vld [vmem:[%s17365_s1 + $0x74c] ss:$28 sps:$4 sm:$0xff]  }
 0x14c   :  { %3276 = vmatprep.subr.bf16.mxu0 %v12087_v45  ;;  %v12280_v45 = vld [vmem:[%s17367_s5 + $0x1c0] ss:$28 sps:$4 sm:$0xff]  }
 0x14d   :  { %11356 = vmatpush3.bf16.msra.mxu1 %v12206_v46  ;;  %v12288_v46 = vld [vmem:[%s17367_s5 + $0x1fc] ss:$28 sps:$4 sm:$0xff]  }
 0x14e   :  { %11357 = vmatprep.subr.bf16.mxu1 %v12207_v47  ;;  %v12138_v47 = vld [vmem:[%s17365_s1 + $0x748] ss:$28 sps:$4 sm:$0xff]  }
 0x14f   :  { %3277 = vmatpush1.bf16.msra.mxu0 %v12085_v49  ;;  %v12145_v49 = vld [vmem:[%s17365_s1 + $0x784] ss:$28 sps:$4 sm:$0xff]  }
 0x150   :  { %3278 = vmatprep.subr.bf16.mxu0 %v12090_v50  ;;  %v12143_v50 = vld [vmem:[%s17365_s1 + $0x780] ss:$28 sps:$4 sm:$0xff]  }
 0x151   :  { %11358 = vmatpush3.bf16.msra.mxu1 %v12211_v51  ;;  %v12294_v51 = vld [vmem:[%s17367_s5 + $0x234] ss:$28 sps:$4 sm:$0xff]  }
 0x152   :  { %11359 = vmatprep.subr.bf16.mxu1 %v12212_v52  ;;  %v12292_v52 = vld [vmem:[%s17367_s5 + $0x230] ss:$28 sps:$4 sm:$0xff]  }
 0x153   :  { %3279 = vmatpush1.bf16.msra.mxu0 %v12088_v53  ;;  %v12300_v53 = vld [vmem:[%s17367_s5 + $0x26c] ss:$28 sps:$4 sm:$0xff]  }
 0x154   :  { %3280 = vmatprep.subr.bf16.mxu0 %v12093_v54  ;;  %v12148_v54 = vld [vmem:[%s17365_s1 + $0x7b8] ss:$28 sps:$4 sm:$0xff]  }
 0x155   :  { %11360 = vmatpush3.bf16.msra.mxu1 %v12216_v55  ;;  %v12155_v55 = vld [vmem:[%s17365_s1 + $0x7f4] ss:$28 sps:$4 sm:$0xff]  }
 0x156   :  { %11361 = vmatprep.subr.bf16.mxu1 %v12217_v56  ;;  %v12153_v56 = vld [vmem:[%s17365_s1 + $0x7f0] ss:$28 sps:$4 sm:$0xff]  }
 0x157   :  { %3281 = vmatpush1.bf16.msra.mxu0 %v12091_v57  ;;  %v12298_v57 = vld [vmem:[%s17367_s5 + $0x268] ss:$28 sps:$4 sm:$0xff]  }
 0x158   :  { %3282 = vmatprep.subr.bf16.mxu0 %v12096_v58  ;;  %v12160_v58 = vld [vmem:[%s17365_s1 + $0x82c] ss:$28 sps:$4 sm:$0xff]  }
 0x159   :  { %11362 = vmatpush3.bf16.msra.mxu1 %v12221_v60  ;;  %v12304_v60 = vld [vmem:[%s17367_s5 + $0x2a0] ss:$28 sps:$4 sm:$0xff]  }
 0x15a   :  { %11363 = vmatprep.subr.bf16.mxu1 %v12222_v61  ;;  %v12311_v61 = vld [vmem:[%s17367_s5 + $0x2dc] ss:$28 sps:$4 sm:$0xff]  }
 0x15b   :  { %3283 = vmatpush1.bf16.msra.mxu0 %v12094_v59  ;;  %v12306_v59 = vld [vmem:[%s17367_s5 + $0x2a4] ss:$28 sps:$4 sm:$0xff]  }
 0x15c   :  { %3284 = vmatprep.subr.bf16.mxu0 %v12099_v62  ;;  %v12158_v62 = vld [vmem:[%s17365_s1 + $0x828] ss:$28 sps:$4 sm:$0xff]  }
 0x15d   :  { %11364 = vmatpush3.bf16.msra.mxu1 %v12226_v63  ;;  %v12165_v63 = vld [vmem:[%s17365_s1 + $0x864] ss:$28 sps:$4 sm:$0xff]  }
 0x15e   :  { %11365 = vmatprep.subr.bf16.mxu1 %v12227_v1  ;;  %v12316_v1 = vld [vmem:[%s17367_s5 + $0x314] ss:$28 sps:$4 sm:$0xff]  }
 0x15f   :  { %3285 = vmatpush1.bf16.msra.mxu0 %v12097_v0  ;;  %v12309_v0 = vld [vmem:[%s17367_s5 + $0x2d8] ss:$28 sps:$4 sm:$0xff]  }
 0x160   :  { %3286 = vmatprep.subr.bf16.mxu0 %v12102_v2  ;;  %v12163_v2 = vld [vmem:[%s17365_s1 + $0x860] ss:$28 sps:$4 sm:$0xff]  }
 0x161   :  { %11366 = vmatpush3.bf16.msra.mxu1 %v12231_v3  ;;  %v12170_v3 = vld [vmem:[%s17365_s1 + $0x89c] ss:$28 sps:$4 sm:$0xff]  }
 0x162   :  { %6023 = vmatprep.subr.bf16.mxu1 %v12234_v6  ;;  %v12321_v6 = vld [vmem:[%s17367_s5 + $0x34c] ss:$28 sps:$4 sm:$0xff]  }
 0x163   :  { %3287 = vmatpush1.bf16.msra.mxu0 %v12100_v4  ;;  %v12314_v4 = vld [vmem:[%s17367_s5 + $0x310] ss:$28 sps:$4 sm:$0xff]  }
 0x164   :  { %3288 = vmatprep.subr.bf16.mxu0 %v12105_v7  ;;  %3546 = vmatmul.mubr.bf16.vlgmr.msra.gmra.mrb[12].mxu1 %v14243_v28  ;;  %v12168_v7 = vld [vmem:[%s17365_s1 + $0x898] ss:$28 sps:$4 sm:$0xff]  }
 0x165   :  { %6024 = vmatpush1.bf16.msra.mxu1 %v12232_v8  ;;  %v12175_v8 = vld [vmem:[%s17365_s1 + $0x8d4] ss:$28 sps:$4 sm:$0xff]  }
 0x166   :  { %6025 = vmatprep.subr.bf16.mxu1 %v12240_v11  ;;  %v12326_v11 = vld [vmem:[%s17367_s5 + $0x384] ss:$28 sps:$4 sm:$0xff]  }
 0x167   :  { %3289 = vmatpush1.bf16.msra.mxu0 %v12103_v9  ;;  %v12319_v9 = vld [vmem:[%s17367_s5 + $0x348] ss:$28 sps:$4 sm:$0xff]  }
 0x168   :  { %3290 = vmatprep.subr.bf16.mxu0 %v12108_v12  ;;  %v12173_v12 = vld [vmem:[%s17365_s1 + $0x8d0] ss:$28 sps:$4 sm:$0xff]  }
 0x169   :  { %6026 = vmatpush1.bf16.msra.mxu1 %v12238_v14  ;;  %v12180_v14 = vld [vmem:[%s17365_s1 + $0x90c] ss:$28 sps:$4 sm:$0xff]  }
 0x16a   :  { %6027 = vmatprep.subr.bf16.mxu1 %v12246_v17  ;;  %v12185_v17 = vld [vmem:[%s17365_s1 + $0x944] ss:$28 sps:$4 sm:$0xff]  }
 0x16b   :  { %3291 = vmatpush1.bf16.msra.mxu0 %v12106_v16  ;;  %v12178_v16 = vld [vmem:[%s17365_s1 + $0x908] ss:$28 sps:$4 sm:$0xff]  }
 0x16c   :  { %3292 = vmatprep.subr.bf16.mxu0 %v12111_v18  ;;  %v12183_v18 = vld [vmem:[%s17365_s1 + $0x940] ss:$28 sps:$4 sm:$0xff]  }
 0x16d   :  { %6028 = vmatpush1.bf16.msra.mxu1 %v12244_v19  ;;  %v12190_v19 = vld [vmem:[%s17365_s1 + $0x97c] ss:$28 sps:$4 sm:$0xff]  }
 0x16e   :  { %6029 = vmatprep.subr.bf16.mxu1 %v12252_v23  ;;  %v12195_v23 = vld [vmem:[%s17365_s1 + $0x9b4] ss:$28 sps:$4 sm:$0xff]  }
 0x16f   :  { %3293 = vmatpush1.bf16.msra.mxu0 %v12109_v22  ;;  %v12188_v22 = vld [vmem:[%s17365_s1 + $0x978] ss:$28 sps:$4 sm:$0xff]  }
 0x170   :  { %3294 = vmatprep.subr.bf16.mxu0 %v12115_v13  ;;  %v12193_v13 = vld [vmem:[%s17365_s1 + $0x9b0] ss:$28 sps:$4 sm:$0xff]  }
 0x171   :  { %6030 = vmatpush1.bf16.msra.mxu1 %v12250_v24  ;;  %v12200_v24 = vld [vmem:[%s17365_s1 + $0x9ec] ss:$28 sps:$4 sm:$0xff]  }
 0x172   :  { %6031 = vmatprep.subr.bf16.mxu1 %v12258_v27  ;;  %v12205_v27 = vld [vmem:[%s17365_s1 + $0xa24] ss:$28 sps:$4 sm:$0xff]  }
 0x173   :  { %3295 = vmatpush1.bf16.msra.mxu0 %v12113_v26  ;;  %v12198_v26 = vld [vmem:[%s17365_s1 + $0x9e8] ss:$28 sps:$4 sm:$0xff]  }
 0x174   :  { %3296 = vmatprep.subr.bf16.mxu0 %v12120_v29  ;;  %v12203_v29 = vld [vmem:[%s17365_s1 + $0xa20] ss:$28 sps:$4 sm:$0xff]  }
 0x175   :  { %6032 = vmatpush1.bf16.msra.mxu1 %v12256_v31  ;;  %v12210_v31 = vld [vmem:[%s17365_s1 + $0xa5c] ss:$28 sps:$4 sm:$0xff]  }
 0x176   :  { %6033 = vmatprep.subr.bf16.mxu1 %v12264_v21  ;;  %v12215_v21 = vld [vmem:[%s17365_s1 + $0xa94] ss:$28 sps:$4 sm:$0xff]  }
 0x177   :  { %3297 = vmatpush1.bf16.msra.mxu0 %v12118_v32  ;;  %v12208_v32 = vld [vmem:[%s17365_s1 + $0xa58] ss:$28 sps:$4 sm:$0xff]  }
 0x178   :  { %3298 = vmatprep.subr.bf16.mxu0 %v12125_v33  ;;  %v12213_v33 = vld [vmem:[%s17365_s1 + $0xa90] ss:$28 sps:$4 sm:$0xff]  }
 0x179   :  { %6034 = vmatpush1.bf16.msra.mxu1 %v12262_v34  ;;  %v12220_v34 = vld [vmem:[%s17365_s1 + $0xacc] ss:$28 sps:$4 sm:$0xff]  }
 0x17a   :  { %6035 = vmatprep.subr.bf16.mxu1 %v12270_v36  ;;  %v12225_v36 = vld [vmem:[%s17365_s1 + $0xb04] ss:$28 sps:$4 sm:$0xff]  }
 0x17b   :  { %3299 = vmatpush1.bf16.msra.mxu0 %v12123_v35  ;;  %v12218_v35 = vld [vmem:[%s17365_s1 + $0xac8] ss:$28 sps:$4 sm:$0xff]  }
 0x17c   :  { %3300 = vmatprep.subr.bf16.mxu0 %v12130_v37  ;;  %v12223_v37 = vld [vmem:[%s17365_s1 + $0xb00] ss:$28 sps:$4 sm:$0xff]  }
 0x17d   :  { %6036 = vmatpush1.bf16.msra.mxu1 %v12268_v38  ;;  %v12230_v38 = vld [vmem:[%s17365_s1 + $0xb3c] ss:$28 sps:$4 sm:$0xff]  }
 0x17e   :  { %6037 = vmatprep.subr.bf16.mxu1 %v12276_v40  ;;  %v12243_v40 = vld [vmem:[%s17365_s1 + $0xbac] ss:$28 sps:$4 sm:$0xff]  }
 0x17f   :  { %3301 = vmatpush1.bf16.msra.mxu0 %v12128_v39  ;;  %v12235_v39 = vld [vmem:[%s17365_s1 + $0xb70] ss:$28 sps:$4 sm:$0xff]  }
 0x180   :  { %3311 = vmatprep.subr.bf16.mxu0 %v12135_v41  ;;  %v12241_v41 = vld [vmem:[%s17365_s1 + $0xba8] ss:$28 sps:$4 sm:$0xff]  }
 0x181   :  { %6038 = vmatpush1.bf16.msra.mxu1 %v12274_v42  ;;  %v12249_v42 = vld [vmem:[%s17365_s1 + $0xbe4] ss:$28 sps:$4 sm:$0xff]  }
 0x182   :  { %3303 = vmatmul.mubr.bf16.vlgmr.msra.gmra.mrb[4].mxu0 %v13828_v10  ;;  %6039 = vmatprep.subr.bf16.mxu1 %v12282_v44  ;;  %v12286_v10 = vld [vmem:[%s17367_s5 + $0x1f8] ss:$28 sps:$4 sm:$0xff]  }
 0x183   :  { %3312 = vmatpush1.bf16.msra.mxu0 %v12133_v43  ;;  %3343 = vmatprep.mubr.bf16.mxu0 %v13846_v15  ;;  %v12150_v15 = vld [vmem:[%s17365_s1 + $0x7bc] ss:$28 sps:$4 sm:$0xff]  }
 0x184   :  { %3313 = vmatprep.subr.bf16.mxu0 %v12140_v30  ;;  %v12247_v30 = vld [vmem:[%s17365_s1 + $0xbe0] ss:$28 sps:$4 sm:$0xff]  }
 0x185   :  { %6040 = vmatpush1.bf16.msra.mxu1 %v12280_v45 }
 0x186   :  { %6041 = vmatprep.subr.bf16.mxu1 %v12288_v46 }
 0x187   :  { %3314 = vmatpush1.bf16.msra.mxu0 %v12138_v47 }
 0x188   :  { %3315 = vmatprep.subr.bf16.mxu0 %v12145_v49  ;;  %v12255_v49 = vld [vmem:[%s17365_s1 + $0xc1c] ss:$28 sps:$4 sm:$0xff]  }
 0x189   :  { %6042 = vmatpush1.bf16.msra.mxu1 %v12286_v10 }
 0x18a   :  { %6043 = vmatprep.subr.bf16.mxu1 %v12294_v51 }
 0x18b   :  { %3316 = vmatpush1.bf16.msra.mxu0 %v12143_v50 }
 0x18c   :  { %3317 = vmatprep.subr.bf16.mxu0 %v12150_v15 }
 0x18d   :  { %6044 = vmatpush1.bf16.msra.mxu1 %v12292_v52 }
 0x18e   :  { %6045 = vmatprep.subr.bf16.mxu1 %v12300_v53 }
 0x18f   :  { %3318 = vmatpush1.bf16.msra.mxu0 %v12148_v54 }
 0x190   :  { %3319 = vmatprep.subr.bf16.mxu0 %v12155_v55 }
 0x191   :  { %6046 = vmatpush1.bf16.msra.mxu1 %v12298_v57  ;;  %v12253_v57 = vld [vmem:[%s17365_s1 + $0xc18] ss:$28 sps:$4 sm:$0xff]  }
 0x192   :  { %6047 = vmatprep.subr.bf16.mxu1 %v12306_v59  ;;  %v12261_v59 = vld [vmem:[%s17365_s1 + $0xc54] ss:$28 sps:$4 sm:$0xff]  }
 0x193   :  { %3320 = vmatpush1.bf16.msra.mxu0 %v12153_v56 }
 0x194   :  { %3321 = vmatprep.subr.bf16.mxu0 %v12160_v58 }
 0x195   :  { %6048 = vmatpush1.bf16.msra.mxu1 %v12304_v60 }
 0x196   :  { %6049 = vmatprep.subr.bf16.mxu1 %v12311_v61 }
 0x197   :  { %3322 = vmatpush1.bf16.msra.mxu0 %v12158_v62 }
 0x198   :  { %3323 = vmatprep.subr.bf16.mxu0 %v12165_v63 }
 0x199   :  { %6050 = vmatpush1.bf16.msra.mxu1 %v12309_v0 }
 0x19a   :  { %6051 = vmatprep.subr.bf16.mxu1 %v12316_v1  ;;  %v12259_v1 = vld [vmem:[%s17365_s1 + $0xc50] ss:$28 sps:$4 sm:$0xff]  }
 0x19b   :  { %3324 = vmatpush1.bf16.msra.mxu0 %v12163_v2 }
 0x19c   :  { %3325 = vmatprep.subr.bf16.mxu0 %v12170_v3  ;;  %v12267_v3 = vld [vmem:[%s17365_s1 + $0xc8c] ss:$28 sps:$4 sm:$0xff]  }
 0x19d   :  { %6052 = vmatpush1.bf16.msra.mxu1 %v12314_v4 }
 0x19e   :  { %6053 = vmatprep.subr.bf16.mxu1 %v12321_v6 }
 0x19f   :  { %3326 = vmatpush1.bf16.msra.mxu0 %v12168_v7 }
 0x1a0   :  { %3327 = vmatprep.subr.bf16.mxu0 %v12175_v8 }
 0x1a1   :  { %6054 = vmatpush1.bf16.msra.mxu1 %v12319_v9 }
 0x1a2   :  { %6064 = vmatprep.subr.bf16.mxu1 %v12326_v11  ;;  %v12265_v11 = vld [vmem:[%s17365_s1 + $0xc88] ss:$28 sps:$4 sm:$0xff]  }
 0x1a3   :  { %3328 = vmatpush1.bf16.msra.mxu0 %v12173_v12 }
 0x1a4   :  { %3329 = vmatprep.subr.bf16.mxu0 %v12180_v14  ;;  %v12273_v14 = vld [vmem:[%s17365_s1 + $0xcc4] ss:$28 sps:$4 sm:$0xff]  }
 0x1a7   :  { %3330 = vmatpush1.bf16.msra.mxu0 %v12178_v16 }
 0x1a8   :  { %3331 = vmatprep.subr.bf16.mxu0 %v12185_v17 }
 0x1ab   :  { %3332 = vmatpush1.bf16.msra.mxu0 %v12183_v18 }
 0x1ac   :  { %3333 = vmatprep.subr.bf16.mxu0 %v12190_v19 }
 0x1af   :  { %3334 = vmatpush1.bf16.msra.mxu0 %v12188_v22 }
 0x1b0   :  { %3335 = vmatprep.subr.bf16.mxu0 %v12195_v23  ;;  %v12271_v23 = vld [vmem:[%s17365_s1 + $0xcc0] ss:$28 sps:$4 sm:$0xff]  }
 0x1b3   :  { %3336 = vmatpush1.bf16.msra.mxu0 %v12193_v13 }
 0x1b4   :  { %3337 = vmatprep.subr.bf16.mxu0 %v12200_v24  ;;  %v12279_v24 = vld [vmem:[%s17365_s1 + $0xcfc] ss:$28 sps:$4 sm:$0xff]  }
 0x1b7   :  { %3338 = vmatpush1.bf16.msra.mxu0 %v12198_v26 }
 0x1b8   :  { %3339 = vmatprep.subr.bf16.mxu0 %v12205_v27 }
 0x1bb   :  { %3340 = vmatpush1.bf16.msra.mxu0 %v12203_v29 }
 0x1bc   :  { %3341 = vmatprep.subr.bf16.mxu0 %v12210_v31  ;;  %v3692_v31 = vlaneseq }
 0x1bf   :  { %3342 = vmatpush1.bf16.msra.mxu0 %v12208_v32 }
 0x1c0   :  { %3352 = vmatprep.subr.bf16.mxu0 %v12215_v21 }
 0x1c2   :  { %3344 = vmatmul.mubr.bf16.vlgmr.msra.gmra.mrb[4].mxu0 %v14040_v20  ;;  %v12228_v20 = vld [vmem:[%s17365_s1 + $0xb38] ss:$28 sps:$4 sm:$0xff]  }
 0x1c3   :  { %3353 = vmatpush1.bf16.msra.mxu0 %v12213_v33  ;;  %3384 = vmatprep.mubr.bf16.mxu0 %v14061_v25  ;;  %v12237_v25 = vld [vmem:[%s17365_s1 + $0xb74] ss:$28 sps:$4 sm:$0xff]  }
 0x1c4   :  { %3354 = vmatprep.subr.bf16.mxu0 %v12220_v34  ;;  %v12277_v34 = vld [vmem:[%s17365_s1 + $0xcf8] ss:$28 sps:$4 sm:$0xff]  }
 0x1c7   :  { %3355 = vmatpush1.bf16.msra.mxu0 %v12218_v35 }
 0x1c8   :  { %3356 = vmatprep.subr.bf16.mxu0 %v12225_v36  ;;  %v12285_v36 = vld [vmem:[%s17365_s1 + $0xd34] ss:$28 sps:$4 sm:$0xff]  }
 0x1cb   :  { %3357 = vmatpush1.bf16.msra.mxu0 %v12223_v37 }
 0x1cc   :  { %3358 = vmatprep.subr.bf16.mxu0 %v12230_v38 }
 0x1cf   :  { %3359 = vmatpush1.bf16.msra.mxu0 %v12228_v20 }
 0x1d0   :  { %3360 = vmatprep.subr.bf16.mxu0 %v12237_v25  ;;  %v14875_v25 = vshrl.u32 %v3692_v31, 7 }
 0x1d3   :  { %3361 = vmatpush1.bf16.msra.mxu0 %v12235_v39 }
 0x1d4   :  { %3362 = vmatprep.subr.bf16.mxu0 %v12243_v40 }
 0x1d5   :  { %v3058_v43 = vpop.f32.mrb[0].mxu0  ;;  %v14824_v44 = vpop.f32.mrb[0].mxu1 }
 0x1d6   :  { %v3553_v45 = vrot.slane %v3058_v43, 4  ;;  %v3060_v46 = vpop.f32.mrb[1].mxu0  ;;  %v3224_v47 = vpop.f32.mrb[1].mxu1  ;;  %v3565_v32 = vrot.slane %v14824_v44, 4 }
 0x1d7   :  { %v3559_v10 = vrot.slane %v3060_v46, 4  ;;  %v3571_v50 = vrot.slane %v3224_v47, 4  ;;  %v3062_v51 = vpop.f32.mrb[2].mxu0  ;;  %3363 = vmatpush1.bf16.msra.mxu0 %v12241_v41  ;;  %v3226_v15 = vpop.f32.mrb[2].mxu1 }
 0x1d8   :  { %v3554_v52 = vadd.f32 %v3553_v45, %v3058_v43  ;;  %v3063_v53 = vpop.f32.mrb[3].mxu0  ;;  %v3227_v54 = vpop.f32.mrb[3].mxu1  ;;  %3364 = vmatprep.subr.bf16.mxu0 %v12249_v42  ;;  %v3566_v39 = vadd.f32 %v3565_v32, %v14824_v44  ;;  %v12283_v42 = vld [vmem:[%s17365_s1 + $0xd30] ss:$28 sps:$4 sm:$0xff]   ;;  %v12289_v51 = vld [vmem:[%s17365_s1 + $0xd68] ss:$28 sps:$4 sm:$0xff]  }
 0x1d9   :  { %v3560_v55 = vadd.f32 %v3559_v10, %v3060_v46  ;;  %v3572_v56 = vadd.f32 %v3571_v50, %v3224_v47 }
 0x1da   :  { %v3555_v58 = vrot.slane %v3554_v52, 2 }
 0x1db   :  { %v3561_v60 = vrot.slane %v3560_v55, 2  ;;  %v3573_v61 = vrot.slane %v3572_v56, 2  ;;  %3365 = vmatpush1.bf16.msra.mxu0 %v12247_v30  ;;  %v12291_v30 = vld [vmem:[%s17365_s1 + $0xd6c] ss:$28 sps:$4 sm:$0xff]  }
 0x1dc   :  { %v3556_v62 = vadd.f32 %v3555_v58, %v3554_v52  ;;  %3366 = vmatprep.subr.bf16.mxu0 %v12255_v49  ;;  %v3567_v49 = vrot.slane %v3566_v39, 2  ;;  %v12297_v52 = vld [vmem:[%s17365_s1 + $0xda4] ss:$28 sps:$4 sm:$0xff]  }
 0x1dd   :  { %v3562_v63 = vadd.f32 %v3561_v60, %v3560_v55  ;;  %v3574_v0 = vadd.f32 %v3573_v61, %v3572_v56  ;;  %v14894_v61 = vsub.s32 0, %v14875_v25 }
 0x1de   :  { %v3557_v2 = vrot.slane %v3556_v62, 1  ;;  %v3568_v56 = vadd.f32 %v3567_v49, %v3566_v39  ;;  %v3800_v49 = vld [vmem:[%s17370_s4 + $0x8] sm:$0xff] }
 0x1df   :  { %v3563_v4 = vrot.slane %v3562_v63, 1  ;;  %v3575_v6 = vrot.slane %v3574_v0, 1  ;;  %3367 = vmatpush1.bf16.msra.mxu0 %v12253_v57 }
 0x1e0   :  { %v3558_v7 = vadd.f32 %v3557_v2, %v3556_v62  ;;  %3368 = vmatprep.subr.bf16.mxu0 %v12261_v59  ;;  %v12295_v59 = vld [vmem:[%s17365_s1 + $0xda0] ss:$28 sps:$4 sm:$0xff]  }
 0x1e1   :  { %v3564_v8 = vadd.f32 %v3563_v4, %v3562_v63  ;;  %v3576_v9 = vadd.f32 %v3575_v6, %v3574_v0  ;;  %v12303_v62 = vld [vmem:[%s17365_s1 + $0xddc] ss:$28 sps:$4 sm:$0xff]   ;;  %v14903_v4 = vsub.s32 3, %v14875_v25 }
 0x1e2   :  { %v3598_v12 = vmul.f32 0.125, %v3558_v7 }
 0x1e3   :  { %v3599_v16 = vmul.f32 0.125, %v3564_v8  ;;  %v3601_v17 = vmul.f32 0.125, %v3576_v9  ;;  %3369 = vmatpush1.bf16.msra.mxu0 %v12259_v1  ;;  %v14900_v1 = vsub.s32 1, %v14875_v25  ;;  %v3569_v8 = vrot.slane %v3568_v56, 1  ;;  %v12301_v9 = vld [vmem:[%s17365_s1 + $0xdd8] ss:$28 sps:$4 sm:$0xff]  }
 0x1e4   :  { %v14850_v18 = vsub.f32 %v3058_v43, %v3598_v12  ;;  %3370 = vmatprep.subr.bf16.mxu0 %v12267_v3  ;;  %v12307_v12 = vld [vmem:[%s17365_s1 + $0x1d8] ss:$28 sps:$4 sm:$0xff]  }
 0x1e5   :  { %v14852_v19 = vsub.f32 %v3060_v46, %v3599_v16  ;;  %v14854_v22 = vsub.f32 %v3224_v47, %v3601_v17  ;;  %v3570_v16 = vadd.f32 %v3569_v8, %v3568_v56  ;;  %v12308_v17 = vld [vmem:[%s17365_s1 + $0x18] ss:$28 sps:$4 sm:$0xff]  }
 0x1e6   :  { %v3612_v13 = vmul.f32 %v14850_v18, %v14850_v18  ;;  %v12329_v8 = vld [vmem:[%s17367_s5 + $0x3b8] ss:$28 sps:$4 sm:$0xff]  }
 0x1e7   :  { %v3613_v26 = vmul.f32 %v14852_v19, %v14852_v19  ;;  %v3615_v27 = vmul.f32 %v14854_v22, %v14854_v22  ;;  %3371 = vmatpush1.bf16.msra.mxu0 %v12265_v11 }
 0x1e8   :  { %v3619_v29 = vrot.slane %v3612_v13, 4  ;;  %3372 = vmatprep.subr.bf16.mxu0 %v12273_v14  ;;  %v14916_v14 = vld [vmem:[%s17368_s2] sm:$0x7f] }
 0x1e9   :  { %v3625_v21 = vrot.slane %v3613_v26, 4  ;;  %v3637_v33 = vrot.slane %v3615_v27, 4  ;;  %v3699_v32 = vrot.slane %v14916_v14, %v14900_v1 }
 0x1ea   :  { %v3620_v35 = vadd.f32 %v3619_v29, %v3612_v13  ;;  %v12312_v13 = vld [vmem:[%s17365_s1 + $0x210] ss:$28 sps:$4 sm:$0xff]  }
 0x1eb   :  { %v3626_v37 = vadd.f32 %v3625_v21, %v3613_v26  ;;  %v3638_v38 = vadd.f32 %v3637_v33, %v3615_v27  ;;  %3373 = vmatpush1.bf16.msra.mxu0 %v12271_v23  ;;  %v14924_v23 = vld [vmem:[%s17369_s3] sm:$0x7f]  ;;  %v3600_v26 = vmul.f32 0.125, %v3570_v16  ;;  %v12313_v21 = vld [vmem:[%s17365_s1 + $0x50] ss:$28 sps:$4 sm:$0xff]  }
 0x1ec   :  { %v3621_v20 = vrot.slane %v3620_v35, 2  ;;  %3374 = vmatprep.subr.bf16.mxu0 %v12279_v24  ;;  %v3695_v24 = vrot.slane %v14916_v14, %v14894_v61  ;;  %v3739_v31 = vrot.slane %v14924_v23, %v14894_v61  ;;  %v12338_v16 = vld [vmem:[%s17365_s1 + $0x168] ss:$28 sps:$4 sm:$0xff]  }
 0x1ed   :  { %v3627_v40 = vrot.slane %v3626_v37, 2  ;;  %v3639_v41 = vrot.slane %v3638_v38, 2 }
 0x1ee   :  { %v3622_v43 = vadd.f32 %v3621_v20, %v3620_v35  ;;  %v3751_v20 = vrot.slane %v14924_v23, %v14903_v4 }
 0x1ef   :  { %v3628_v45 = vadd.f32 %v3627_v40, %v3626_v37  ;;  %v3640_v46 = vadd.f32 %v3639_v41, %v3638_v38  ;;  %3375 = vmatpush1.bf16.msra.mxu0 %v12277_v34  ;;  %v3707_v34 = vrot.slane %v14916_v14, %v14903_v4  ;;  %v3743_v38 = vrot.slane %v14924_v23, %v14900_v1  ;;  %v12318_v41 = vld [vmem:[%s17365_s1 + $0x88] ss:$28 sps:$4 sm:$0xff]  }
 0x1f0   :  { %v3623_v47 = vrot.slane %v3622_v43, 1  ;;  %3376 = vmatprep.subr.bf16.mxu0 %v12285_v36  ;;  %v14947_v36 = vsub.f32 %v14824_v44, %v3600_v26  ;;  %v12322_v44 = vld [vmem:[%s17365_s1 + $0x280] ss:$28 sps:$4 sm:$0xff]   ;;  %v12341_v26 = vld [vmem:[%s17367_s5 + $0x42c] ss:$28 sps:$4 sm:$0xff]  }
 0x1f1   :  { %v3629_v10 = vrot.slane %v3628_v45, 1  ;;  %v3641_v50 = vrot.slane %v3640_v46, 1 }
 0x1f2   :  { %v3624_v15 = vadd.f32 %v3623_v47, %v3622_v43 }
 0x1f3   :  { %v3630_v53 = vadd.f32 %v3629_v10, %v3628_v45  ;;  %v3642_v54 = vadd.f32 %v3641_v50, %v3640_v46  ;;  %3377 = vmatpush1.bf16.msra.mxu0 %v12283_v42  ;;  %v3799_v45 = vld [vmem:[%s17370_s4] sm:$0xff]  ;;  %v12327_v50 = vld [vmem:[%s17365_s1 + $0x2b8] ss:$28 sps:$4 sm:$0xff]  }
 0x1f4   :  { %v3662_v55 = vmul.f32 0.125, %v3624_v15  ;;  %3378 = vmatprep.subr.bf16.mxu0 %v12291_v30  ;;  %v12323_v46 = vld [vmem:[%s17365_s1 + $0xc0] ss:$28 sps:$4 sm:$0xff]  }
 0x1f5   :  { %v3663_v57 = vmul.f32 0.125, %v3630_v53  ;;  %v3665_v58 = vmul.f32 0.125, %v3642_v54  ;;  %v3802_v15 = vld [vmem:[%s17370_s4 + $0x18] sm:$0xff] }
 0x1f6   :  { %v3669_v60 = vadd.f32 1e-05, %v3662_v55  ;;  %v11323_v63 = vpop.f32.mrb[4].mxu1 }
 0x1f7   :  { %v3670_v0 = vadd.f32 1e-05, %v3663_v57  ;;  %v3672_v2 = vadd.f32 1e-05, %v3665_v58  ;;  %3379 = vmatpush1.bf16.msra.mxu0 %v12289_v51  ;;  %v11324_v3 = vpop.f32.mrb[5].mxu1 }
 0x1f8   :  { %13284 = vrsqrt.f32 %v3669_v60  ;;  %3380 = vmatprep.subr.bf16.mxu0 %v12297_v52  ;;  %v14905_v6 = vadd.f32 %v11324_v3, %v11323_v63  ;;  %v11326_v7 = vpop.f32.mrb[6].mxu1  ;;  %v12328_v57 = vld [vmem:[%s17365_s1 + $0xf8] ss:$28 sps:$4 sm:$0xff]   ;;  %v12324_v60 = vld [vmem:[%s17367_s5 + $0x380] ss:$28 sps:$4 sm:$0xff]  }
 0x1f9   :  { %v11327_v11 = vpop.f32.mrb[7].mxu1  ;;  %13286 = vrsqrt.f32 %v3670_v0  ;;  %v12331_v0 = vld [vmem:[%s17367_s5 + $0x3bc] ss:$28 sps:$4 sm:$0xff]   ;;  %v12333_v7 = vld [vmem:[%s17365_s1 + $0x130] ss:$28 sps:$4 sm:$0xff]  }
 0x1fa   :  { %13288 = vrsqrt.f32 %v3672_v2  ;;  %v12332_v2 = vld [vmem:[%s17365_s1 + $0x2f0] ss:$28 sps:$4 sm:$0xff]  }
 0x1fb   :  { %3381 = vmatpush1.bf16.msra.mxu0 %v12295_v59 }
 0x1fc   :  { %3382 = vmatprep.subr.bf16.mxu0 %v12303_v62 }
 0x1ff   :  { %3383 = vmatpush1.bf16.msra.mxu0 %v12301_v9  ;;  %v12337_v9 = vld [vmem:[%s17365_s1 + $0x328] ss:$28 sps:$4 sm:$0xff]  }
 0x200   :  { %11285 = vmatprep.subr.bf16.mxu0 %v12307_v12  ;;  %v12336_v12 = vld [vmem:[%s17367_s5 + $0x3f4] ss:$28 sps:$4 sm:$0xff]  }
 0x202   :  { %v13285_v27 = vpop.eup %13284  ;;  %3385 = vmatmul.mubr.bf16.vlgmr.msra.gmra.mrb[4].mxu0 %v14243_v28  ;;  %v12317_v28 = vld [vmem:[%s17365_s1 + $0x248] ss:$28 sps:$4 sm:$0xff]  }
 0x203   :  { %v3683_v29 = vmul.f32 %v13285_v27, %v14850_v18  ;;  %11286 = vmatpush3.bf16.msra.mxu0 %v12308_v17  ;;  %3425 = vmatprep.mubr.bf16.mxu0 %v13555_v48  ;;  %v13287_v33 = vpop.eup %13286  ;;  %v12334_v17 = vld [vmem:[%s17367_s5 + $0x3f0] ss:$28 sps:$4 sm:$0xff]   ;;  %v12343_v27 = vld [vmem:[%s17365_s1 + $0x1a0] ss:$28 sps:$4 sm:$0xff]  }
 0x204   :  { %11287 = vmatprep.subr.bf16.mxu0 %v12312_v13  ;;  %v13289_v18 = vpop.eup %13288  ;;  %v3684_v37 = vmul.f32 %v13287_v33, %v14852_v19  ;;  %v3614_v19 = vmul.f32 %v14947_v36, %v14947_v36  ;;  %v12342_v13 = vld [vmem:[%s17365_s1 + $0x360] ss:$28 sps:$4 sm:$0xff]  }
 0x205   :  { %v3727_v35 = vmul.f32 %v3695_v24, %v3683_v29  ;;  %v3686_v48 = vmul.f32 %v13289_v18, %v14854_v22  ;;  %v12339_v29 = vld [vmem:[%s17367_s5 + $0x428] ss:$28 sps:$4 sm:$0xff]  }
 0x206   :  { %v3728_v40 = vmul.f32 %v3699_v32, %v3684_v37  ;;  %v3631_v52 = vrot.slane %v3614_v19, 4  ;;  %v12346_v32 = vld [vmem:[%s17367_s5 + $0x464] ss:$28 sps:$4 sm:$0xff]   ;;  %v12350_v37 = vld [vmem:[%s17367_s5 + $0x4d0] ss:$28 sps:$4 sm:$0xff]  }
 0x207   :  { %v3771_v39 = vadd.f32 %v3739_v31, %v3727_v35  ;;  %11288 = vmatpush3.bf16.msra.mxu0 %v12313_v21  ;;  %v3730_v42 = vmul.f32 %v3707_v34, %v3686_v48  ;;  %v12344_v21 = vld [vmem:[%s17367_s5 + $0x460] ss:$28 sps:$4 sm:$0xff]   ;;  %v12352_v35 = vld [vmem:[%s17367_s5 + $0x4d4] ss:$28 sps:$4 sm:$0xff]   ;;  %v12353_v48 = vld [vmem:[%s17367_s5 + $0x508] ss:$28 sps:$4 sm:$0xff]  }
 0x208   :  { %11289 = vmatprep.subr.bf16.mxu0 %v12317_v28  ;;  %v3772_v22 = vadd.f32 %v3743_v38, %v3728_v40  ;;  %v3632_v62 = vadd.f32 %v3631_v52, %v3614_v19  ;;  %v12349_v34 = vld [vmem:[%s17367_s5 + $0x49c] ss:$28 sps:$4 sm:$0xff]   ;;  %v12376_v52 = vld [vmem:[%s17367_s5 + $0x694] ss:$28 sps:$4 sm:$0xff]  }
 0x209   :  { %vm3778_vm0 = vcmp.gt.f32.partialorder %v3771_v39, 0.0  ;;  %v3785_v43 = vmul.f32 0.2, %v3771_v39  ;;  %v3774_v30 = vadd.f32 %v3751_v20, %v3730_v42  ;;  %v12347_v28 = vld [vmem:[%s17367_s5 + $0x498] ss:$28 sps:$4 sm:$0xff]  }
 0x20a   :  { %vm3779_vm1 = vcmp.gt.f32.partialorder %v3772_v22, 0.0  ;;  %v3786_v47 = vmul.f32 0.2, %v3772_v22  ;;  %v3633_v11 = vrot.slane %v3632_v62, 2  ;;  %v12358_v20 = vld [vmem:[%s17367_s5 + $0x544] ss:$28 sps:$4 sm:$0xff]  }
 0x20b   :  { %11290 = vmatpush3.bf16.msra.mxu0 %v12318_v41  ;;  %v3792_v10 = vsel %vm3778_vm0, %v3771_v39, %v3785_v43  ;;  %vm3781_vm2 = vcmp.gt.f32.partialorder %v3774_v30, 0.0  ;;  %v3788_v51 = vmul.f32 0.2, %v3774_v30  ;;  %v12356_v39 = vld [vmem:[%s17367_s5 + $0x540] ss:$28 sps:$4 sm:$0xff]  }
 0x20c   :  { %11291 = vmatprep.subr.bf16.mxu0 %v12322_v44  ;;  %v3793_v53 = vsel %vm3779_vm1, %v3772_v22, %v3786_v47  ;;  %v3806_v54 = vmul.f32 %v3799_v45, %v3792_v10  ;;  %v3634_v24 = vadd.f32 %v3633_v11, %v3632_v62  ;;  %v12361_v40 = vld [vmem:[%s17367_s5 + $0x57c] ss:$28 sps:$4 sm:$0xff]   ;;  %v12364_v42 = vld [vmem:[%s17367_s5 + $0x5b4] ss:$28 sps:$4 sm:$0xff]   ;;  %v15070_v44 = vsub.s32 2, %v14875_v25 }
 0x20d   :  { %v3807_v55 = vmul.f32 %v3800_v49, %v3793_v53  ;;  %v3795_v56 = vsel %vm3781_vm2, %v3774_v30, %v3788_v51  ;;  %v12359_v41 = vld [vmem:[%s17367_s5 + $0x578] ss:$28 sps:$4 sm:$0xff]   ;;  %v12362_v22 = vld [vmem:[%s17367_s5 + $0x5b0] ss:$28 sps:$4 sm:$0xff]   ;;  %v12370_v47 = vld [vmem:[%s17367_s5 + $0x624] ss:$28 sps:$4 sm:$0xff]  }
 0x20e   :  { %v3809_v58 = vmul.f32 %v3802_v15, %v3795_v56  ;;  %v14986_v63 = vpack.c.bf16 %v3806_v54, %v3806_v54  ;;  %v3635_v31 = vrot.slane %v3634_v24, 1  ;;  %v12367_v43 = vld [vmem:[%s17367_s5 + $0x5ec] ss:$28 sps:$4 sm:$0xff]   ;;  %v3703_v45 = vrot.slane %v14916_v14, %v15070_v44  ;;  %v12371_v15 = vld [vmem:[%s17367_s5 + $0x658] ss:$28 sps:$4 sm:$0xff]  }
 0x20f   :  { %11292 = vmatpush3.bf16.msra.mxu0 %v12323_v46  ;;  %v14981_v59 = vpack.c.bf16 %v3807_v55, %v3807_v55  ;;  %v12365_v46 = vld [vmem:[%s17367_s5 + $0x5e8] ss:$28 sps:$4 sm:$0xff]   ;;  %v3747_v10 = vrot.slane %v14924_v23, %v15070_v44  ;;  %v12374_v54 = vld [vmem:[%s17367_s5 + $0x690] ss:$28 sps:$4 sm:$0xff]  }
 0x210   :  { %11293 = vmatprep.subr.bf16.mxu0 %v12327_v50  ;;  %v14995_v3 = vpack.c.bf16 %v3809_v58, %v3809_v58  ;;  %v3636_v33 = vadd.f32 %v3635_v31, %v3634_v24  ;;  %v12373_v50 = vld [vmem:[%s17367_s5 + $0x65c] ss:$28 sps:$4 sm:$0xff]   ;;  %v12379_v55 = vld [vmem:[%s17367_s5 + $0x6cc] ss:$28 sps:$4 sm:$0xff]   ;;  %v12382_v62 = vld [vmem:[%s17367_s5 + $0x704] ss:$28 sps:$4 sm:$0xff]  }
 0x211   :  { %6055 = vmatprep.mubr.bf16.mxu1 %v14981_v59  ;;  %v12377_v58 = vld [vmem:[%s17367_s5 + $0x6c8] ss:$28 sps:$4 sm:$0xff]   ;;  %v12388_v11 = vld [vmem:[%s17367_s5 + $0x774] ss:$28 sps:$4 sm:$0xff]   ;;  %v12392_v31 = vld [vmem:[%s17367_s5 + $0x7e0] ss:$28 sps:$4 sm:$0xff]  }
 0x212   :  { %6056 = vmatmul.mubr.bf16.vlgmr.msra.gmra.mrb[16].mxu1 %v14986_v63  ;;  %v3664_v18 = vmul.f32 0.125, %v3636_v33  ;;  %v12400_v33 = vld [vmem:[%s17367_s5 + $0x854] ss:$28 sps:$4 sm:$0xff]  }
 0x213   :  { %11294 = vmatpush3.bf16.msra.mxu0 %v12328_v57  ;;  %6065 = vmatpush1.bf16.msra.mxu1 %v12324_v60  ;;  %v3801_v57 = vld [vmem:[%s17370_s4 + $0x10] sm:$0xff] }
 0x214   :  { %6096 = vmatprep.mubr.bf16.mxu1 %v14995_v3  ;;  %6066 = vmatprep.subr.bf16.mxu1 %v12331_v0  ;;  %v3671_v38 = vadd.f32 1e-05, %v3664_v18  ;;  %v12380_v0 = vld [vmem:[%s17367_s5 + $0x700] ss:$28 sps:$4 sm:$0xff]   ;;  %v12401_v18 = vld [vmem:[%s17367_s5 + $0x888] ss:$28 sps:$4 sm:$0xff]  }
 0x215   :  { %11295 = vmatprep.subr.bf16.mxu0 %v12332_v2 }
 0x216   :  { %13290 = vrsqrt.f32 %v3671_v38  ;;  %v12409_v38 = vld [vmem:[%s17367_s5 + $0x8fc] ss:$28 sps:$4 sm:$0xff]  }
 0x217   :  { %11296 = vmatpush3.bf16.msra.mxu0 %v12333_v7  ;;  %6067 = vmatpush1.bf16.msra.mxu1 %v12329_v8  ;;  %v12385_v7 = vld [vmem:[%s17367_s5 + $0x73c] ss:$28 sps:$4 sm:$0xff]  }
 0x218   :  { %11297 = vmatprep.subr.bf16.mxu0 %v12337_v9  ;;  %6068 = vmatprep.subr.bf16.mxu1 %v12336_v12  ;;  %v12383_v8 = vld [vmem:[%s17367_s5 + $0x738] ss:$28 sps:$4 sm:$0xff]   ;;  %v11345_v9 = vpop.f32.mrb[8].mxu1 }
 0x219   :  { %v11346_v12 = vpop.f32.mrb[9].mxu1 }
 0x21a   :  { %v15134_v24 = vadd.f32 %v11346_v12, %v11345_v9 }
 0x21b   :  { %11298 = vmatpush3.bf16.msra.mxu0 %v12338_v16  ;;  %6069 = vmatpush1.bf16.msra.mxu1 %v12334_v17  ;;  %v12386_v16 = vld [vmem:[%s17367_s5 + $0x770] ss:$28 sps:$4 sm:$0xff]   ;;  %v11348_v17 = vpop.f32.mrb[10].mxu1 }
 0x21c   :  { %11299 = vmatprep.subr.bf16.mxu0 %v12342_v13  ;;  %6070 = vmatprep.subr.bf16.mxu1 %v12341_v26  ;;  %v11349_v13 = vpop.f32.mrb[11].mxu1  ;;  %v12391_v26 = vld [vmem:[%s17367_s5 + $0x7ac] ss:$28 sps:$4 sm:$0xff]  }
 0x21f   :  { %11300 = vmatpush3.bf16.msra.mxu0 %v12343_v27  ;;  %6071 = vmatpush1.bf16.msra.mxu1 %v12339_v29  ;;  %v12389_v27 = vld [vmem:[%s17367_s5 + $0x7a8] ss:$28 sps:$4 sm:$0xff]  }
 0x220   :  { %6072 = vmatprep.subr.bf16.mxu1 %v12346_v32  ;;  %v13291_v19 = vpop.eup %13290  ;;  %v12394_v29 = vld [vmem:[%s17367_s5 + $0x7e4] ss:$28 sps:$4 sm:$0xff]   ;;  %v12397_v32 = vld [vmem:[%s17367_s5 + $0x81c] ss:$28 sps:$4 sm:$0xff]  }
 0x221   :  { %v3685_v30 = vmul.f32 %v13291_v19, %v14947_v36  ;;  %v12368_v36 = vld [vmem:[%s17367_s5 + $0x620] ss:$28 sps:$4 sm:$0xff]  }
 0x222   :  { %3426 = vmatmul.mubr.bf16.vlgmr.msra.gmra.mrb[8].mxu0 %v13619_v5  ;;  %v12355_v5 = vld [vmem:[%s17367_s5 + $0x50c] ss:$28 sps:$4 sm:$0xff]  }
 0x223   :  { %6073 = vmatpush1.bf16.msra.mxu1 %v12344_v21  ;;  %v3729_v49 = vmul.f32 %v3703_v45, %v3685_v30  ;;  %v12395_v21 = vld [vmem:[%s17367_s5 + $0x818] ss:$28 sps:$4 sm:$0xff]   ;;  %v12418_v30 = vld [vmem:[%s17367_s5 + $0x9a4] ss:$28 sps:$4 sm:$0xff]  }
 0x224   :  { %6074 = vmatprep.subr.bf16.mxu1 %v12349_v34  ;;  %v12398_v34 = vld [vmem:[%s17367_s5 + $0x850] ss:$28 sps:$4 sm:$0xff]   ;;  %v12416_v45 = vld [vmem:[%s17367_s5 + $0x9a0] ss:$28 sps:$4 sm:$0xff]  }
 0x225   :  { %v3773_v51 = vadd.f32 %v3747_v10, %v3729_v49  ;;  %v12424_v49 = vld [vmem:[%s17367_s5 + $0xa14] ss:$28 sps:$4 sm:$0xff]  }
 0x226   :  { %v12422_v10 = vld [vmem:[%s17367_s5 + $0xa10] ss:$28 sps:$4 sm:$0xff]  }
 0x227   :  { %6075 = vmatpush1.bf16.msra.mxu1 %v12347_v28  ;;  %v3787_v53 = vmul.f32 0.2, %v3773_v51  ;;  %vm3780_vm3 = vcmp.gt.f32.partialorder %v3773_v51, 0.0  ;;  %v12403_v28 = vld [vmem:[%s17367_s5 + $0x88c] ss:$28 sps:$4 sm:$0xff]  }
 0x228   :  { %6076 = vmatprep.subr.bf16.mxu1 %v12352_v35  ;;  %v12406_v35 = vld [vmem:[%s17367_s5 + $0x8c4] ss:$28 sps:$4 sm:$0xff]  }
 0x229   :  { %v3794_v56 = vsel %vm3780_vm3, %v3773_v51, %v3787_v53  ;;  %v12430_v51 = vld [vmem:[%s17367_s5 + $0x14] ss:$28 sps:$4 sm:$0xff]  }
 0x22a   :  { %v3808_v60 = vmul.f32 %v3801_v57, %v3794_v56  ;;  %v12461_v53 = vld [vmem:[%s17367_s5 + $0xab8] ss:$28 sps:$4 sm:$0xff]   ;;  %v13328_v56 = vmov 0  }
 0x22b   :  { %6077 = vmatpush1.bf16.msra.mxu1 %v12350_v37  ;;  %v12404_v37 = vld [vmem:[%s17367_s5 + $0x8c0] ss:$28 sps:$4 sm:$0xff]   ;;  %6178 = vmatprep.mubr.bf16.mxu0 %v13328_v56 }
 0x22c   :  { %6078 = vmatprep.subr.bf16.mxu1 %v12355_v5  ;;  %v15119_v2 = vpack.c.bf16 %v3808_v60, %v3808_v60  ;;  %v12407_v5 = vld [vmem:[%s17367_s5 + $0x8f8] ss:$28 sps:$4 sm:$0xff]  }
 0x22f   :  { %6079 = vmatpush1.bf16.msra.mxu1 %v12353_v48 }
 0x230   :  { %6080 = vmatprep.subr.bf16.mxu1 %v12358_v20 }
 0x233   :  { %6081 = vmatpush1.bf16.msra.mxu1 %v12356_v39  ;;  %v12412_v39 = vld [vmem:[%s17367_s5 + $0x934] ss:$28 sps:$4 sm:$0xff]  }
 0x234   :  { %6082 = vmatprep.subr.bf16.mxu1 %v12361_v40 }
 0x237   :  { %6083 = vmatpush1.bf16.msra.mxu1 %v12359_v41  ;;  %v11367_v48 = vpop.f32.mrb[12].mxu1  ;;  %v12410_v41 = vld [vmem:[%s17367_s5 + $0x930] ss:$28 sps:$4 sm:$0xff]  }
 0x238   :  { %6084 = vmatprep.subr.bf16.mxu1 %v12364_v42  ;;  %v11368_v20 = vpop.f32.mrb[13].mxu1 }
 0x239   :  { %v11370_v40 = vpop.f32.mrb[14].mxu1  ;;  %v15184_v19 = vadd.f32 %v11368_v20, %v11367_v48 }
 0x23a   :  { %v11371_v42 = vpop.f32.mrb[15].mxu1 }
 0x23b   :  { %6085 = vmatpush1.bf16.msra.mxu1 %v12362_v22  ;;  %v12415_v22 = vld [vmem:[%s17367_s5 + $0x96c] ss:$28 sps:$4 sm:$0xff]  }
 0x23c   :  { %6086 = vmatprep.subr.bf16.mxu1 %v12367_v43  ;;  %v12413_v43 = vld [vmem:[%s17367_s5 + $0x968] ss:$28 sps:$4 sm:$0xff]  }
 0x23f   :  { %6087 = vmatpush1.bf16.msra.mxu1 %v12365_v46  ;;  %v12421_v46 = vld [vmem:[%s17367_s5 + $0x9dc] ss:$28 sps:$4 sm:$0xff]  }
 0x240   :  { %6088 = vmatprep.subr.bf16.mxu1 %v12370_v47  ;;  %v12419_v47 = vld [vmem:[%s17367_s5 + $0x9d8] ss:$28 sps:$4 sm:$0xff]  }
 0x243   :  { %6089 = vmatpush1.bf16.msra.mxu1 %v12368_v36  ;;  %v12427_v36 = vld [vmem:[%s17367_s5 + $0xa4c] ss:$28 sps:$4 sm:$0xff]  }
 0x244   :  { %6090 = vmatprep.subr.bf16.mxu1 %v12373_v50  ;;  %v12425_v50 = vld [vmem:[%s17367_s5 + $0xa48] ss:$28 sps:$4 sm:$0xff]  }
 0x247   :  { %6091 = vmatpush1.bf16.msra.mxu1 %v12371_v15  ;;  %v12457_v15 = vld [vmem:[%s17367_s5 + $0xa84] ss:$28 sps:$4 sm:$0xff]  }
 0x248   :  { %6092 = vmatprep.subr.bf16.mxu1 %v12376_v52  ;;  %v12455_v52 = vld [vmem:[%s17367_s5 + $0xa80] ss:$28 sps:$4 sm:$0xff]   ;;  %6146 = vmatprep.subr.bf16.mxu0 %v12457_v15 }
 0x249   :  { %6147 = vmatpush1.bf16.msra.mxu0 %v12455_v52  ;;  %v15238_v52 = vsub.s32 4, %v14875_v25 }
 0x24b   :  { %6093 = vmatpush1.bf16.msra.mxu1 %v12374_v54  ;;  %v12463_v54 = vld [vmem:[%s17367_s5 + $0xabc] ss:$28 sps:$4 sm:$0xff]  }
 0x24c   :  { %6094 = vmatprep.subr.bf16.mxu1 %v12379_v55  ;;  %6148 = vmatprep.subr.bf16.mxu0 %v12463_v54  ;;  %v12469_v55 = vld [vmem:[%s17367_s5 + $0xc] ss:$28 sps:$4 sm:$0xff]   ;;  %v15242_v54 = vsub.s32 5, %v14875_v25 }
 0x24d   :  { %6149 = vmatpush1.bf16.msra.mxu0 %v12461_v53 }
 0x24e   :  { %6187 = vmatprep.subr.bf16.mxu0 %v12469_v55 }
 0x24f   :  { %6095 = vmatpush1.bf16.msra.mxu1 %v12377_v58 }
 0x250   :  { %6105 = vmatprep.subr.bf16.mxu1 %v12382_v62 }
 0x252   :  { %6097 = vmatmul.mubr.bf16.vlgmr.msra.gmra.mrb[16].mxu1 %v15119_v2 }
 0x253   :  { %6106 = vmatpush1.bf16.msra.mxu1 %v12380_v0 }
 0x254   :  { %6107 = vmatprep.subr.bf16.mxu1 %v12385_v7 }
 0x257   :  { %6108 = vmatpush1.bf16.msra.mxu1 %v12383_v8 }
 0x258   :  { %6109 = vmatprep.subr.bf16.mxu1 %v12388_v11 }
 0x25b   :  { %6110 = vmatpush1.bf16.msra.mxu1 %v12386_v16 }
 0x25c   :  { %6111 = vmatprep.subr.bf16.mxu1 %v12391_v26 }
 0x25f   :  { %6112 = vmatpush1.bf16.msra.mxu1 %v12389_v27 }
 0x260   :  { %6113 = vmatprep.subr.bf16.mxu1 %v12394_v29 }
 0x263   :  { %6114 = vmatpush1.bf16.msra.mxu1 %v12392_v31 }
 0x264   :  { %6115 = vmatprep.subr.bf16.mxu1 %v12397_v32 }
 0x267   :  { %6116 = vmatpush1.bf16.msra.mxu1 %v12395_v21 }
 0x268   :  { %6117 = vmatprep.subr.bf16.mxu1 %v12400_v33 }
 0x26b   :  { %6118 = vmatpush1.bf16.msra.mxu1 %v12398_v34 }
 0x26c   :  { %6119 = vmatprep.subr.bf16.mxu1 %v12403_v28 }
 0x26f   :  { %6120 = vmatpush1.bf16.msra.mxu1 %v12401_v18 }
 0x270   :  { %6121 = vmatprep.subr.bf16.mxu1 %v12406_v35 }
 0x273   :  { %6122 = vmatpush1.bf16.msra.mxu1 %v12404_v37 }
 0x274   :  { %6123 = vmatprep.subr.bf16.mxu1 %v12409_v38 }
 0x277   :  { %6124 = vmatpush1.bf16.msra.mxu1 %v12407_v5 }
 0x278   :  { %6125 = vmatprep.subr.bf16.mxu1 %v12412_v39 }
 0x27b   :  { %6126 = vmatpush1.bf16.msra.mxu1 %v12410_v41 }
 0x27c   :  { %6127 = vmatprep.subr.bf16.mxu1 %v12415_v22 }
 0x27f   :  { %6128 = vmatpush1.bf16.msra.mxu1 %v12413_v43 }
 0x280   :  { %6129 = vmatprep.subr.bf16.mxu1 %v12418_v30 }
 0x283   :  { %6130 = vmatpush1.bf16.msra.mxu1 %v12416_v45 }
 0x284   :  { %6131 = vmatprep.subr.bf16.mxu1 %v12421_v46 }
 0x287   :  { %6132 = vmatpush1.bf16.msra.mxu1 %v12419_v47 }
 0x288   :  { %6133 = vmatprep.subr.bf16.mxu1 %v12424_v49 }
 0x28b   :  { %6134 = vmatpush1.bf16.msra.mxu1 %v12422_v10 }
 0x28c   :  { %6135 = vmatprep.subr.bf16.mxu1 %v12427_v36 }
 0x28f   :  { %6136 = vmatpush1.bf16.msra.mxu1 %v12425_v50 }
 0x290   :  { %6351 = vmatprep.subr.bf16.mxu1 %v12430_v51 }
 0x2d5   :  { %v3386_v57 = vpop.f32.mrb[4].mxu0 }
 0x2d6   :  { %v3577_v58 = vrot.slane %v3386_v57, 4  ;;  %v3388_v60 = vpop.f32.mrb[5].mxu0 }
 0x2d7   :  { %v3583_v62 = vrot.slane %v3388_v60, 4  ;;  %v3390_v0 = vpop.f32.mrb[6].mxu0 }
 0x2d8   :  { %v3578_v7 = vadd.f32 %v3577_v58, %v3386_v57  ;;  %v3391_v8 = vpop.f32.mrb[7].mxu0  ;;  %v3711_v58 = vrot.slane %v14916_v14, %v15238_v52 }
 0x2d9   :  { %v3584_v9 = vadd.f32 %v3583_v62, %v3388_v60  ;;  %v3759_v8 = vrot.slane %v14924_v23, %v15242_v54 }
 0x2da   :  { %v3579_v11 = vrot.slane %v3578_v7, 2 }
 0x2db   :  { %v3585_v12 = vrot.slane %v3584_v9, 2 }
 0x2dc   :  { %v3580_v16 = vadd.f32 %v3579_v11, %v3578_v7  ;;  %v3755_v7 = vrot.slane %v14924_v23, %v15238_v52 }
 0x2dd   :  { %v3586_v17 = vadd.f32 %v3585_v12, %v3584_v9 }
 0x2de   :  { %v3581_v13 = vrot.slane %v3580_v16, 1 }
 0x2df   :  { %v3587_v26 = vrot.slane %v3586_v17, 1 }
 0x2e0   :  { %v3582_v27 = vadd.f32 %v3581_v13, %v3580_v16 }
 0x2e1   :  { %v3588_v29 = vadd.f32 %v3587_v26, %v3586_v17 }
 0x2e2   :  { %v3602_v31 = vmul.f32 0.125, %v3582_v27 }
 0x2e3   :  { %v3603_v32 = vmul.f32 0.125, %v3588_v29  ;;  %v3803_v29 = vld [vmem:[%s17370_s4 + $0x20] sm:$0xff] }
 0x2e4   :  { %v3609_v21 = vsub.f32 %v3386_v57, %v3602_v31 }
 0x2e5   :  { %v3610_v33 = vsub.f32 %v3388_v60, %v3603_v32 }
 0x2e6   :  { %v3616_v34 = vmul.f32 %v3609_v21, %v3609_v21 }
 0x2e7   :  { %v3617_v28 = vmul.f32 %v3610_v33, %v3610_v33 }
 0x2e8   :  { %v3643_v18 = vrot.slane %v3616_v34, 4 }
 0x2e9   :  { %v3649_v35 = vrot.slane %v3617_v28, 4 }
 0x2ea   :  { %v3644_v37 = vadd.f32 %v3643_v18, %v3616_v34 }
 0x2eb   :  { %v3650_v38 = vadd.f32 %v3649_v35, %v3617_v28 }
 0x2ec   :  { %v3645_v5 = vrot.slane %v3644_v37, 2 }
 0x2ed   :  { %v3651_v48 = vrot.slane %v3650_v38, 2 }
 0x2ee   :  { %v3646_v20 = vadd.f32 %v3645_v5, %v3644_v37  ;;  %v12428_v5 = vld [vmem:[%s17367_s5 + $0x10] ss:$28 sps:$4 sm:$0xff]  }
 0x2ef   :  { %v3652_v39 = vadd.f32 %v3651_v48, %v3650_v38 }
 0x2f0   :  { %v3647_v40 = vrot.slane %v3646_v20, 1 }
 0x2f1   :  { %v3653_v41 = vrot.slane %v3652_v39, 1 }
 0x2f2   :  { %v3648_v42 = vadd.f32 %v3647_v40, %v3646_v20 }
 0x2f3   :  { %v3654_v22 = vadd.f32 %v3653_v41, %v3652_v39  ;;  %v12433_v39 = vld [vmem:[%s17367_s5 + $0x4c] ss:$28 sps:$4 sm:$0xff]  }
 0x2f4   :  { %v3666_v43 = vmul.f32 0.125, %v3648_v42  ;;  %v12431_v42 = vld [vmem:[%s17367_s5 + $0x48] ss:$28 sps:$4 sm:$0xff]  }
 0x2f5   :  { %v3667_v30 = vmul.f32 0.125, %v3654_v22  ;;  %v11301_v45 = vpop.f32.mrb[8].mxu0  ;;  %v12436_v22 = vld [vmem:[%s17367_s5 + $0x84] ss:$28 sps:$4 sm:$0xff]  }
 0x2f6   :  { %v3673_v46 = vadd.f32 1e-05, %v3666_v43  ;;  %v11302_v47 = vpop.f32.mrb[9].mxu0 }
 0x2f7   :  { %v3674_v49 = vadd.f32 1e-05, %v3667_v30  ;;  %v11303_v10 = vadd.f32 %v11302_v47, %v11301_v45  ;;  %v11304_v36 = vpop.f32.mrb[10].mxu0  ;;  %v12434_v45 = vld [vmem:[%s17367_s5 + $0x80] ss:$28 sps:$4 sm:$0xff]  }
 0x2f8   :  { %13292 = vrsqrt.f32 %v3673_v46  ;;  %v11305_v50 = vpop.f32.mrb[11].mxu0  ;;  %v12439_v46 = vld [vmem:[%s17367_s5 + $0xbc] ss:$28 sps:$4 sm:$0xff]   ;;  %v12442_v36 = vld [vmem:[%s17367_s5 + $0xf4] ss:$28 sps:$4 sm:$0xff]  }
 0x2f9   :  { %13294 = vrsqrt.f32 %v3674_v49  ;;  %v3468_v51 = vadd.f32 %v14905_v6, %v11303_v10  ;;  %v3715_v6 = vrot.slane %v14916_v14, %v15242_v54  ;;  %v12437_v10 = vld [vmem:[%s17367_s5 + $0xb8] ss:$28 sps:$4 sm:$0xff]  }
 0x2fb   :  { %v3508_v15 = vadd.f32 %v15134_v24, %v3468_v51 }
 0x2fd   :  { %v3548_v53 = vadd.f32 %v15184_v19, %v3508_v15  ;;  %v12440_v15 = vld [vmem:[%s17367_s5 + $0xf0] ss:$28 sps:$4 sm:$0xff]  }
 0x2ff   :  { %v3590_v55 = vsel %vm3589_vm4, %v3548_v53, 0.0 }
 0x300   :  { %v3591_v57 = vrot.slane %v3590_v55, 4 }
 0x302   :  { %v13293_v60 = vpop.eup %13292  ;;  %v3592_v24 = vadd.f32 %v3591_v57, %v3590_v55  ;;  %v12443_v57 = vld [vmem:[%s17367_s5 + $0x128] ss:$28 sps:$4 sm:$0xff]  }
 0x303   :  { %v13295_v62 = vpop.eup %13294  ;;  %v3687_v0 = vmul.f32 %v13293_v60, %v3609_v21  ;;  %v3804_v21 = vld [vmem:[%s17370_s4 + $0x28] sm:$0xff]  ;;  %v12446_v60 = vld [vmem:[%s17367_s5 + $0x160] ss:$28 sps:$4 sm:$0xff]  }
 0x304   :  { %v3688_v19 = vmul.f32 %v13295_v62, %v3610_v33  ;;  %v3593_v9 = vrot.slane %v3592_v24, 2  ;;  %v12449_v62 = vld [vmem:[%s17367_s5 + $0x198] ss:$28 sps:$4 sm:$0xff]  }
 0x305   :  { %v3731_v11 = vmul.f32 %v3711_v58, %v3687_v0  ;;  %v12448_v58 = vld [vmem:[%s17367_s5 + $0x164] ss:$28 sps:$4 sm:$0xff]  }
 0x306   :  { %v3732_v12 = vmul.f32 %v3715_v6, %v3688_v19  ;;  %v3594_v16 = vadd.f32 %v3593_v9, %v3592_v24  ;;  %v15307_v6 = vsub.s32 6, %v14875_v25  ;;  %v12451_v24 = vld [vmem:[%s17367_s5 + $0x19c] ss:$28 sps:$4 sm:$0xff]   ;;  %v12452_v9 = vld [vmem:[%s17367_s5 + $0x1d0] ss:$28 sps:$4 sm:$0xff]  }
 0x307   :  { %v3775_v17 = vadd.f32 %v3755_v7, %v3731_v11  ;;  %v12454_v7 = vld [vmem:[%s17367_s5 + $0x1d4] ss:$28 sps:$4 sm:$0xff]  }
 0x308   :  { %v3776_v13 = vadd.f32 %v3759_v8, %v3732_v12  ;;  %v3595_v26 = vrot.slane %v3594_v16, 1  ;;  %v3719_v0 = vrot.slane %v14916_v14, %v15307_v6  ;;  %v3763_v8 = vrot.slane %v14924_v23, %v15307_v6  ;;  %v12460_v14 = vld [vmem:[%s17367_s5 + $0x20c] ss:$28 sps:$4 sm:$0xff]   ;;  %v12466_v23 = vld [vmem:[%s17367_s5 + $0x244] ss:$28 sps:$4 sm:$0xff]  }
 0x309   :  { %vm3782_vm5 = vcmp.gt.f32.partialorder %v3775_v17, 0.0  ;;  %v3789_v27 = vmul.f32 0.2, %v3775_v17 }
 0x30a   :  { %v3596_v31 = vadd.f32 %v3595_v26, %v3594_v16  ;;  %vm3783_vm6 = vcmp.gt.f32.partialorder %v3776_v13, 0.0  ;;  %v3790_v32 = vmul.f32 0.2, %v3776_v13  ;;  %v12458_v16 = vld [vmem:[%s17367_s5 + $0x208] ss:$28 sps:$4 sm:$0xff]  }
 0x30b   :  { %v3796_v33 = vsel %vm3782_vm5, %v3775_v17, %v3789_v27  ;;  %v12464_v27 = vld [vmem:[%s17367_s5 + $0x240] ss:$28 sps:$4 sm:$0xff]  }
 0x30c   :  { %v3604_v34 = vmul.f32 0.125, %v3596_v31  ;;  %v3797_v28 = vsel %vm3783_vm6, %v3776_v13, %v3790_v32  ;;  %v3810_v18 = vmul.f32 %v3803_v29, %v3796_v33  ;;  %v3805_v13 = vld [vmem:[%s17370_s4 + $0x30] sm:$0xff]  ;;  %v12467_v31 = vld [vmem:[%s17367_s5 + $0x8] ss:$28 sps:$4 sm:$0xff]  }
 0x30d   :  { %v3811_v35 = vmul.f32 %v3804_v21, %v3797_v28  ;;  %v12472_v21 = vld [vmem:[%s17367_s5 + $0x27c] ss:$28 sps:$4 sm:$0xff]   ;;  %v12475_v33 = vld [vmem:[%s17367_s5 + $0x44] ss:$28 sps:$4 sm:$0xff]  }
 0x30e   :  { %v3611_v37 = vsub.f32 %v3548_v53, %v3604_v34  ;;  %v15264_v20 = vpack.c.bf16 %v3810_v18, %v3810_v18  ;;  %v12445_v53 = vld [vmem:[%s17367_s5 + $0x12c] ss:$28 sps:$4 sm:$0xff]   ;;  %v12470_v34 = vld [vmem:[%s17367_s5 + $0x278] ss:$28 sps:$4 sm:$0xff]   ;;  %v12473_v28 = vld [vmem:[%s17367_s5 + $0x40] ss:$28 sps:$4 sm:$0xff]  }
 0x30f   :  { %v15259_v38 = vpack.c.bf16 %v3811_v35, %v3811_v35  ;;  %v12478_v18 = vld [vmem:[%s17367_s5 + $0x2b4] ss:$28 sps:$4 sm:$0xff]   ;;  %v12481_v35 = vld [vmem:[%s17367_s5 + $0x7c] ss:$28 sps:$4 sm:$0xff]  }
 0x310   :  { %v3618_v48 = vmul.f32 %v3611_v37, %v3611_v37 }
 0x311   :  { %6137 = vmatprep.mubr.bf16.mxu1 %v15259_v38 }
 0x312   :  { %v3655_v40 = vsel %vm3589_vm4, %v3618_v48, 0.0  ;;  %6138 = vmatmul.mubr.bf16.vlgmr.msra.gmra.mrb[16].mxu1 %v15264_v20  ;;  %v12484_v48 = vld [vmem:[%s17367_s5 + $0x2ec] ss:$28 sps:$4 sm:$0xff]  }
 0x313   :  { %v3656_v41 = vrot.slane %v3655_v40, 4  ;;  %6352 = vmatpush1.bf16.msra.mxu1 %v12428_v5  ;;  %6383 = vmatprep.mubr.bf16.mxu1 %v14981_v59  ;;  %v12479_v5 = vld [vmem:[%s17367_s5 + $0x78] ss:$28 sps:$4 sm:$0xff]  }
 0x314   :  { %6353 = vmatprep.subr.bf16.mxu1 %v12433_v39  ;;  %v12487_v39 = vld [vmem:[%s17367_s5 + $0xb4] ss:$28 sps:$4 sm:$0xff]  }
 0x315   :  { %v3657_v43 = vadd.f32 %v3656_v41, %v3655_v40  ;;  %v12482_v40 = vld [vmem:[%s17367_s5 + $0x2e8] ss:$28 sps:$4 sm:$0xff]   ;;  %v12485_v41 = vld [vmem:[%s17367_s5 + $0xb0] ss:$28 sps:$4 sm:$0xff]  }
 0x317   :  { %v3658_v30 = vrot.slane %v3657_v43, 2  ;;  %6354 = vmatpush1.bf16.msra.mxu1 %v12431_v42  ;;  %v12490_v42 = vld [vmem:[%s17367_s5 + $0x324] ss:$28 sps:$4 sm:$0xff]  }
 0x318   :  { %6355 = vmatprep.subr.bf16.mxu1 %v12436_v22  ;;  %v12493_v22 = vld [vmem:[%s17367_s5 + $0xec] ss:$28 sps:$4 sm:$0xff]  }
 0x319   :  { %v3659_v47 = vadd.f32 %v3658_v30, %v3657_v43  ;;  %v12488_v43 = vld [vmem:[%s17367_s5 + $0x320] ss:$28 sps:$4 sm:$0xff]   ;;  %v12491_v30 = vld [vmem:[%s17367_s5 + $0xe8] ss:$28 sps:$4 sm:$0xff]  }
 0x31b   :  { %v3660_v49 = vrot.slane %v3659_v47, 1  ;;  %6356 = vmatpush1.bf16.msra.mxu1 %v12434_v45  ;;  %v12496_v45 = vld [vmem:[%s17367_s5 + $0x35c] ss:$28 sps:$4 sm:$0xff]  }
 0x31c   :  { %6357 = vmatprep.subr.bf16.mxu1 %v12439_v46  ;;  %v12499_v46 = vld [vmem:[%s17367_s5 + $0x124] ss:$28 sps:$4 sm:$0xff]  }
 0x31d   :  { %v3661_v50 = vadd.f32 %v3660_v49, %v3659_v47  ;;  %v12494_v47 = vld [vmem:[%s17367_s5 + $0x358] ss:$28 sps:$4 sm:$0xff]   ;;  %v12497_v49 = vld [vmem:[%s17367_s5 + $0x120] ss:$28 sps:$4 sm:$0xff]  }
 0x31f   :  { %v3668_v51 = vmul.f32 0.125, %v3661_v50  ;;  %6358 = vmatpush1.bf16.msra.mxu1 %v12437_v10  ;;  %v12502_v10 = vld [vmem:[%s17367_s5 + $0x394] ss:$28 sps:$4 sm:$0xff]  }
 0x320   :  { %6359 = vmatprep.subr.bf16.mxu1 %v12442_v36  ;;  %v12505_v36 = vld [vmem:[%s17367_s5 + $0x15c] ss:$28 sps:$4 sm:$0xff]   ;;  %v12500_v50 = vld [vmem:[%s17367_s5 + $0x390] ss:$28 sps:$4 sm:$0xff]  }
 0x321   :  { %v3675_v55 = vadd.f32 1e-05, %v3668_v51  ;;  %v12503_v51 = vld [vmem:[%s17367_s5 + $0x158] ss:$28 sps:$4 sm:$0xff]  }
 0x323   :  { %13296 = vrsqrt.f32 %v3675_v55  ;;  %6360 = vmatpush1.bf16.msra.mxu1 %v12440_v15  ;;  %v12508_v15 = vld [vmem:[%s17367_s5 + $0x3cc] ss:$28 sps:$4 sm:$0xff]  }
 0x324   :  { %6361 = vmatprep.subr.bf16.mxu1 %v12445_v53  ;;  %v12511_v53 = vld [vmem:[%s17367_s5 + $0x194] ss:$28 sps:$4 sm:$0xff]   ;;  %v12506_v55 = vld [vmem:[%s17367_s5 + $0x3c8] ss:$28 sps:$4 sm:$0xff]  }
 0x327   :  { %6362 = vmatpush1.bf16.msra.mxu1 %v12443_v57  ;;  %v12509_v57 = vld [vmem:[%s17367_s5 + $0x190] ss:$28 sps:$4 sm:$0xff]  }
 0x328   :  { %6363 = vmatprep.subr.bf16.mxu1 %v12448_v58  ;;  %v12514_v58 = vld [vmem:[%s17367_s5 + $0x404] ss:$28 sps:$4 sm:$0xff]  }
 0x32b   :  { %6364 = vmatpush1.bf16.msra.mxu1 %v12446_v60  ;;  %v12517_v60 = vld [vmem:[%s17367_s5 + $0x1cc] ss:$28 sps:$4 sm:$0xff]  }
 0x32c   :  { %6365 = vmatprep.subr.bf16.mxu1 %v12451_v24  ;;  %v12512_v24 = vld [vmem:[%s17367_s5 + $0x400] ss:$28 sps:$4 sm:$0xff]  }
 0x32d   :  { %v13297_v25 = vpop.eup %13296 }
 0x32e   :  { %v3689_v19 = vmul.f32 %v13297_v25, %v3611_v37  ;;  %v12476_v37 = vld [vmem:[%s17367_s5 + $0x2b0] ss:$28 sps:$4 sm:$0xff]   ;;  %v12518_v25 = vld [vmem:[%s17367_s5 + $0x438] ss:$28 sps:$4 sm:$0xff]  }
 0x32f   :  { %6366 = vmatpush1.bf16.msra.mxu1 %v12449_v62  ;;  %v12515_v62 = vld [vmem:[%s17367_s5 + $0x1c8] ss:$28 sps:$4 sm:$0xff]  }
 0x330   :  { %v3733_v11 = vmul.f32 %v3719_v0, %v3689_v19  ;;  %6367 = vmatprep.subr.bf16.mxu1 %v12454_v7  ;;  %v12520_v0 = vld [vmem:[%s17367_s5 + $0x43c] ss:$28 sps:$4 sm:$0xff]   ;;  %v12523_v7 = vld [vmem:[%s17367_s5 + $0x204] ss:$28 sps:$4 sm:$0xff]  }
 0x331   :  { %v12521_v19 = vld [vmem:[%s17367_s5 + $0x200] ss:$28 sps:$4 sm:$0xff]  }
 0x332   :  { %v3777_v12 = vadd.f32 %v3763_v8, %v3733_v11  ;;  %v12526_v8 = vld [vmem:[%s17367_s5 + $0x474] ss:$28 sps:$4 sm:$0xff]  }
 0x333   :  { %6368 = vmatpush1.bf16.msra.mxu1 %v12452_v9  ;;  %v12529_v9 = vld [vmem:[%s17367_s5 + $0x23c] ss:$28 sps:$4 sm:$0xff]   ;;  %v12524_v11 = vld [vmem:[%s17367_s5 + $0x470] ss:$28 sps:$4 sm:$0xff]  }
 0x334   :  { %vm3784_vm7 = vcmp.gt.f32.partialorder %v3777_v12, 0.0  ;;  %v3791_v17 = vmul.f32 0.2, %v3777_v12  ;;  %6369 = vmatprep.subr.bf16.mxu1 %v12460_v14  ;;  %v12527_v14 = vld [vmem:[%s17367_s5 + $0x238] ss:$28 sps:$4 sm:$0xff]  }
 0x336   :  { %v3798_v26 = vsel %vm3784_vm7, %v3777_v12, %v3791_v17  ;;  %v12532_v12 = vld [vmem:[%s17367_s5 + $0x4ac] ss:$28 sps:$4 sm:$0xff]  }
 0x337   :  { %6370 = vmatpush1.bf16.msra.mxu1 %v12458_v16  ;;  %v3812_v29 = vmul.f32 %v3805_v13, %v3798_v26  ;;  %v12535_v16 = vld [vmem:[%s17367_s5 + $0x274] ss:$28 sps:$4 sm:$0xff]   ;;  %v12530_v17 = vld [vmem:[%s17367_s5 + $0x4a8] ss:$28 sps:$4 sm:$0xff]  }
 0x338   :  { %6371 = vmatprep.subr.bf16.mxu1 %v12466_v23  ;;  %v12533_v23 = vld [vmem:[%s17367_s5 + $0x270] ss:$28 sps:$4 sm:$0xff]   ;;  %v12538_v13 = vld [vmem:[%s17367_s5 + $0x4e4] ss:$28 sps:$4 sm:$0xff]  }
 0x339   :  { %v15343_v32 = vpack.c.bf16 %v3812_v29, %v3812_v29  ;;  %v12541_v26 = vld [vmem:[%s17367_s5 + $0x2ac] ss:$28 sps:$4 sm:$0xff]  }
 0x33a   :  { %v12539_v29 = vld [vmem:[%s17367_s5 + $0x2a8] ss:$28 sps:$4 sm:$0xff]  }
 0x33b   :  { %6372 = vmatpush1.bf16.msra.mxu1 %v12464_v27  ;;  %10926 = vmatmul.mubr.msk.bf16.vlgmr.msra.gmra.mrb[12].mxu0 %vm3589_vm4, %v15343_v32  ;;  %v12536_v27 = vld [vmem:[%s17367_s5 + $0x4e0] ss:$28 sps:$4 sm:$0xff]  }
 0x33c   :  { %6188 = vmatpush1.bf16.msra.mxu0 %v12467_v31  ;;  %6219 = vmatprep.mubr.bf16.mxu0 %v14981_v59  ;;  %v12544_v31 = vld [vmem:[%s17367_s5 + $0x51c] ss:$28 sps:$4 sm:$0xff]  }
 0x33d   :  { %6373 = vmatprep.subr.bf16.mxu1 %v12472_v21  ;;  %6189 = vmatprep.subr.bf16.mxu0 %v12475_v33  ;;  %v12547_v21 = vld [vmem:[%s17367_s5 + $0x2e4] ss:$28 sps:$4 sm:$0xff]   ;;  %v12542_v33 = vld [vmem:[%s17367_s5 + $0x518] ss:$28 sps:$4 sm:$0xff]  }
 0x33f   :  { %6374 = vmatpush1.bf16.msra.mxu1 %v12470_v34  ;;  %v12545_v34 = vld [vmem:[%s17367_s5 + $0x2e0] ss:$28 sps:$4 sm:$0xff]  }
 0x340   :  { %6190 = vmatpush1.bf16.msra.mxu0 %v12473_v28  ;;  %6375 = vmatprep.subr.bf16.mxu1 %v12478_v18  ;;  %v12550_v28 = vld [vmem:[%s17367_s5 + $0x554] ss:$28 sps:$4 sm:$0xff]   ;;  %v12553_v18 = vld [vmem:[%s17367_s5 + $0x31c] ss:$28 sps:$4 sm:$0xff]  }
 0x341   :  { %6191 = vmatprep.subr.bf16.mxu0 %v12481_v35  ;;  %v12548_v35 = vld [vmem:[%s17367_s5 + $0x550] ss:$28 sps:$4 sm:$0xff]  }
 0x343   :  { %6376 = vmatpush1.bf16.msra.mxu1 %v12476_v37  ;;  %v12551_v37 = vld [vmem:[%s17367_s5 + $0x318] ss:$28 sps:$4 sm:$0xff]  }
 0x344   :  { %6192 = vmatpush1.bf16.msra.mxu0 %v12479_v5  ;;  %6377 = vmatprep.subr.bf16.mxu1 %v12484_v48  ;;  %v12556_v5 = vld [vmem:[%s17367_s5 + $0x58c] ss:$28 sps:$4 sm:$0xff]   ;;  %v12559_v48 = vld [vmem:[%s17367_s5 + $0x354] ss:$28 sps:$4 sm:$0xff]  }
 0x345   :  { %6193 = vmatprep.subr.bf16.mxu0 %v12487_v39  ;;  %v12554_v39 = vld [vmem:[%s17367_s5 + $0x588] ss:$28 sps:$4 sm:$0xff]  }
 0x347   :  { %6378 = vmatpush1.bf16.msra.mxu1 %v12482_v40  ;;  %v12557_v40 = vld [vmem:[%s17367_s5 + $0x350] ss:$28 sps:$4 sm:$0xff]  }
 0x348   :  { %6194 = vmatpush1.bf16.msra.mxu0 %v12485_v41  ;;  %6379 = vmatprep.subr.bf16.mxu1 %v12490_v42  ;;  %v12562_v41 = vld [vmem:[%s17367_s5 + $0x5c4] ss:$28 sps:$4 sm:$0xff]   ;;  %v12565_v42 = vld [vmem:[%s17367_s5 + $0x38c] ss:$28 sps:$4 sm:$0xff]  }
 0x349   :  { %6195 = vmatprep.subr.bf16.mxu0 %v12493_v22  ;;  %v12560_v22 = vld [vmem:[%s17367_s5 + $0x5c0] ss:$28 sps:$4 sm:$0xff]  }
 0x34b   :  { %6380 = vmatpush1.bf16.msra.mxu1 %v12488_v43  ;;  %v12563_v43 = vld [vmem:[%s17367_s5 + $0x388] ss:$28 sps:$4 sm:$0xff]  }
 0x34c   :  { %6196 = vmatpush1.bf16.msra.mxu0 %v12491_v30  ;;  %6381 = vmatprep.subr.bf16.mxu1 %v12496_v45  ;;  %v12568_v30 = vld [vmem:[%s17367_s5 + $0x5fc] ss:$28 sps:$4 sm:$0xff]   ;;  %v12571_v45 = vld [vmem:[%s17367_s5 + $0x3c4] ss:$28 sps:$4 sm:$0xff]  }
 0x34d   :  { %6197 = vmatprep.subr.bf16.mxu0 %v12499_v46  ;;  %v12566_v46 = vld [vmem:[%s17367_s5 + $0x5f8] ss:$28 sps:$4 sm:$0xff]  }
 0x34f   :  { %6382 = vmatpush1.bf16.msra.mxu1 %v12494_v47  ;;  %v12569_v47 = vld [vmem:[%s17367_s5 + $0x3c0] ss:$28 sps:$4 sm:$0xff]  }
 0x350   :  { %6198 = vmatpush1.bf16.msra.mxu0 %v12497_v49  ;;  %6392 = vmatprep.subr.bf16.mxu1 %v12502_v10  ;;  %v12574_v49 = vld [vmem:[%s17367_s5 + $0x634] ss:$28 sps:$4 sm:$0xff]   ;;  %v12577_v10 = vld [vmem:[%s17367_s5 + $0x3fc] ss:$28 sps:$4 sm:$0xff]  }
 0x351   :  { %6199 = vmatprep.subr.bf16.mxu0 %v12505_v36  ;;  %v12572_v36 = vld [vmem:[%s17367_s5 + $0x630] ss:$28 sps:$4 sm:$0xff]  }
 0x352   :  { %6384 = vmatmul.mubr.bf16.vlgmr.msra.gmra.mrb[20].mxu1 %v14986_v63 }
 0x353   :  { %6393 = vmatpush1.bf16.msra.mxu1 %v12500_v50  ;;  %6424 = vmatprep.mubr.bf16.mxu1 %v14995_v3  ;;  %v12575_v50 = vld [vmem:[%s17367_s5 + $0x3f8] ss:$28 sps:$4 sm:$0xff]  }
 0x354   :  { %6200 = vmatpush1.bf16.msra.mxu0 %v12503_v51  ;;  %6394 = vmatprep.subr.bf16.mxu1 %v12508_v15  ;;  %v12580_v51 = vld [vmem:[%s17367_s5 + $0x66c] ss:$28 sps:$4 sm:$0xff]   ;;  %v12583_v15 = vld [vmem:[%s17367_s5 + $0x434] ss:$28 sps:$4 sm:$0xff]  }
 0x355   :  { %6201 = vmatprep.subr.bf16.mxu0 %v12511_v53  ;;  %v12578_v53 = vld [vmem:[%s17367_s5 + $0x668] ss:$28 sps:$4 sm:$0xff]  }
 0x357   :  { %6395 = vmatpush1.bf16.msra.mxu1 %v12506_v55  ;;  %v12581_v55 = vld [vmem:[%s17367_s5 + $0x430] ss:$28 sps:$4 sm:$0xff]  }
 0x358   :  { %6202 = vmatpush1.bf16.msra.mxu0 %v12509_v57  ;;  %6396 = vmatprep.subr.bf16.mxu1 %v12514_v58  ;;  %v12586_v57 = vld [vmem:[%s17367_s5 + $0x6a4] ss:$28 sps:$4 sm:$0xff]   ;;  %v12589_v58 = vld [vmem:[%s17367_s5 + $0x46c] ss:$28 sps:$4 sm:$0xff]  }
 0x359   :  { %6203 = vmatprep.subr.bf16.mxu0 %v12517_v60  ;;  %v12584_v60 = vld [vmem:[%s17367_s5 + $0x6a0] ss:$28 sps:$4 sm:$0xff]  }
 0x35b   :  { %6397 = vmatpush1.bf16.msra.mxu1 %v12512_v24  ;;  %v12587_v24 = vld [vmem:[%s17367_s5 + $0x468] ss:$28 sps:$4 sm:$0xff]  }
 0x35c   :  { %6204 = vmatpush1.bf16.msra.mxu0 %v12515_v62  ;;  %6398 = vmatprep.subr.bf16.mxu1 %v12520_v0  ;;  %v12592_v62 = vld [vmem:[%s17367_s5 + $0x6dc] ss:$28 sps:$4 sm:$0xff]   ;;  %v12595_v0 = vld [vmem:[%s17367_s5 + $0x4a4] ss:$28 sps:$4 sm:$0xff]  }
 0x35d   :  { %6205 = vmatprep.subr.bf16.mxu0 %v12523_v7  ;;  %v12590_v7 = vld [vmem:[%s17367_s5 + $0x6d8] ss:$28 sps:$4 sm:$0xff]  }
 0x35f   :  { %6399 = vmatpush1.bf16.msra.mxu1 %v12518_v25  ;;  %v12593_v25 = vld [vmem:[%s17367_s5 + $0x4a0] ss:$28 sps:$4 sm:$0xff]  }
 0x360   :  { %6206 = vmatpush1.bf16.msra.mxu0 %v12521_v19  ;;  %6400 = vmatprep.subr.bf16.mxu1 %v12526_v8  ;;  %v12598_v19 = vld [vmem:[%s17367_s5 + $0x714] ss:$28 sps:$4 sm:$0xff]  }
 0x361   :  { %6207 = vmatprep.subr.bf16.mxu0 %v12529_v9  ;;  %v12596_v8 = vld [vmem:[%s17367_s5 + $0x710] ss:$28 sps:$4 sm:$0xff]   ;;  %v12601_v9 = vld [vmem:[%s17367_s5 + $0x4dc] ss:$28 sps:$4 sm:$0xff]  }
 0x363   :  { %6401 = vmatpush1.bf16.msra.mxu1 %v12524_v11  ;;  %v12599_v11 = vld [vmem:[%s17367_s5 + $0x4d8] ss:$28 sps:$4 sm:$0xff]  }
 0x364   :  { %6208 = vmatpush1.bf16.msra.mxu0 %v12527_v14  ;;  %6402 = vmatprep.subr.bf16.mxu1 %v12532_v12  ;;  %v12604_v14 = vld [vmem:[%s17367_s5 + $0x74c] ss:$28 sps:$4 sm:$0xff]  }
 0x365   :  { %6209 = vmatprep.subr.bf16.mxu0 %v12535_v16  ;;  %v12602_v12 = vld [vmem:[%s17367_s5 + $0x748] ss:$28 sps:$4 sm:$0xff]   ;;  %v12607_v16 = vld [vmem:[%s17367_s5 + $0x514] ss:$28 sps:$4 sm:$0xff]  }
 0x367   :  { %6403 = vmatpush1.bf16.msra.mxu1 %v12530_v17  ;;  %v12605_v17 = vld [vmem:[%s17367_s5 + $0x510] ss:$28 sps:$4 sm:$0xff]  }
 0x368   :  { %6210 = vmatpush1.bf16.msra.mxu0 %v12533_v23  ;;  %6404 = vmatprep.subr.bf16.mxu1 %v12538_v13  ;;  %v12610_v23 = vld [vmem:[%s17367_s5 + $0x784] ss:$28 sps:$4 sm:$0xff]  }
 0x369   :  { %6211 = vmatprep.subr.bf16.mxu0 %v12541_v26  ;;  %v12608_v13 = vld [vmem:[%s17367_s5 + $0x780] ss:$28 sps:$4 sm:$0xff]   ;;  %v12613_v26 = vld [vmem:[%s17367_s5 + $0x54c] ss:$28 sps:$4 sm:$0xff]  }
 0x36b   :  { %6405 = vmatpush1.bf16.msra.mxu1 %v12536_v27  ;;  %v12611_v27 = vld [vmem:[%s17367_s5 + $0x548] ss:$28 sps:$4 sm:$0xff]  }
 0x36c   :  { %6212 = vmatpush1.bf16.msra.mxu0 %v12539_v29  ;;  %6406 = vmatprep.subr.bf16.mxu1 %v12544_v31  ;;  %v12616_v29 = vld [vmem:[%s17367_s5 + $0x7bc] ss:$28 sps:$4 sm:$0xff]  }
 0x36d   :  { %6213 = vmatprep.subr.bf16.mxu0 %v12547_v21  ;;  %v12614_v31 = vld [vmem:[%s17367_s5 + $0x7b8] ss:$28 sps:$4 sm:$0xff]   ;;  %v12619_v21 = vld [vmem:[%s17367_s5 + $0x584] ss:$28 sps:$4 sm:$0xff]  }
 0x36f   :  { %6407 = vmatpush1.bf16.msra.mxu1 %v12542_v33  ;;  %v12617_v33 = vld [vmem:[%s17367_s5 + $0x580] ss:$28 sps:$4 sm:$0xff]  }
 0x370   :  { %6214 = vmatpush1.bf16.msra.mxu0 %v12545_v34  ;;  %6408 = vmatprep.subr.bf16.mxu1 %v12550_v28  ;;  %v12622_v34 = vld [vmem:[%s17367_s5 + $0x7f4] ss:$28 sps:$4 sm:$0xff]  }
 0x371   :  { %6215 = vmatprep.subr.bf16.mxu0 %v12553_v18  ;;  %v12620_v28 = vld [vmem:[%s17367_s5 + $0x7f0] ss:$28 sps:$4 sm:$0xff]   ;;  %v12625_v18 = vld [vmem:[%s17367_s5 + $0x5bc] ss:$28 sps:$4 sm:$0xff]  }
 0x373   :  { %6409 = vmatpush1.bf16.msra.mxu1 %v12548_v35  ;;  %v12623_v35 = vld [vmem:[%s17367_s5 + $0x5b8] ss:$28 sps:$4 sm:$0xff]  }
 0x374   :  { %6216 = vmatpush1.bf16.msra.mxu0 %v12551_v37  ;;  %6410 = vmatprep.subr.bf16.mxu1 %v12556_v5  ;;  %v12628_v37 = vld [vmem:[%s17367_s5 + $0x82c] ss:$28 sps:$4 sm:$0xff]  }
 0x375   :  { %6217 = vmatprep.subr.bf16.mxu0 %v12559_v48  ;;  %v12626_v5 = vld [vmem:[%s17367_s5 + $0x828] ss:$28 sps:$4 sm:$0xff]   ;;  %v12631_v48 = vld [vmem:[%s17367_s5 + $0x5f4] ss:$28 sps:$4 sm:$0xff]  }
 0x377   :  { %6411 = vmatpush1.bf16.msra.mxu1 %v12554_v39  ;;  %v12629_v39 = vld [vmem:[%s17367_s5 + $0x5f0] ss:$28 sps:$4 sm:$0xff]  }
 0x378   :  { %6218 = vmatpush1.bf16.msra.mxu0 %v12557_v40  ;;  %6412 = vmatprep.subr.bf16.mxu1 %v12562_v41  ;;  %v12634_v40 = vld [vmem:[%s17367_s5 + $0x864] ss:$28 sps:$4 sm:$0xff]  }
 0x379   :  { %6228 = vmatprep.subr.bf16.mxu0 %v12565_v42  ;;  %v12632_v41 = vld [vmem:[%s17367_s5 + $0x860] ss:$28 sps:$4 sm:$0xff]   ;;  %v12637_v42 = vld [vmem:[%s17367_s5 + $0x62c] ss:$28 sps:$4 sm:$0xff]  }
 0x37b   :  { %6220 = vmatmul.mubr.bf16.vlgmr.msra.gmra.mrb[16].mxu0 %v14986_v63  ;;  %6413 = vmatpush1.bf16.msra.mxu1 %v12560_v22  ;;  %v12635_v22 = vld [vmem:[%s17367_s5 + $0x628] ss:$28 sps:$4 sm:$0xff]  }
 0x37c   :  { %6229 = vmatpush1.bf16.msra.mxu0 %v12563_v43  ;;  %6260 = vmatprep.mubr.bf16.mxu0 %v14995_v3  ;;  %v12640_v43 = vld [vmem:[%s17367_s5 + $0x89c] ss:$28 sps:$4 sm:$0xff]  }
 0x37d   :  { %6414 = vmatprep.subr.bf16.mxu1 %v12568_v30  ;;  %6230 = vmatprep.subr.bf16.mxu0 %v12571_v45  ;;  %v12638_v30 = vld [vmem:[%s17367_s5 + $0x898] ss:$28 sps:$4 sm:$0xff]   ;;  %v12643_v45 = vld [vmem:[%s17367_s5 + $0x664] ss:$28 sps:$4 sm:$0xff]  }
 0x37f   :  { %6415 = vmatpush1.bf16.msra.mxu1 %v12566_v46  ;;  %v12641_v46 = vld [vmem:[%s17367_s5 + $0x660] ss:$28 sps:$4 sm:$0xff]  }
 0x380   :  { %6231 = vmatpush1.bf16.msra.mxu0 %v12569_v47  ;;  %6416 = vmatprep.subr.bf16.mxu1 %v12574_v49  ;;  %v12646_v47 = vld [vmem:[%s17367_s5 + $0x8d4] ss:$28 sps:$4 sm:$0xff]  }
 0x381   :  { %6232 = vmatprep.subr.bf16.mxu0 %v12577_v10  ;;  %v12644_v49 = vld [vmem:[%s17367_s5 + $0x8d0] ss:$28 sps:$4 sm:$0xff]   ;;  %v12649_v10 = vld [vmem:[%s17367_s5 + $0x69c] ss:$28 sps:$4 sm:$0xff]  }
 0x383   :  { %6417 = vmatpush1.bf16.msra.mxu1 %v12572_v36  ;;  %v12647_v36 = vld [vmem:[%s17367_s5 + $0x698] ss:$28 sps:$4 sm:$0xff]  }
 0x384   :  { %6233 = vmatpush1.bf16.msra.mxu0 %v12575_v50  ;;  %6418 = vmatprep.subr.bf16.mxu1 %v12580_v51  ;;  %v12652_v50 = vld [vmem:[%s17367_s5 + $0x90c] ss:$28 sps:$4 sm:$0xff]  }
 0x385   :  { %6234 = vmatprep.subr.bf16.mxu0 %v12583_v15  ;;  %v12650_v51 = vld [vmem:[%s17367_s5 + $0x908] ss:$28 sps:$4 sm:$0xff]   ;;  %v12655_v15 = vld [vmem:[%s17367_s5 + $0x6d4] ss:$28 sps:$4 sm:$0xff]  }
 0x387   :  { %6419 = vmatpush1.bf16.msra.mxu1 %v12578_v53  ;;  %v12653_v53 = vld [vmem:[%s17367_s5 + $0x6d0] ss:$28 sps:$4 sm:$0xff]  }
 0x388   :  { %6235 = vmatpush1.bf16.msra.mxu0 %v12581_v55  ;;  %6420 = vmatprep.subr.bf16.mxu1 %v12586_v57  ;;  %v12658_v55 = vld [vmem:[%s17367_s5 + $0x944] ss:$28 sps:$4 sm:$0xff]   ;;  %v12661_v57 = vld [vmem:[%s17367_s5 + $0x70c] ss:$28 sps:$4 sm:$0xff]  }
 0x389   :  { %6236 = vmatprep.subr.bf16.mxu0 %v12589_v58  ;;  %v12656_v58 = vld [vmem:[%s17367_s5 + $0x940] ss:$28 sps:$4 sm:$0xff]  }
 0x38b   :  { %6421 = vmatpush1.bf16.msra.mxu1 %v12584_v60  ;;  %v12659_v60 = vld [vmem:[%s17367_s5 + $0x708] ss:$28 sps:$4 sm:$0xff]  }
 0x38c   :  { %6237 = vmatpush1.bf16.msra.mxu0 %v12587_v24  ;;  %6422 = vmatprep.subr.bf16.mxu1 %v12592_v62  ;;  %v12662_v24 = vld [vmem:[%s17367_s5 + $0x978] ss:$28 sps:$4 sm:$0xff]  }
 0x38d   :  { %6238 = vmatprep.subr.bf16.mxu0 %v12595_v0  ;;  %v12664_v62 = vld [vmem:[%s17367_s5 + $0x97c] ss:$28 sps:$4 sm:$0xff]   ;;  %v12667_v0 = vld [vmem:[%s17367_s5 + $0x744] ss:$28 sps:$4 sm:$0xff]  }
 0x38f   :  { %6423 = vmatpush1.bf16.msra.mxu1 %v12590_v7  ;;  %v12665_v7 = vld [vmem:[%s17367_s5 + $0x740] ss:$28 sps:$4 sm:$0xff]  }
 0x390   :  { %6239 = vmatpush1.bf16.msra.mxu0 %v12593_v25  ;;  %6433 = vmatprep.subr.bf16.mxu1 %v12598_v19  ;;  %v12670_v25 = vld [vmem:[%s17367_s5 + $0x9b4] ss:$28 sps:$4 sm:$0xff]   ;;  %v12673_v19 = vld [vmem:[%s17367_s5 + $0x77c] ss:$28 sps:$4 sm:$0xff]  }
 0x391   :  { %6240 = vmatprep.subr.bf16.mxu0 %v12601_v9  ;;  %v12671_v9 = vld [vmem:[%s17367_s5 + $0x778] ss:$28 sps:$4 sm:$0xff]  }
 0x392   :  { %6425 = vmatmul.mubr.bf16.vlgmr.msra.gmra.mrb[20].mxu1 %v15119_v2 }
 0x393   :  { %6434 = vmatpush1.bf16.msra.mxu1 %v12596_v8  ;;  %6465 = vmatprep.mubr.bf16.mxu1 %v15259_v38  ;;  %v12668_v8 = vld [vmem:[%s17367_s5 + $0x9b0] ss:$28 sps:$4 sm:$0xff]  }
 0x394   :  { %6241 = vmatpush1.bf16.msra.mxu0 %v12599_v11  ;;  %6435 = vmatprep.subr.bf16.mxu1 %v12604_v14  ;;  %v12676_v11 = vld [vmem:[%s17367_s5 + $0x9ec] ss:$28 sps:$4 sm:$0xff]  }
 0x395   :  { %6242 = vmatprep.subr.bf16.mxu0 %v12607_v16  ;;  %v12674_v14 = vld [vmem:[%s17367_s5 + $0x9e8] ss:$28 sps:$4 sm:$0xff]   ;;  %v12677_v16 = vld [vmem:[%s17367_s5 + $0x7b0] ss:$28 sps:$4 sm:$0xff]  }
 0x397   :  { %6436 = vmatpush1.bf16.msra.mxu1 %v12602_v12  ;;  %v12679_v12 = vld [vmem:[%s17367_s5 + $0x7b4] ss:$28 sps:$4 sm:$0xff]  }
 0x398   :  { %6243 = vmatpush1.bf16.msra.mxu0 %v12605_v17  ;;  %6437 = vmatprep.subr.bf16.mxu1 %v12610_v23  ;;  %v12682_v17 = vld [vmem:[%s17367_s5 + $0xa24] ss:$28 sps:$4 sm:$0xff]   ;;  %v12685_v23 = vld [vmem:[%s17367_s5 + $0x7ec] ss:$28 sps:$4 sm:$0xff]  }
 0x399   :  { %6244 = vmatprep.subr.bf16.mxu0 %v12613_v26  ;;  %v12683_v26 = vld [vmem:[%s17367_s5 + $0x7e8] ss:$28 sps:$4 sm:$0xff]  }
 0x39b   :  { %6438 = vmatpush1.bf16.msra.mxu1 %v12608_v13  ;;  %v12680_v13 = vld [vmem:[%s17367_s5 + $0xa20] ss:$28 sps:$4 sm:$0xff]  }
 0x39c   :  { %6245 = vmatpush1.bf16.msra.mxu0 %v12611_v27  ;;  %6439 = vmatprep.subr.bf16.mxu1 %v12616_v29  ;;  %v12688_v27 = vld [vmem:[%s17367_s5 + $0xa5c] ss:$28 sps:$4 sm:$0xff]  }
 0x39d   :  { %6246 = vmatprep.subr.bf16.mxu0 %v12619_v21  ;;  %v12686_v29 = vld [vmem:[%s17367_s5 + $0xa58] ss:$28 sps:$4 sm:$0xff]   ;;  %v12689_v21 = vld [vmem:[%s17367_s5 + $0x820] ss:$28 sps:$4 sm:$0xff]  }
 0x39f   :  { %6440 = vmatpush1.bf16.msra.mxu1 %v12614_v31  ;;  %v12691_v31 = vld [vmem:[%s17367_s5 + $0x824] ss:$28 sps:$4 sm:$0xff]  }
 0x3a0   :  { %6247 = vmatpush1.bf16.msra.mxu0 %v12617_v33  ;;  %6441 = vmatprep.subr.bf16.mxu1 %v12622_v34  ;;  %v12694_v33 = vld [vmem:[%s17367_s5 + $0x85c] ss:$28 sps:$4 sm:$0xff]   ;;  %v12697_v34 = vld [vmem:[%s17367_s5 + $0xa94] ss:$28 sps:$4 sm:$0xff]  }
 0x3a1   :  { %6248 = vmatprep.subr.bf16.mxu0 %v12625_v18  ;;  %v12692_v18 = vld [vmem:[%s17367_s5 + $0x858] ss:$28 sps:$4 sm:$0xff]  }
 0x3a3   :  { %6442 = vmatpush1.bf16.msra.mxu1 %v12620_v28  ;;  %v12695_v28 = vld [vmem:[%s17367_s5 + $0xa90] ss:$28 sps:$4 sm:$0xff]  }
 0x3a4   :  { %6249 = vmatpush1.bf16.msra.mxu0 %v12623_v35  ;;  %6443 = vmatprep.subr.bf16.mxu1 %v12628_v37  ;;  %v12700_v35 = vld [vmem:[%s17367_s5 + $0x894] ss:$28 sps:$4 sm:$0xff]   ;;  %v12703_v37 = vld [vmem:[%s17367_s5 + $0xacc] ss:$28 sps:$4 sm:$0xff]  }
 0x3a5   :  { %6250 = vmatprep.subr.bf16.mxu0 %v12631_v48  ;;  %v12698_v48 = vld [vmem:[%s17367_s5 + $0x890] ss:$28 sps:$4 sm:$0xff]  }
 0x3a7   :  { %6444 = vmatpush1.bf16.msra.mxu1 %v12626_v5  ;;  %v12701_v5 = vld [vmem:[%s17367_s5 + $0xac8] ss:$28 sps:$4 sm:$0xff]  }
 0x3a8   :  { %6251 = vmatpush1.bf16.msra.mxu0 %v12629_v39  ;;  %6445 = vmatprep.subr.bf16.mxu1 %v12634_v40  ;;  %v12706_v39 = vld [vmem:[%s17367_s5 + $0x8cc] ss:$28 sps:$4 sm:$0xff]  }
 0x3a9   :  { %6252 = vmatprep.subr.bf16.mxu0 %v12637_v42  ;;  %v12704_v40 = vld [vmem:[%s17367_s5 + $0x8c8] ss:$28 sps:$4 sm:$0xff]  }
 0x3aa   :  { %v12709_v42 = vld [vmem:[%s17367_s5 + $0x904] ss:$28 sps:$4 sm:$0xff]  }
 0x3ab   :  { %6446 = vmatpush1.bf16.msra.mxu1 %v12632_v41  ;;  %v13329_v41 = vmov 0.0  }
 0x3ac   :  { %6253 = vmatpush1.bf16.msra.mxu0 %v12635_v22  ;;  %6447 = vmatprep.subr.bf16.mxu1 %v12640_v43  ;;  %v12710_v22 = vld [vmem:[%s17367_s5 + $0xa98] ss:$28 sps:$4 sm:$0xff]   ;;  %v12707_v43 = vld [vmem:[%s17367_s5 + $0x900] ss:$28 sps:$4 sm:$0xff]  }
 0x3ad   :  { %6254 = vmatprep.subr.bf16.mxu0 %v12643_v45  ;;  %v12714_v45 = vld [vmem:[%s17367_s5 + $0xad0] ss:$28 sps:$4 sm:$0xff]  }
 0x3af   :  { %6448 = vmatpush1.bf16.msra.mxu1 %v12638_v30  ;;  %v12713_v30 = vld [vmem:[%s17367_s5 + $0x93c] ss:$28 sps:$4 sm:$0xff]  }
 0x3b0   :  { %6255 = vmatpush1.bf16.msra.mxu0 %v12641_v46  ;;  %6449 = vmatprep.subr.bf16.mxu1 %v12646_v47  ;;  %v12711_v46 = vld [vmem:[%s17367_s5 + $0x938] ss:$28 sps:$4 sm:$0xff]  }
 0x3b1   :  { %6256 = vmatprep.subr.bf16.mxu0 %v12649_v10  ;;  %v12717_v47 = vld [vmem:[%s17367_s5 + $0x974] ss:$28 sps:$4 sm:$0xff]   ;;  %v12741_v10 = vld [vmem:[%s17371_s9] ss:$28 sps:$4 sm:$0xff]  }
 0x3b3   :  { %6450 = vmatpush1.bf16.msra.mxu1 %v12644_v49  ;;  %v12743_v49 = vld [vmem:[%s17371_s9 + $0x4] ss:$28 sps:$4 sm:$0xff]  }
 0x3b4   :  { %6257 = vmatpush1.bf16.msra.mxu0 %v12647_v36  ;;  %6451 = vmatprep.subr.bf16.mxu1 %v12652_v50  ;;  %v12715_v36 = vld [vmem:[%s17367_s5 + $0x970] ss:$28 sps:$4 sm:$0xff]   ;;  %v12748_v50 = vld [vmem:[%s17371_s9 + $0x3c] ss:$28 sps:$4 sm:$0xff]  }
 0x3b5   :  { %6258 = vmatprep.subr.bf16.mxu0 %v12655_v15  ;;  %v12720_v15 = vld [vmem:[%s17367_s5 + $0x9ac] ss:$28 sps:$4 sm:$0xff]  }
 0x3b7   :  { %6452 = vmatpush1.bf16.msra.mxu1 %v12650_v51 }
 0x3b8   :  { %6259 = vmatpush1.bf16.msra.mxu0 %v12653_v53  ;;  %6453 = vmatprep.subr.bf16.mxu1 %v12658_v55  ;;  %v12718_v55 = vld [vmem:[%s17367_s5 + $0x9a8] ss:$28 sps:$4 sm:$0xff]  }
 0x3b9   :  { %6269 = vmatprep.subr.bf16.mxu0 %v12661_v57  ;;  %v12746_v57 = vld [vmem:[%s17371_s9 + $0x38] ss:$28 sps:$4 sm:$0xff]  }
 0x3bb   :  { %6261 = vmatmul.mubr.bf16.vlgmr.msra.gmra.mrb[16].mxu0 %v15119_v2  ;;  %6454 = vmatpush1.bf16.msra.mxu1 %v12656_v58 }
 0x3bc   :  { %6270 = vmatpush1.bf16.msra.mxu0 %v12659_v60  ;;  %6301 = vmatprep.mubr.bf16.mxu0 %v15259_v38 }
 0x3bd   :  { %6455 = vmatprep.subr.bf16.mxu1 %v12664_v62  ;;  %6271 = vmatprep.subr.bf16.mxu0 %v12667_v0  ;;  %v12753_v62 = vld [vmem:[%s17371_s9 + $0x74] ss:$28 sps:$4 sm:$0xff]  }
 0x3be   :  { %v12751_v0 = vld [vmem:[%s17371_s9 + $0x70] ss:$28 sps:$4 sm:$0xff]  }
 0x3bf   :  { %6456 = vmatpush1.bf16.msra.mxu1 %v12662_v24  ;;  %v12723_v24 = vld [vmem:[%s17367_s5 + $0x9e4] ss:$28 sps:$4 sm:$0xff]  }
 0x3c0   :  { %6272 = vmatpush1.bf16.msra.mxu0 %v12665_v7  ;;  %6457 = vmatprep.subr.bf16.mxu1 %v12670_v25  ;;  %v12721_v7 = vld [vmem:[%s17367_s5 + $0x9e0] ss:$28 sps:$4 sm:$0xff]  }
 0x3c1   :  { %6273 = vmatprep.subr.bf16.mxu0 %v12673_v19  ;;  %v12726_v25 = vld [vmem:[%s17367_s5 + $0xa1c] ss:$28 sps:$4 sm:$0xff]   ;;  %v12758_v19 = vld [vmem:[%s17371_s9 + $0xac] ss:$28 sps:$4 sm:$0xff]  }
 0x3c3   :  { %6458 = vmatpush1.bf16.msra.mxu1 %v12668_v8  ;;  %v12756_v8 = vld [vmem:[%s17371_s9 + $0xa8] ss:$28 sps:$4 sm:$0xff]  }
 0x3c4   :  { %6274 = vmatpush1.bf16.msra.mxu0 %v12671_v9  ;;  %6459 = vmatprep.subr.bf16.mxu1 %v12676_v11  ;;  %v12724_v9 = vld [vmem:[%s17367_s5 + $0xa18] ss:$28 sps:$4 sm:$0xff]  }
 0x3c5   :  { %6275 = vmatprep.subr.bf16.mxu0 %v12679_v12  ;;  %v12729_v11 = vld [vmem:[%s17367_s5 + $0xa54] ss:$28 sps:$4 sm:$0xff]   ;;  %v12761_v12 = vld [vmem:[%s17371_s9 + $0xe0] ss:$28 sps:$4 sm:$0xff]  }
 0x3c7   :  { %6460 = vmatpush1.bf16.msra.mxu1 %v12674_v14  ;;  %v12763_v14 = vld [vmem:[%s17371_s9 + $0xe4] ss:$28 sps:$4 sm:$0xff]  }
 0x3c8   :  { %6276 = vmatpush1.bf16.msra.mxu0 %v12677_v16  ;;  %6461 = vmatprep.subr.bf16.mxu1 %v12682_v17  ;;  %v12727_v16 = vld [vmem:[%s17367_s5 + $0xa50] ss:$28 sps:$4 sm:$0xff]  }
 0x3c9   :  { %6277 = vmatprep.subr.bf16.mxu0 %v12685_v23  ;;  %v12732_v17 = vld [vmem:[%s17367_s5 + $0xa8c] ss:$28 sps:$4 sm:$0xff]   ;;  %v12768_v23 = vld [vmem:[%s17371_s9 + $0x11c] ss:$28 sps:$4 sm:$0xff]  }
 0x3cb   :  { %6462 = vmatpush1.bf16.msra.mxu1 %v12680_v13  ;;  %v12766_v13 = vld [vmem:[%s17371_s9 + $0x118] ss:$28 sps:$4 sm:$0xff]  }
 0x3cc   :  { %6278 = vmatpush1.bf16.msra.mxu0 %v12683_v26  ;;  %6463 = vmatprep.subr.bf16.mxu1 %v12688_v27  ;;  %v12730_v26 = vld [vmem:[%s17367_s5 + $0xa88] ss:$28 sps:$4 sm:$0xff]  }
 0x3cd   :  { %6279 = vmatprep.subr.bf16.mxu0 %v12691_v31  ;;  %v12735_v27 = vld [vmem:[%s17367_s5 + $0xac4] ss:$28 sps:$4 sm:$0xff]   ;;  %v12771_v31 = vld [vmem:[%s17371_s9 + $0x150] ss:$28 sps:$4 sm:$0xff]  }
 0x3cf   :  { %6464 = vmatpush1.bf16.msra.mxu1 %v12686_v29  ;;  %v12773_v29 = vld [vmem:[%s17371_s9 + $0x154] ss:$28 sps:$4 sm:$0xff]  }
 0x3d0   :  { %6280 = vmatpush1.bf16.msra.mxu0 %v12689_v21  ;;  %6474 = vmatprep.subr.bf16.mxu1 %v12697_v34  ;;  %v12733_v21 = vld [vmem:[%s17367_s5 + $0xac0] ss:$28 sps:$4 sm:$0xff]   ;;  %v12778_v34 = vld [vmem:[%s17371_s9 + $0x18c] ss:$28 sps:$4 sm:$0xff]  }
 0x3d1   :  { %6281 = vmatprep.subr.bf16.mxu0 %v12694_v33  ;;  %v12736_v33 = vld [vmem:[%s17367_s5 + $0x1d8] ss:$28 sps:$4 sm:$0xff]  }
 0x3d2   :  { %6466 = vmatmul.mubr.bf16.vlgmr.msra.gmra.mrb[20].mxu1 %v15264_v20 }
 0x3d3   :  { %6475 = vmatpush1.bf16.msra.mxu1 %v12695_v28  ;;  %6506 = vmatprep.mubr.bf16.mxu1 %v13328_v56  ;;  %v12776_v28 = vld [vmem:[%s17371_s9 + $0x188] ss:$28 sps:$4 sm:$0xff]  }
 0x3d4   :  { %6282 = vmatpush1.bf16.msra.mxu0 %v12692_v18  ;;  %6476 = vmatprep.subr.bf16.mxu1 %v12703_v37  ;;  %v12783_v18 = vld [vmem:[%s17371_s9 + $0x1c4] ss:$28 sps:$4 sm:$0xff]   ;;  %v12737_v37 = vld [vmem:[%s17367_s5 + $0x18] ss:$28 sps:$4 sm:$0xff]  }
 0x3d5   :  { %6283 = vmatprep.subr.bf16.mxu0 %v12700_v35  ;;  %v12781_v35 = vld [vmem:[%s17371_s9 + $0x1c0] ss:$28 sps:$4 sm:$0xff]  }
 0x3d7   :  { %6477 = vmatpush1.bf16.msra.mxu1 %v12701_v5  ;;  %v12738_v5 = vld [vmem:[%s17367_s5 + $0x210] ss:$28 sps:$4 sm:$0xff]  }
 0x3d8   :  { %6284 = vmatpush1.bf16.msra.mxu0 %v12698_v48  ;;  %11511 = vmatprep.subr.bf16.mxu1 %v13329_v41  ;;  %v12788_v48 = vld [vmem:[%s17371_s9 + $0x1fc] ss:$28 sps:$4 sm:$0xff]  }
 0x3d9   :  { %6285 = vmatprep.subr.bf16.mxu0 %v12706_v39  ;;  %v12786_v39 = vld [vmem:[%s17371_s9 + $0x1f8] ss:$28 sps:$4 sm:$0xff]  }
 0x3dc   :  { %6286 = vmatpush1.bf16.msra.mxu0 %v12704_v40  ;;  %v12739_v40 = vld [vmem:[%s17367_s5 + $0x50] ss:$28 sps:$4 sm:$0xff]  }
 0x3dd   :  { %6287 = vmatprep.subr.bf16.mxu0 %v12709_v42  ;;  %v12740_v42 = vld [vmem:[%s17367_s5 + $0x248] ss:$28 sps:$4 sm:$0xff]  }
 0x3de   :  { %10928 = vmatmul.mubr.msk.bf16.vlgmr.msra.gmra.mrb[20].mxu1 %vm3589_vm4, %v15343_v32 }
 0x3df   :  { %11512 = vmatpush3.bf16.msra.mxu1 %v12710_v22  ;;  %11515 = vmatprep.mubr.msk.bf16.mxu1 %vm13330_vm8, %v13329_v41  ;;  %v12793_v22 = vld [vmem:[%s17371_s9 + $0x234] ss:$28 sps:$4 sm:$0xff]  }
 0x3e0   :  { %6288 = vmatpush1.bf16.msra.mxu0 %v12707_v43  ;;  %11513 = vmatprep.subr.bf16.mxu1 %v13329_v41  ;;  %v12791_v43 = vld [vmem:[%s17371_s9 + $0x230] ss:$28 sps:$4 sm:$0xff]  }
 0x3e1   :  { %6289 = vmatprep.subr.bf16.mxu0 %v12713_v30  ;;  %v12798_v30 = vld [vmem:[%s17371_s9 + $0x26c] ss:$28 sps:$4 sm:$0xff]  }
 0x3e3   :  { %11514 = vmatpush3.bf16.msra.mxu1 %v12714_v45  ;;  %v12796_v45 = vld [vmem:[%s17371_s9 + $0x268] ss:$28 sps:$4 sm:$0xff]  }
 0x3e4   :  { %6290 = vmatpush1.bf16.msra.mxu0 %v12711_v46  ;;  %9143 = vmatprep.subr.bf16.mxu1 %v12743_v49 }
 0x3e5   :  { %v15871_v51 = vpop.f32.mrb[16].mxu1  ;;  %6291 = vmatprep.subr.bf16.mxu0 %v12717_v47  ;;  %v12749_v47 = vld [vmem:[%s17367_s5 + $0xc0] ss:$28 sps:$4 sm:$0xff]  }
 0x3e6   :  { %11516 = vmatmul.mubr.msk.bf16.vlgmr.msra.gmra.mrb[24].mxu1 %vm3589_vm4, %v15343_v32  ;;  %v15878_v53 = vpop.f32.mrb[17].mxu1 }
 0x3e7   :  { %v6143_v58 = vpop.f32.mrb[18].mxu1  ;;  %9144 = vmatpush1.bf16.msra.mxu1 %v12741_v10 }
 0x3e8   :  { %6292 = vmatpush1.bf16.msra.mxu0 %v12715_v36  ;;  %v6144_v60 = vpop.f32.mrb[19].mxu1  ;;  %9145 = vmatprep.subr.bf16.mxu1 %v12748_v50 }
 0x3e9   :  { %6293 = vmatprep.subr.bf16.mxu0 %v12720_v15  ;;  %v12750_v15 = vld [vmem:[%s17367_s5 + $0x2b8] ss:$28 sps:$4 sm:$0xff]  }
 0x3eb   :  { %9146 = vmatpush1.bf16.msra.mxu1 %v12746_v57 }
 0x3ec   :  { %6294 = vmatpush1.bf16.msra.mxu0 %v12718_v55  ;;  %9147 = vmatprep.subr.bf16.mxu1 %v12753_v62  ;;  %v12803_v55 = vld [vmem:[%s17371_s9 + $0x2a4] ss:$28 sps:$4 sm:$0xff]  }
 0x3ed   :  { %6295 = vmatprep.subr.bf16.mxu0 %v12723_v24 }
 0x3ef   :  { %9148 = vmatpush1.bf16.msra.mxu1 %v12751_v0  ;;  %v12755_v0 = vld [vmem:[%s17367_s5 + $0x2f0] ss:$28 sps:$4 sm:$0xff]  }
 0x3f0   :  { %6296 = vmatpush1.bf16.msra.mxu0 %v12721_v7  ;;  %9149 = vmatprep.subr.bf16.mxu1 %v12758_v19  ;;  %v12808_v7 = vld [vmem:[%s17371_s9 + $0x2dc] ss:$28 sps:$4 sm:$0xff]  }
 0x3f1   :  { %6297 = vmatprep.subr.bf16.mxu0 %v12726_v25  ;;  %v12806_v19 = vld [vmem:[%s17371_s9 + $0x2d8] ss:$28 sps:$4 sm:$0xff]  }
 0x3f3   :  { %9150 = vmatpush1.bf16.msra.mxu1 %v12756_v8 }
 0x3f4   :  { %6298 = vmatpush1.bf16.msra.mxu0 %v12724_v9  ;;  %9151 = vmatprep.subr.bf16.mxu1 %v12763_v14  ;;  %v12759_v9 = vld [vmem:[%s17367_s5 + $0x130] ss:$28 sps:$4 sm:$0xff]  }
 0x3f5   :  { %6299 = vmatprep.subr.bf16.mxu0 %v12729_v11 }
 0x3f7   :  { %9152 = vmatpush1.bf16.msra.mxu1 %v12761_v12  ;;  %v12760_v12 = vld [vmem:[%s17367_s5 + $0x328] ss:$28 sps:$4 sm:$0xff]  }
 0x3f8   :  { %6300 = vmatpush1.bf16.msra.mxu0 %v12727_v16  ;;  %9153 = vmatprep.subr.bf16.mxu1 %v12768_v23  ;;  %v12813_v16 = vld [vmem:[%s17371_s9 + $0x314] ss:$28 sps:$4 sm:$0xff]  }
 0x3f9   :  { %6310 = vmatprep.subr.bf16.mxu0 %v12732_v17  ;;  %v12811_v23 = vld [vmem:[%s17371_s9 + $0x310] ss:$28 sps:$4 sm:$0xff]  }
 0x3fb   :  { %6302 = vmatmul.mubr.bf16.vlgmr.msra.gmra.mrb[16].mxu0 %v15264_v20  ;;  %9154 = vmatpush1.bf16.msra.mxu1 %v12766_v13 }
 0x3fc   :  { %6311 = vmatpush1.bf16.msra.mxu0 %v12730_v26  ;;  %6342 = vmatprep.mubr.bf16.mxu0 %v13328_v56  ;;  %v12764_v26 = vld [vmem:[%s17367_s5 + $0x168] ss:$28 sps:$4 sm:$0xff]  }
 0x3fd   :  { %6312 = vmatprep.subr.bf16.mxu0 %v12735_v27  ;;  %9155 = vmatprep.subr.bf16.mxu1 %v12773_v29 }
 0x3ff   :  { %9156 = vmatpush1.bf16.msra.mxu1 %v12771_v31  ;;  %v12765_v31 = vld [vmem:[%s17367_s5 + $0x360] ss:$28 sps:$4 sm:$0xff]  }
 0x400   :  { %6313 = vmatpush1.bf16.msra.mxu0 %v12733_v21  ;;  %9157 = vmatprep.subr.bf16.mxu1 %v12778_v34  ;;  %v12818_v21 = vld [vmem:[%s17371_s9 + $0x34c] ss:$28 sps:$4 sm:$0xff]  }
 0x401   :  { %11373 = vmatprep.subr.bf16.mxu0 %v12736_v33  ;;  %v12816_v34 = vld [vmem:[%s17371_s9 + $0x348] ss:$28 sps:$4 sm:$0xff]  }
 0x403   :  { %9158 = vmatpush1.bf16.msra.mxu1 %v12776_v28 }
 0x404   :  { %9159 = vmatprep.subr.bf16.mxu1 %v12783_v18 }
 0x407   :  { %10927 = vmatmul.mubr.msk.bf16.vlgmr.msra.gmra.mrb[16].mxu0 %vm3589_vm4, %v15343_v32  ;;  %9160 = vmatpush1.bf16.msra.mxu1 %v12781_v35  ;;  %v12744_v32 = vld [vmem:[%s17367_s5 + $0x88] ss:$28 sps:$4 sm:$0xff]  }
 0x408   :  { %11374 = vmatpush3.bf16.msra.mxu0 %v12737_v37  ;;  %6547 = vmatprep.mubr.bf16.mxu0 %v14981_v59  ;;  %v12745_v59 = vld [vmem:[%s17367_s5 + $0x280] ss:$28 sps:$4 sm:$0xff]  }
 0x409   :  { %11375 = vmatprep.subr.bf16.mxu0 %v12738_v5  ;;  %9161 = vmatprep.subr.bf16.mxu1 %v12788_v48  ;;  %v12769_v37 = vld [vmem:[%s17367_s5 + $0x1a0] ss:$28 sps:$4 sm:$0xff]   ;;  %v12770_v5 = vld [vmem:[%s17367_s5 + $0x558] ss:$28 sps:$4 sm:$0xff]  }
 0x40b   :  { %9162 = vmatpush1.bf16.msra.mxu1 %v12786_v39 }
 0x40c   :  { %11376 = vmatpush3.bf16.msra.mxu0 %v12739_v40  ;;  %9163 = vmatprep.subr.bf16.mxu1 %v12793_v22  ;;  %v12774_v40 = vld [vmem:[%s17367_s5 + $0x398] ss:$28 sps:$4 sm:$0xff]   ;;  %v12775_v22 = vld [vmem:[%s17367_s5 + $0x590] ss:$28 sps:$4 sm:$0xff]  }
 0x40d   :  { %11377 = vmatprep.subr.bf16.mxu0 %v12740_v42 }
 0x40e   :  { %v6180_v46 = vpop.f32.mrb[12].mxu0 }
 0x40f   :  { %v11527_v49 = vadd.f32 %v6180_v46, %v15871_v51  ;;  %v6182_v10 = vpop.f32.mrb[13].mxu0  ;;  %9164 = vmatpush1.bf16.msra.mxu1 %v12791_v43  ;;  %v12801_v51 = vld [vmem:[%s17371_s9 + $0x2a0] ss:$28 sps:$4 sm:$0xff]   ;;  %v12780_v46 = vld [vmem:[%s17367_s5 + $0x5c8] ss:$28 sps:$4 sm:$0xff]  }
 0x410   :  { %11378 = vmatpush3.bf16.msra.mxu0 %v12744_v32  ;;  %v11528_v36 = vadd.f32 %v6182_v10, %v15878_v53  ;;  %v6184_v50 = vpop.f32.mrb[14].mxu0  ;;  %9165 = vmatprep.subr.bf16.mxu1 %v12798_v30  ;;  %v12754_v53 = vld [vmem:[%s17367_s5 + $0xf8] ss:$28 sps:$4 sm:$0xff]   ;;  %v12779_v30 = vld [vmem:[%s17367_s5 + $0x3d0] ss:$28 sps:$4 sm:$0xff]  }
 0x411   :  { %v6675_v57 = vrot.slane %v11527_v49, 4  ;;  %v6185_v58 = vpop.f32.mrb[15].mxu0  ;;  %11379 = vmatprep.subr.bf16.mxu0 %v12745_v59 }
 0x412   :  { %v6681_v60 = vrot.slane %v11528_v36, 4 }
 0x413   :  { %v6676_v24 = vadd.f32 %v11527_v49, %v6675_v57  ;;  %9166 = vmatpush1.bf16.msra.mxu1 %v12796_v45 }
 0x414   :  { %v6682_v62 = vadd.f32 %v11528_v36, %v6681_v60  ;;  %11380 = vmatpush3.bf16.msra.mxu0 %v12749_v47  ;;  %9167 = vmatprep.subr.bf16.mxu1 %v12803_v55 }
 0x415   :  { %v6677_v25 = vrot.slane %v6676_v24, 2  ;;  %11381 = vmatprep.subr.bf16.mxu0 %v12750_v15 }
 0x416   :  { %v6683_v8 = vrot.slane %v6682_v62, 2 }
 0x417   :  { %v6678_v11 = vadd.f32 %v6677_v25, %v6676_v24  ;;  %9168 = vmatpush1.bf16.msra.mxu1 %v12801_v51  ;;  %v12790_v51 = vld [vmem:[%s17367_s5 + $0x638] ss:$28 sps:$4 sm:$0xff]   ;;  %v16104_v25 = vld [vmem:[%s17372_s6] sm:$0x7f] }
 0x418   :  { %v6684_v14 = vadd.f32 %v6683_v8, %v6682_v62  ;;  %11382 = vmatpush3.bf16.msra.mxu0 %v12754_v53  ;;  %9169 = vmatprep.subr.bf16.mxu1 %v12808_v7  ;;  %v12794_v62 = vld [vmem:[%s17367_s5 + $0x478] ss:$28 sps:$4 sm:$0xff]   ;;  %v12799_v7 = vld [vmem:[%s17367_s5 + $0x4b0] ss:$28 sps:$4 sm:$0xff]   ;;  %v16112_v8 = vld [vmem:[%s17373_s7] sm:$0x7f] }
 0x419   :  { %v6679_v17 = vrot.slane %v6678_v11, 1  ;;  %11383 = vmatprep.subr.bf16.mxu0 %v12755_v0  ;;  %v12795_v0 = vld [vmem:[%s17367_s5 + $0x670] ss:$28 sps:$4 sm:$0xff]  }
 0x41a   :  { %v6685_v13 = vrot.slane %v6684_v14, 1 }
 0x41b   :  { %v6680_v27 = vadd.f32 %v6679_v17, %v6678_v11  ;;  %9170 = vmatpush1.bf16.msra.mxu1 %v12806_v19  ;;  %v12800_v19 = vld [vmem:[%s17367_s5 + $0x6a8] ss:$28 sps:$4 sm:$0xff]  }
 0x41c   :  { %v6686_v29 = vadd.f32 %v6685_v13, %v6684_v14  ;;  %11384 = vmatpush3.bf16.msra.mxu0 %v12759_v9  ;;  %9171 = vmatprep.subr.bf16.mxu1 %v12813_v16  ;;  %v6815_v9 = vrot.slane %v16104_v25, %v14894_v61  ;;  %v12804_v11 = vld [vmem:[%s17367_s5 + $0x4e8] ss:$28 sps:$4 sm:$0xff]   ;;  %v12805_v16 = vld [vmem:[%s17367_s5 + $0x6e0] ss:$28 sps:$4 sm:$0xff]   ;;  %v6859_v13 = vrot.slane %v16112_v8, %v14894_v61 }
 0x41d   :  { %v6718_v33 = vmul.f32 0.125, %v6680_v27  ;;  %11385 = vmatprep.subr.bf16.mxu0 %v12760_v12  ;;  %v6819_v12 = vrot.slane %v16104_v25, %v14900_v1  ;;  %v6863_v27 = vrot.slane %v16112_v8, %v14900_v1 }
 0x41e   :  { %v6719_v28 = vmul.f32 0.125, %v6686_v29 }
 0x41f   :  { %v16052_v18 = vsub.f32 %v11527_v49, %v6718_v33  ;;  %9172 = vmatpush1.bf16.msra.mxu1 %v12811_v23  ;;  %v12810_v33 = vld [vmem:[%s17367_s5 + $0x8d8] ss:$28 sps:$4 sm:$0xff]  }
 0x420   :  { %v16054_v35 = vsub.f32 %v11528_v36, %v6719_v28  ;;  %11386 = vmatpush3.bf16.msra.mxu0 %v12764_v26  ;;  %9173 = vmatprep.subr.bf16.mxu1 %v12818_v21  ;;  %v12784_v36 = vld [vmem:[%s17367_s5 + $0x408] ss:$28 sps:$4 sm:$0xff]  }
 0x421   :  { %v6732_v48 = vmul.f32 %v16052_v18, %v16052_v18  ;;  %11387 = vmatprep.subr.bf16.mxu0 %v12765_v31  ;;  %v12809_v31 = vld [vmem:[%s17367_s5 + $0x520] ss:$28 sps:$4 sm:$0xff]  }
 0x422   :  { %v6733_v39 = vmul.f32 %v16054_v35, %v16054_v35 }
 0x423   :  { %v6739_v42 = vrot.slane %v6732_v48, 4  ;;  %9174 = vmatpush1.bf16.msra.mxu1 %v12816_v34 }
 0x424   :  { %v6745_v43 = vrot.slane %v6733_v39, 4  ;;  %11388 = vmatpush3.bf16.msra.mxu0 %v12769_v37  ;;  %v6919_v37 = vld [vmem:[%s17374_s8] sm:$0xff] }
 0x425   :  { %v6740_v32 = vadd.f32 %v6739_v42, %v6732_v48  ;;  %11395 = vmatprep.subr.bf16.mxu0 %v12770_v5  ;;  %v12815_v5 = vld [vmem:[%s17367_s5 + $0x910] ss:$28 sps:$4 sm:$0xff]  }
 0x426   :  { %v6746_v59 = vadd.f32 %v6745_v43, %v6733_v39  ;;  %v6920_v39 = vld [vmem:[%s17374_s8 + $0x8] sm:$0xff] }
 0x427   :  { %v6741_v45 = vrot.slane %v6740_v32, 2  ;;  %6548 = vmatmul.mubr.bf16.vlgmr.msra.gmra.mrb[20].mxu0 %v14986_v63  ;;  %v12785_v63 = vld [vmem:[%s17367_s5 + $0x600] ss:$28 sps:$4 sm:$0xff]   ;;  %v12819_v43 = vld [vmem:[%s17367_s5 + $0x750] ss:$28 sps:$4 sm:$0xff]  }
 0x428   :  { %v6747_v47 = vrot.slane %v6746_v59, 2  ;;  %11396 = vmatpush3.bf16.msra.mxu0 %v12774_v40  ;;  %6587 = vmatprep.mubr.bf16.mxu0 %v14995_v3  ;;  %v12789_v3 = vld [vmem:[%s17367_s5 + $0x440] ss:$28 sps:$4 sm:$0xff]  }
 0x429   :  { %v6742_v49 = vadd.f32 %v6741_v45, %v6740_v32  ;;  %11397 = vmatprep.subr.bf16.mxu0 %v12775_v22 }
 0x42a   :  { %v6748_v10 = vadd.f32 %v6747_v47, %v6746_v59  ;;  %v12820_v59 = vld [vmem:[%s17367_s5 + $0x948] ss:$28 sps:$4 sm:$0xff]   ;;  %v12824_v47 = vld [vmem:[%s17367_s5 + $0x9b8] ss:$28 sps:$4 sm:$0xff]  }
 0x42b   :  { %v6743_v50 = vrot.slane %v6742_v49, 1 }
 0x42c   :  { %v6749_v15 = vrot.slane %v6748_v10, 1  ;;  %11398 = vmatpush3.bf16.msra.mxu0 %v12779_v30 }
 0x42d   :  { %v6744_v55 = vadd.f32 %v6743_v50, %v6742_v49  ;;  %11399 = vmatprep.subr.bf16.mxu0 %v12780_v46  ;;  %v12823_v46 = vld [vmem:[%s17367_s5 + $0x7c0] ss:$28 sps:$4 sm:$0xff]   ;;  %v12825_v49 = vld [vmem:[%s17367_s5 + $0x7f8] ss:$28 sps:$4 sm:$0xff]  }
 0x42e   :  { %v6750_v57 = vadd.f32 %v6749_v15, %v6748_v10  ;;  %v12826_v10 = vld [vmem:[%s17367_s5 + $0x9f0] ss:$28 sps:$4 sm:$0xff]   ;;  %v12880_v50 = vld [vmem:[%s17371_s9 + $0x380] ss:$28 sps:$4 sm:$0xff]   ;;  %v12828_v15 = vld [vmem:[%s17367_s5 + $0xa28] ss:$28 sps:$4 sm:$0xff]  }
 0x42f   :  { %v6782_v58 = vmul.f32 0.125, %v6744_v55  ;;  %v12888_v55 = vld [vmem:[%s17371_s9 + $0x3bc] ss:$28 sps:$4 sm:$0xff]  }
 0x430   :  { %v6783_v60 = vmul.f32 0.125, %v6750_v57  ;;  %11400 = vmatpush3.bf16.msra.mxu0 %v12784_v36  ;;  %v12882_v36 = vld [vmem:[%s17371_s9 + $0x384] ss:$28 sps:$4 sm:$0xff]   ;;  %v12886_v57 = vld [vmem:[%s17371_s9 + $0x3b8] ss:$28 sps:$4 sm:$0xff]  }
 0x431   :  { %v6789_v53 = vadd.f32 1e-05, %v6782_v58  ;;  %11401 = vmatprep.subr.bf16.mxu0 %v12785_v63  ;;  %9184 = vmatprep.subr.bf16.mxu1 %v12882_v36  ;;  %v12827_v63 = vld [vmem:[%s17367_s5 + $0x830] ss:$28 sps:$4 sm:$0xff]   ;;  %v12830_v58 = vld [vmem:[%s17367_s5 + $0xa60] ss:$28 sps:$4 sm:$0xff]  }
 0x432   :  { %v6790_v24 = vadd.f32 1e-05, %v6783_v60  ;;  %v12892_v60 = vld [vmem:[%s17371_s9 + $0x3f0] ss:$28 sps:$4 sm:$0xff]   ;;  %v12864_v36 = vld [vmem:[%s17371_s9 + $0x23c] ss:$28 sps:$4 sm:$0xff]  }
 0x433   :  { %13298 = vrsqrt.f32 %v6789_v53  ;;  %v12831_v53 = vld [vmem:[%s17367_s5 + $0x8a0] ss:$28 sps:$4 sm:$0xff]  }
 0x434   :  { %13300 = vrsqrt.f32 %v6790_v24  ;;  %11402 = vmatpush3.bf16.msra.mxu0 %v12789_v3  ;;  %v12829_v3 = vld [vmem:[%s17367_s5 + $0x868] ss:$28 sps:$4 sm:$0xff]  }
 0x435   :  { %11403 = vmatprep.subr.bf16.mxu0 %v12790_v51  ;;  %v12894_v51 = vld [vmem:[%s17371_s9 + $0x3f4] ss:$28 sps:$4 sm:$0xff]   ;;  %v12834_v24 = vld [vmem:[%s17371_s9 + $0xc] ss:$28 sps:$4 sm:$0xff]  }
 0x438   :  { %11404 = vmatpush3.bf16.msra.mxu0 %v12794_v62  ;;  %v12900_v62 = vld [vmem:[%s17371_s9 + $0x42c] ss:$28 sps:$4 sm:$0xff]  }
 0x439   :  { %11405 = vmatprep.subr.bf16.mxu0 %v12795_v0  ;;  %v12898_v0 = vld [vmem:[%s17371_s9 + $0x428] ss:$28 sps:$4 sm:$0xff]  }
 0x43c   :  { %11406 = vmatpush3.bf16.msra.mxu0 %v12799_v7  ;;  %v12832_v7 = vld [vmem:[%s17371_s9 + $0x8] ss:$28 sps:$4 sm:$0xff]  }
 0x43d   :  { %v13299_v14 = vpop.eup %13298  ;;  %11407 = vmatprep.subr.bf16.mxu0 %v12800_v19  ;;  %v12837_v19 = vld [vmem:[%s17371_s9 + $0x44] ss:$28 sps:$4 sm:$0xff]  }
 0x43e   :  { %v13301_v17 = vpop.eup %13300  ;;  %v6803_v23 = vmul.f32 %v13299_v14, %v16052_v18  ;;  %v12814_v18 = vld [vmem:[%s17367_s5 + $0x718] ss:$28 sps:$4 sm:$0xff]   ;;  %v12835_v14 = vld [vmem:[%s17371_s9 + $0x40] ss:$28 sps:$4 sm:$0xff]  }
 0x43f   :  { %v6804_v26 = vmul.f32 %v13301_v17, %v16054_v35  ;;  %v12838_v17 = vld [vmem:[%s17371_s9 + $0x78] ss:$28 sps:$4 sm:$0xff]  }
 0x440   :  { %v6847_v29 = vmul.f32 %v6815_v9, %v6803_v23  ;;  %11408 = vmatpush3.bf16.msra.mxu0 %v12804_v11  ;;  %v12906_v9 = vld [vmem:[%s17371_s9 + $0x464] ss:$28 sps:$4 sm:$0xff]   ;;  %v12843_v23 = vld [vmem:[%s17371_s9 + $0xb4] ss:$28 sps:$4 sm:$0xff]  }
 0x441   :  { %v6848_v21 = vmul.f32 %v6819_v12, %v6804_v26  ;;  %11409 = vmatprep.subr.bf16.mxu0 %v12805_v16  ;;  %v12904_v11 = vld [vmem:[%s17371_s9 + $0x460] ss:$28 sps:$4 sm:$0xff]   ;;  %v12916_v26 = vld [vmem:[%s17371_s9 + $0x4d0] ss:$28 sps:$4 sm:$0xff]  }
 0x442   :  { %v6891_v34 = vadd.f32 %v6859_v13, %v6847_v29  ;;  %v12840_v12 = vld [vmem:[%s17371_s9 + $0x7c] ss:$28 sps:$4 sm:$0xff]   ;;  %v12918_v13 = vld [vmem:[%s17371_s9 + $0x4d4] ss:$28 sps:$4 sm:$0xff]   ;;  %v12846_v29 = vld [vmem:[%s17371_s9 + $0xec] ss:$28 sps:$4 sm:$0xff]  }
 0x443   :  { %v6892_v28 = vadd.f32 %v6863_v27, %v6848_v21  ;;  %v12912_v16 = vld [vmem:[%s17371_s9 + $0x49c] ss:$28 sps:$4 sm:$0xff]   ;;  %v12841_v27 = vld [vmem:[%s17371_s9 + $0xb0] ss:$28 sps:$4 sm:$0xff]   ;;  %v12922_v21 = vld [vmem:[%s17371_s9 + $0x508] ss:$28 sps:$4 sm:$0xff]  }
 0x444   :  { %11410 = vmatpush3.bf16.msra.mxu0 %v12809_v31  ;;  %vm6898_vm9 = vcmp.gt.f32.partialorder %v6891_v34, 0.0  ;;  %v6905_v35 = vmul.f32 0.2, %v6891_v34  ;;  %v12924_v31 = vld [vmem:[%s17371_s9 + $0x50c] ss:$28 sps:$4 sm:$0xff]  }
 0x445   :  { %11417 = vmatprep.subr.bf16.mxu0 %v12810_v33  ;;  %vm6899_vm10 = vcmp.gt.f32.partialorder %v6892_v28, 0.0  ;;  %v6906_v48 = vmul.f32 0.2, %v6892_v28  ;;  %v12844_v33 = vld [vmem:[%s17371_s9 + $0xe8] ss:$28 sps:$4 sm:$0xff]  }
 0x446   :  { %v6912_v40 = vsel %vm6898_vm9, %v6891_v34, %v6905_v35  ;;  %v12849_v34 = vld [vmem:[%s17371_s9 + $0x124] ss:$28 sps:$4 sm:$0xff]  }
 0x447   :  { %6588 = vmatmul.mubr.bf16.vlgmr.msra.gmra.mrb[24].mxu0 %v15119_v2  ;;  %v6913_v42 = vsel %vm6899_vm10, %v6892_v28, %v6906_v48  ;;  %v6926_v22 = vmul.f32 %v6919_v37, %v6912_v40  ;;  %v12821_v2 = vld [vmem:[%s17367_s5 + $0x788] ss:$28 sps:$4 sm:$0xff]   ;;  %v12847_v35 = vld [vmem:[%s17371_s9 + $0x120] ss:$28 sps:$4 sm:$0xff]   ;;  %v12934_v48 = vld [vmem:[%s17371_s9 + $0x578] ss:$28 sps:$4 sm:$0xff]  }
 0x448   :  { %11418 = vmatpush3.bf16.msra.mxu0 %v12814_v18  ;;  %6627 = vmatprep.mubr.bf16.mxu0 %v15259_v38  ;;  %v6927_v32 = vmul.f32 %v6920_v39, %v6913_v42  ;;  %v12822_v38 = vld [vmem:[%s17367_s5 + $0x980] ss:$28 sps:$4 sm:$0xff]   ;;  %v12850_v39 = vld [vmem:[%s17371_s9 + $0x158] ss:$28 sps:$4 sm:$0xff]  }
 0x449   :  { %11419 = vmatprep.subr.bf16.mxu0 %v12815_v5  ;;  %v16158_v45 = vpack.c.bf16 %v6926_v22, %v6926_v22  ;;  %v12930_v28 = vld [vmem:[%s17371_s9 + $0x544] ss:$28 sps:$4 sm:$0xff]   ;;  %v12852_v37 = vld [vmem:[%s17371_s9 + $0x15c] ss:$28 sps:$4 sm:$0xff]   ;;  %v12855_v40 = vld [vmem:[%s17371_s9 + $0x194] ss:$28 sps:$4 sm:$0xff]  }
 0x44a   :  { %v16156_v30 = vpack.c.bf16 %v6927_v32, %v6927_v32  ;;  %v12928_v18 = vld [vmem:[%s17371_s9 + $0x540] ss:$28 sps:$4 sm:$0xff]   ;;  %v12942_v42 = vld [vmem:[%s17371_s9 + $0x5b4] ss:$28 sps:$4 sm:$0xff]   ;;  %v12858_v32 = vld [vmem:[%s17371_s9 + $0x1cc] ss:$28 sps:$4 sm:$0xff]  }
 0x44b   :  { %v12936_v5 = vld [vmem:[%s17371_s9 + $0x57c] ss:$28 sps:$4 sm:$0xff]   ;;  %v12940_v22 = vld [vmem:[%s17371_s9 + $0x5b0] ss:$28 sps:$4 sm:$0xff]  }
 0x44c   :  { %11420 = vmatpush3.bf16.msra.mxu0 %v12819_v43  ;;  %9175 = vmatprep.mubr.bf16.mxu1 %v16156_v30  ;;  %v12853_v43 = vld [vmem:[%s17371_s9 + $0x190] ss:$28 sps:$4 sm:$0xff]  }
 0x44d   :  { %11421 = vmatprep.subr.bf16.mxu0 %v12820_v59  ;;  %9176 = vmatmul.mubr.bf16.vlgmr.msra.gmra.mrb[28].mxu1 %v16158_v45  ;;  %v12948_v59 = vld [vmem:[%s17371_s9 + $0x5ec] ss:$28 sps:$4 sm:$0xff]  }
 0x44e   :  { %9185 = vmatpush1.bf16.msra.mxu1 %v12880_v50  ;;  %v12960_v50 = vld [vmem:[%s17371_s9 + $0x65c] ss:$28 sps:$4 sm:$0xff]  }
 0x44f   :  { %9186 = vmatprep.subr.bf16.mxu1 %v12888_v55  ;;  %v12867_v55 = vld [vmem:[%s17371_s9 + $0x274] ss:$28 sps:$4 sm:$0xff]  }
 0x450   :  { %11422 = vmatpush3.bf16.msra.mxu0 %v12821_v2  ;;  %v12946_v2 = vld [vmem:[%s17371_s9 + $0x5e8] ss:$28 sps:$4 sm:$0xff]  }
 0x451   :  { %11423 = vmatprep.subr.bf16.mxu0 %v12822_v38  ;;  %v12856_v38 = vld [vmem:[%s17371_s9 + $0x1c8] ss:$28 sps:$4 sm:$0xff]  }
 0x452   :  { %9187 = vmatpush1.bf16.msra.mxu1 %v12886_v57  ;;  %v12964_v57 = vld [vmem:[%s17371_s9 + $0x690] ss:$28 sps:$4 sm:$0xff]  }
 0x453   :  { %9188 = vmatprep.subr.bf16.mxu1 %v12894_v51  ;;  %v12865_v51 = vld [vmem:[%s17371_s9 + $0x270] ss:$28 sps:$4 sm:$0xff]  }
 0x454   :  { %11424 = vmatpush3.bf16.msra.mxu0 %v12823_v46  ;;  %v12861_v46 = vld [vmem:[%s17371_s9 + $0x204] ss:$28 sps:$4 sm:$0xff]  }
 0x455   :  { %11425 = vmatprep.subr.bf16.mxu0 %v12824_v47  ;;  %v12954_v47 = vld [vmem:[%s17371_s9 + $0x624] ss:$28 sps:$4 sm:$0xff]  }
 0x456   :  { %9189 = vmatpush1.bf16.msra.mxu1 %v12892_v60  ;;  %v12870_v60 = vld [vmem:[%s17371_s9 + $0x2ac] ss:$28 sps:$4 sm:$0xff]  }
 0x457   :  { %9190 = vmatprep.subr.bf16.mxu1 %v12900_v62  ;;  %v12873_v62 = vld [vmem:[%s17371_s9 + $0x2e4] ss:$28 sps:$4 sm:$0xff]  }
 0x458   :  { %11426 = vmatpush3.bf16.msra.mxu0 %v12825_v49  ;;  %v12952_v49 = vld [vmem:[%s17371_s9 + $0x620] ss:$28 sps:$4 sm:$0xff]  }
 0x459   :  { %11427 = vmatprep.subr.bf16.mxu0 %v12826_v10  ;;  %v12859_v10 = vld [vmem:[%s17371_s9 + $0x200] ss:$28 sps:$4 sm:$0xff]  }
 0x45a   :  { %9191 = vmatpush1.bf16.msra.mxu1 %v12898_v0  ;;  %v12978_v0 = vld [vmem:[%s17371_s9 + $0x704] ss:$28 sps:$4 sm:$0xff]  }
 0x45b   :  { %9192 = vmatprep.subr.bf16.mxu1 %v12906_v9  ;;  %v12874_v9 = vld [vmem:[%s17371_s9 + $0x318] ss:$28 sps:$4 sm:$0xff]  }
 0x45c   :  { %11428 = vmatpush3.bf16.msra.mxu0 %v12827_v63  ;;  %v12958_v63 = vld [vmem:[%s17371_s9 + $0x658] ss:$28 sps:$4 sm:$0xff]  }
 0x45d   :  { %11429 = vmatprep.subr.bf16.mxu0 %v12828_v15  ;;  %v12862_v15 = vld [vmem:[%s17371_s9 + $0x238] ss:$28 sps:$4 sm:$0xff]  }
 0x45e   :  { %9193 = vmatpush1.bf16.msra.mxu1 %v12904_v11  ;;  %v12879_v11 = vld [vmem:[%s17371_s9 + $0x354] ss:$28 sps:$4 sm:$0xff]  }
 0x45f   :  { %9194 = vmatprep.subr.bf16.mxu1 %v12912_v16  ;;  %v12883_v16 = vld [vmem:[%s17371_s9 + $0x388] ss:$28 sps:$4 sm:$0xff]  }
 0x460   :  { %11430 = vmatpush3.bf16.msra.mxu0 %v12829_v3  ;;  %v12966_v3 = vld [vmem:[%s17371_s9 + $0x694] ss:$28 sps:$4 sm:$0xff]  }
 0x461   :  { %11431 = vmatprep.subr.bf16.mxu0 %v12830_v58  ;;  %v12972_v58 = vld [vmem:[%s17371_s9 + $0x6cc] ss:$28 sps:$4 sm:$0xff]  }
 0x464   :  { %11432 = vmatpush3.bf16.msra.mxu0 %v12831_v53  ;;  %v12970_v53 = vld [vmem:[%s17371_s9 + $0x6c8] ss:$28 sps:$4 sm:$0xff]  }
 0x465   :  { %9307 = vmatprep.subr.bf16.mxu0 %v12834_v24  ;;  %v12868_v24 = vld [vmem:[%s17371_s9 + $0x2a8] ss:$28 sps:$4 sm:$0xff]  }
 0x467   :  { %6628 = vmatmul.mubr.bf16.vlgmr.msra.gmra.mrb[28].mxu0 %v15264_v20  ;;  %v12910_v20 = vld [vmem:[%s17371_s9 + $0x498] ss:$28 sps:$4 sm:$0xff]  }
 0x468   :  { %9308 = vmatpush1.bf16.msra.mxu0 %v12832_v7  ;;  %9339 = vmatprep.mubr.bf16.mxu0 %v16156_v30  ;;  %v12871_v7 = vld [vmem:[%s17371_s9 + $0x2e0] ss:$28 sps:$4 sm:$0xff]  }
 0x469   :  { %9309 = vmatprep.subr.bf16.mxu0 %v12837_v19  ;;  %9195 = vmatpush1.bf16.msra.mxu1 %v12910_v20  ;;  %v12876_v19 = vld [vmem:[%s17371_s9 + $0x31c] ss:$28 sps:$4 sm:$0xff]   ;;  %v12891_v20 = vld [vmem:[%s17371_s9 + $0x3c4] ss:$28 sps:$4 sm:$0xff]  }
 0x46a   :  { %9196 = vmatprep.subr.bf16.mxu1 %v12918_v13  ;;  %v12895_v13 = vld [vmem:[%s17371_s9 + $0x3f8] ss:$28 sps:$4 sm:$0xff]  }
 0x46c   :  { %9310 = vmatpush1.bf16.msra.mxu0 %v12835_v14  ;;  %v12877_v14 = vld [vmem:[%s17371_s9 + $0x350] ss:$28 sps:$4 sm:$0xff]  }
 0x46d   :  { %9311 = vmatprep.subr.bf16.mxu0 %v12840_v12  ;;  %9197 = vmatpush1.bf16.msra.mxu1 %v12916_v26  ;;  %v12885_v12 = vld [vmem:[%s17371_s9 + $0x38c] ss:$28 sps:$4 sm:$0xff]   ;;  %v12903_v26 = vld [vmem:[%s17371_s9 + $0x434] ss:$28 sps:$4 sm:$0xff]  }
 0x46e   :  { %9198 = vmatprep.subr.bf16.mxu1 %v12924_v31  ;;  %v12909_v31 = vld [vmem:[%s17371_s9 + $0x46c] ss:$28 sps:$4 sm:$0xff]  }
 0x470   :  { %9312 = vmatpush1.bf16.msra.mxu0 %v12838_v17  ;;  %v12889_v17 = vld [vmem:[%s17371_s9 + $0x3c0] ss:$28 sps:$4 sm:$0xff]  }
 0x471   :  { %9313 = vmatprep.subr.bf16.mxu0 %v12843_v23  ;;  %9199 = vmatpush1.bf16.msra.mxu1 %v12922_v21  ;;  %v12897_v23 = vld [vmem:[%s17371_s9 + $0x3fc] ss:$28 sps:$4 sm:$0xff]  }
 0x472   :  { %9200 = vmatprep.subr.bf16.mxu1 %v12930_v28 }
 0x474   :  { %9314 = vmatpush1.bf16.msra.mxu0 %v12841_v27  ;;  %v12901_v27 = vld [vmem:[%s17371_s9 + $0x430] ss:$28 sps:$4 sm:$0xff]  }
 0x475   :  { %9315 = vmatprep.subr.bf16.mxu0 %v12846_v29  ;;  %9201 = vmatpush1.bf16.msra.mxu1 %v12928_v18  ;;  %v12907_v18 = vld [vmem:[%s17371_s9 + $0x468] ss:$28 sps:$4 sm:$0xff]  }
 0x476   :  { %9202 = vmatprep.subr.bf16.mxu1 %v12936_v5 }
 0x478   :  { %9316 = vmatpush1.bf16.msra.mxu0 %v12844_v33 }
 0x479   :  { %9317 = vmatprep.subr.bf16.mxu0 %v12849_v34  ;;  %9203 = vmatpush1.bf16.msra.mxu1 %v12934_v48  ;;  %v12913_v48 = vld [vmem:[%s17371_s9 + $0x4a0] ss:$28 sps:$4 sm:$0xff]  }
 0x47a   :  { %9204 = vmatprep.subr.bf16.mxu1 %v12942_v42 }
 0x47c   :  { %9318 = vmatpush1.bf16.msra.mxu0 %v12847_v35 }
 0x47d   :  { %9319 = vmatprep.subr.bf16.mxu0 %v12852_v37  ;;  %9205 = vmatpush1.bf16.msra.mxu1 %v12940_v22  ;;  %v12915_v37 = vld [vmem:[%s17371_s9 + $0x4a4] ss:$28 sps:$4 sm:$0xff]  }
 0x47e   :  { %9206 = vmatprep.subr.bf16.mxu1 %v12948_v59  ;;  %v12919_v59 = vld [vmem:[%s17371_s9 + $0x4d8] ss:$28 sps:$4 sm:$0xff]  }
 0x480   :  { %9320 = vmatpush1.bf16.msra.mxu0 %v12850_v39 }
 0x481   :  { %9321 = vmatprep.subr.bf16.mxu0 %v12855_v40  ;;  %9207 = vmatpush1.bf16.msra.mxu1 %v12946_v2  ;;  %v12921_v40 = vld [vmem:[%s17371_s9 + $0x4dc] ss:$28 sps:$4 sm:$0xff]   ;;  %v12927_v2 = vld [vmem:[%s17371_s9 + $0x514] ss:$28 sps:$4 sm:$0xff]  }
 0x482   :  { %9208 = vmatprep.subr.bf16.mxu1 %v12954_v47  ;;  %v12933_v47 = vld [vmem:[%s17371_s9 + $0x54c] ss:$28 sps:$4 sm:$0xff]  }
 0x484   :  { %9322 = vmatpush1.bf16.msra.mxu0 %v12853_v43 }
 0x485   :  { %9323 = vmatprep.subr.bf16.mxu0 %v12858_v32  ;;  %9209 = vmatpush1.bf16.msra.mxu1 %v12952_v49 }
 0x486   :  { %9210 = vmatprep.subr.bf16.mxu1 %v12960_v50 }
 0x488   :  { %9324 = vmatpush1.bf16.msra.mxu0 %v12856_v38 }
 0x489   :  { %9325 = vmatprep.subr.bf16.mxu0 %v12861_v46  ;;  %9211 = vmatpush1.bf16.msra.mxu1 %v12958_v63  ;;  %v12925_v46 = vld [vmem:[%s17371_s9 + $0x510] ss:$28 sps:$4 sm:$0xff]   ;;  %v12937_v63 = vld [vmem:[%s17371_s9 + $0x580] ss:$28 sps:$4 sm:$0xff]  }
 0x48a   :  { %9212 = vmatprep.subr.bf16.mxu1 %v12966_v3  ;;  %v12951_v3 = vld [vmem:[%s17371_s9 + $0x5f4] ss:$28 sps:$4 sm:$0xff]  }
 0x48c   :  { %9326 = vmatpush1.bf16.msra.mxu0 %v12859_v10  ;;  %v12931_v10 = vld [vmem:[%s17371_s9 + $0x548] ss:$28 sps:$4 sm:$0xff]  }
 0x48d   :  { %9327 = vmatprep.subr.bf16.mxu0 %v12864_v36  ;;  %9213 = vmatpush1.bf16.msra.mxu1 %v12964_v57  ;;  %v12939_v36 = vld [vmem:[%s17371_s9 + $0x584] ss:$28 sps:$4 sm:$0xff]   ;;  %v12943_v57 = vld [vmem:[%s17371_s9 + $0x5b8] ss:$28 sps:$4 sm:$0xff]  }
 0x48e   :  { %9214 = vmatprep.subr.bf16.mxu1 %v12972_v58 }
 0x490   :  { %9328 = vmatpush1.bf16.msra.mxu0 %v12862_v15  ;;  %v12945_v15 = vld [vmem:[%s17371_s9 + $0x5bc] ss:$28 sps:$4 sm:$0xff]  }
 0x491   :  { %9329 = vmatprep.subr.bf16.mxu0 %v12867_v55  ;;  %9215 = vmatpush1.bf16.msra.mxu1 %v12970_v53 }
 0x492   :  { %9225 = vmatprep.subr.bf16.mxu1 %v12978_v0 }
 0x494   :  { %9330 = vmatpush1.bf16.msra.mxu0 %v12865_v51  ;;  %v12949_v51 = vld [vmem:[%s17371_s9 + $0x5f0] ss:$28 sps:$4 sm:$0xff]  }
 0x495   :  { %9331 = vmatprep.subr.bf16.mxu0 %v12870_v60  ;;  %v12957_v60 = vld [vmem:[%s17371_s9 + $0x62c] ss:$28 sps:$4 sm:$0xff]  }
 0x498   :  { %9332 = vmatpush1.bf16.msra.mxu0 %v12868_v24  ;;  %v12955_v24 = vld [vmem:[%s17371_s9 + $0x628] ss:$28 sps:$4 sm:$0xff]  }
 0x499   :  { %9333 = vmatprep.subr.bf16.mxu0 %v12873_v62  ;;  %v12963_v62 = vld [vmem:[%s17371_s9 + $0x664] ss:$28 sps:$4 sm:$0xff]  }
 0x49c   :  { %9334 = vmatpush1.bf16.msra.mxu0 %v12871_v7  ;;  %v12961_v7 = vld [vmem:[%s17371_s9 + $0x660] ss:$28 sps:$4 sm:$0xff]  }
 0x49d   :  { %9335 = vmatprep.subr.bf16.mxu0 %v12876_v19  ;;  %v12969_v19 = vld [vmem:[%s17371_s9 + $0x69c] ss:$28 sps:$4 sm:$0xff]  }
 0x4a0   :  { %9336 = vmatpush1.bf16.msra.mxu0 %v12874_v9 }
 0x4a1   :  { %9337 = vmatprep.subr.bf16.mxu0 %v12879_v11 }
 0x4a4   :  { %9338 = vmatpush1.bf16.msra.mxu0 %v12877_v14 }
 0x4a5   :  { %9348 = vmatprep.subr.bf16.mxu0 %v12885_v12 }
 0x4a7   :  { %9340 = vmatmul.mubr.bf16.vlgmr.msra.gmra.mrb[32].mxu0 %v16158_v45 }
 0x4a8   :  { %9349 = vmatpush1.bf16.msra.mxu0 %v12883_v16 }
 0x4a9   :  { %9350 = vmatprep.subr.bf16.mxu0 %v12891_v20 }
 0x4ac   :  { %9351 = vmatpush1.bf16.msra.mxu0 %v12889_v17  ;;  %v12967_v17 = vld [vmem:[%s17371_s9 + $0x698] ss:$28 sps:$4 sm:$0xff]  }
 0x4ad   :  { %9352 = vmatprep.subr.bf16.mxu0 %v12897_v23 }
 0x4b0   :  { %9353 = vmatpush1.bf16.msra.mxu0 %v12895_v13 }
 0x4b1   :  { %v16417_v29 = vpop.f32.mrb[20].mxu1  ;;  %9354 = vmatprep.subr.bf16.mxu0 %v12903_v26  ;;  %v12975_v26 = vld [vmem:[%s17371_s9 + $0x6d4] ss:$28 sps:$4 sm:$0xff]  }
 0x4b2   :  { %v6510_v21 = vpop.f32.mrb[21].mxu1 }
 0x4b3   :  { %v6705_v33 = vrot.slane %v6510_v21, 4  ;;  %v6512_v34 = vpop.f32.mrb[22].mxu1 }
 0x4b4   :  { %v6513_v28 = vpop.f32.mrb[23].mxu1  ;;  %9355 = vmatpush1.bf16.msra.mxu0 %v12901_v27  ;;  %v12973_v34 = vld [vmem:[%s17371_s9 + $0x6d0] ss:$28 sps:$4 sm:$0xff]  }
 0x4b5   :  { %v6706_v35 = vadd.f32 %v6705_v33, %v6510_v21  ;;  %9356 = vmatprep.subr.bf16.mxu0 %v12909_v31 }
 0x4b7   :  { %v6707_v5 = vrot.slane %v6706_v35, 2 }
 0x4b8   :  { %9357 = vmatpush1.bf16.msra.mxu0 %v12907_v18  ;;  %v12981_v18 = vld [vmem:[%s17371_s9 + $0x70c] ss:$28 sps:$4 sm:$0xff]  }
 0x4b9   :  { %v16431_v39 = vpop.f32.mrb[24].mxu1  ;;  %9358 = vmatprep.subr.bf16.mxu0 %v12915_v37  ;;  %v6708_v22 = vadd.f32 %v6707_v5, %v6706_v35 }
 0x4ba   :  { %v11517_v42 = vpop.f32.mrb[25].mxu1 }
 0x4bb   :  { %v6672_v43 = vpop.f32.mrb[26].mxu1  ;;  %v6709_v38 = vrot.slane %v6708_v22, 1 }
 0x4bc   :  { %v11518_v32 = vpop.f32.mrb[27].mxu1  ;;  %9359 = vmatpush1.bf16.msra.mxu0 %v12913_v48 }
 0x4bd   :  { %9360 = vmatprep.subr.bf16.mxu0 %v12921_v40  ;;  %v6710_v49 = vadd.f32 %v6709_v38, %v6708_v22 }
 0x4bf   :  { %v6723_v50 = vmul.f32 0.125, %v6710_v49  ;;  %v6699_v49 = vrot.slane %v16417_v29, 4 }
 0x4c0   :  { %9361 = vmatpush1.bf16.msra.mxu0 %v12919_v59 }
 0x4c1   :  { %9362 = vmatprep.subr.bf16.mxu0 %v12927_v2  ;;  %v16460_v55 = vsub.f32 %v6510_v21, %v6723_v50 }
 0x4c3   :  { %v6737_v58 = vmul.f32 %v16460_v55, %v16460_v55 }
 0x4c4   :  { %9363 = vmatpush1.bf16.msra.mxu0 %v12925_v46 }
 0x4c5   :  { %9364 = vmatprep.subr.bf16.mxu0 %v12933_v47  ;;  %v6769_v53 = vrot.slane %v6737_v58, 4 }
 0x4c7   :  { %v6770_v0 = vadd.f32 %v6769_v53, %v6737_v58 }
 0x4c8   :  { %9365 = vmatpush1.bf16.msra.mxu0 %v12931_v10 }
 0x4c9   :  { %9366 = vmatprep.subr.bf16.mxu0 %v12939_v36  ;;  %v6771_v11 = vrot.slane %v6770_v0, 2 }
 0x4cb   :  { %v6772_v31 = vadd.f32 %v6771_v11, %v6770_v0 }
 0x4cc   :  { %9367 = vmatpush1.bf16.msra.mxu0 %v12937_v63 }
 0x4cd   :  { %9368 = vmatprep.subr.bf16.mxu0 %v12945_v15  ;;  %v6773_v37 = vrot.slane %v6772_v31, 1 }
 0x4cf   :  { %v6774_v22 = vadd.f32 %v6773_v37, %v6772_v31 }
 0x4d0   :  { %9369 = vmatpush1.bf16.msra.mxu0 %v12943_v57  ;;  %v6700_v57 = vadd.f32 %v6699_v49, %v16417_v29 }
 0x4d1   :  { %9370 = vmatprep.subr.bf16.mxu0 %v12951_v3  ;;  %v6787_v38 = vmul.f32 0.125, %v6774_v22 }
 0x4d2   :  { %v6701_v53 = vrot.slane %v6700_v57, 2 }
 0x4d3   :  { %v6794_v50 = vadd.f32 1e-05, %v6787_v38 }
 0x4d4   :  { %9371 = vmatpush1.bf16.msra.mxu0 %v12949_v51 }
 0x4d5   :  { %9372 = vmatprep.subr.bf16.mxu0 %v12957_v60  ;;  %13302 = vrsqrt.f32 %v6794_v50  ;;  %v6922_v50 = vld [vmem:[%s17374_s8 + $0x18] sm:$0xff] }
 0x4d8   :  { %9373 = vmatpush1.bf16.msra.mxu0 %v12955_v24 }
 0x4d9   :  { %9374 = vmatprep.subr.bf16.mxu0 %v12963_v62 }
 0x4da   :  { %v6344_v9 = vpop.f32.mrb[16].mxu0 }
 0x4db   :  { %v6687_v14 = vrot.slane %v6344_v9, 4  ;;  %v6346_v12 = vpop.f32.mrb[17].mxu0 }
 0x4dc   :  { %v6693_v16 = vrot.slane %v6346_v12, 4  ;;  %v6348_v20 = vpop.f32.mrb[18].mxu0  ;;  %9375 = vmatpush1.bf16.msra.mxu0 %v12961_v7 }
 0x4dd   :  { %v6688_v23 = vadd.f32 %v6687_v14, %v6344_v9  ;;  %v6349_v13 = vpop.f32.mrb[19].mxu0  ;;  %9376 = vmatprep.subr.bf16.mxu0 %v12969_v19  ;;  %v6702_v19 = vadd.f32 %v6701_v53, %v6700_v57  ;;  %v6924_v57 = vld [vmem:[%s17374_s8 + $0x28] sm:$0xff] }
 0x4de   :  { %v6694_v27 = vadd.f32 %v6693_v16, %v6346_v12 }
 0x4df   :  { %v6689_v21 = vrot.slane %v6688_v23, 2  ;;  %v13303_v13 = vpop.eup %13302 }
 0x4e0   :  { %v6695_v33 = vrot.slane %v6694_v27, 2  ;;  %9377 = vmatpush1.bf16.msra.mxu0 %v12967_v17  ;;  %v6808_v31 = vmul.f32 %v13303_v13, %v16460_v55  ;;  %v6867_v55 = vrot.slane %v16112_v8, %v15070_v44  ;;  %v12993_v13 = vld [vmem:[%s17371_s9 + $0x77c] ss:$28 sps:$4 sm:$0xff]  }
 0x4e1   :  { %v6690_v28 = vadd.f32 %v6689_v21, %v6688_v23  ;;  %9378 = vmatprep.subr.bf16.mxu0 %v12975_v26  ;;  %v6703_v26 = vrot.slane %v6702_v19, 1  ;;  %v6835_v21 = vrot.slane %v16104_v25, %v15242_v54 }
 0x4e2   :  { %v6696_v35 = vadd.f32 %v6695_v33, %v6694_v27 }
 0x4e3   :  { %v6691_v5 = vrot.slane %v6690_v28, 1  ;;  %v6704_v33 = vadd.f32 %v6703_v26, %v6702_v19 }
 0x4e4   :  { %v6697_v48 = vrot.slane %v6696_v35, 1  ;;  %9379 = vmatpush1.bf16.msra.mxu0 %v12973_v34  ;;  %v6852_v34 = vmul.f32 %v6835_v21, %v6808_v31 }
 0x4e5   :  { %v6692_v40 = vadd.f32 %v6691_v5, %v6690_v28  ;;  %9389 = vmatprep.subr.bf16.mxu0 %v12981_v18  ;;  %v6879_v28 = vrot.slane %v16112_v8, %v15242_v54  ;;  %v6722_v18 = vmul.f32 0.125, %v6704_v33  ;;  %v6827_v5 = vrot.slane %v16104_v25, %v14903_v4  ;;  %v12988_v33 = vld [vmem:[%s17371_s9 + $0x770] ss:$28 sps:$4 sm:$0xff]  }
 0x4e6   :  { %v6698_v42 = vadd.f32 %v6697_v48, %v6696_v35  ;;  %v6823_v35 = vrot.slane %v16104_v25, %v15070_v44 }
 0x4e7   :  { %v6720_v43 = vmul.f32 0.125, %v6692_v40  ;;  %v6896_v40 = vadd.f32 %v6879_v28, %v6852_v34  ;;  %v16516_v22 = vsub.f32 %v16417_v29, %v6722_v18  ;;  %v6921_v29 = vld [vmem:[%s17374_s8 + $0x10] sm:$0xff] }
 0x4e8   :  { %v6721_v32 = vmul.f32 0.125, %v6698_v42  ;;  %v12991_v34 = vld [vmem:[%s17371_s9 + $0x778] ss:$28 sps:$4 sm:$0xff]  }
 0x4e9   :  { %v6727_v59 = vsub.f32 %v6344_v9, %v6720_v43  ;;  %v6910_v49 = vmul.f32 0.2, %v6896_v40  ;;  %vm6903_vm11 = vcmp.gt.f32.partialorder %v6896_v40, 0.0 }
 0x4ea   :  { %v6728_v2 = vsub.f32 %v6346_v12, %v6721_v32  ;;  %v6871_v32 = vrot.slane %v16112_v8, %v14903_v4 }
 0x4eb   :  { %v6734_v46 = vmul.f32 %v6727_v59, %v6727_v59 }
 0x4ec   :  { %v6735_v47 = vmul.f32 %v6728_v2, %v6728_v2 }
 0x4ed   :  { %v6751_v10 = vrot.slane %v6734_v46, 4 }
 0x4ee   :  { %v6757_v36 = vrot.slane %v6735_v47, 4 }
 0x4ef   :  { %v6752_v63 = vadd.f32 %v6751_v10, %v6734_v46  ;;  %v6736_v10 = vmul.f32 %v16516_v22, %v16516_v22 }
 0x4f0   :  { %v6758_v15 = vadd.f32 %v6757_v36, %v6735_v47 }
 0x4f1   :  { %v6753_v3 = vrot.slane %v6752_v63, 2 }
 0x4f2   :  { %v6759_v58 = vrot.slane %v6758_v15, 2 }
 0x4f3   :  { %v6754_v51 = vadd.f32 %v6753_v3, %v6752_v63  ;;  %v6763_v3 = vrot.slane %v6736_v10, 4 }
 0x4f4   :  { %v6760_v60 = vadd.f32 %v6759_v58, %v6758_v15  ;;  %v6917_v15 = vsel %vm6903_vm11, %v6896_v40, %v6910_v49  ;;  %v12997_v40 = vld [vmem:[%s17371_s9 + $0x7b0] ss:$28 sps:$4 sm:$0xff]   ;;  %v13006_v49 = vld [vmem:[%s17371_s9 + $0x818] ss:$28 sps:$4 sm:$0xff]  }
 0x4f5   :  { %v6755_v24 = vrot.slane %v6754_v51, 1  ;;  %v6931_v53 = vmul.f32 %v6924_v57, %v6917_v15  ;;  %v13020_v15 = vld [vmem:[%s17371_s9 + $0x88c] ss:$28 sps:$4 sm:$0xff]   ;;  %v13023_v57 = vld [vmem:[%s17371_s9 + $0x894] ss:$28 sps:$4 sm:$0xff]  }
 0x4f6   :  { %v6761_v62 = vrot.slane %v6760_v60, 1 }
 0x4f7   :  { %v6756_v0 = vadd.f32 %v6755_v24, %v6754_v51 }
 0x4f8   :  { %v6762_v7 = vadd.f32 %v6761_v62, %v6760_v60  ;;  %v12976_v62 = vld [vmem:[%s17371_s9 + $0x700] ss:$28 sps:$4 sm:$0xff]  }
 0x4f9   :  { %v6784_v9 = vmul.f32 0.125, %v6756_v0  ;;  %v12979_v0 = vld [vmem:[%s17371_s9 + $0x708] ss:$28 sps:$4 sm:$0xff]  }
 0x4fa   :  { %v6785_v11 = vmul.f32 0.125, %v6762_v7  ;;  %v11389_v14 = vpop.f32.mrb[20].mxu0  ;;  %v6764_v7 = vadd.f32 %v6763_v3, %v6736_v10  ;;  %v13009_v10 = vld [vmem:[%s17371_s9 + $0x820] ss:$28 sps:$4 sm:$0xff]   ;;  %v13018_v3 = vld [vmem:[%s17371_s9 + $0x888] ss:$28 sps:$4 sm:$0xff]  }
 0x4fb   :  { %v6791_v12 = vadd.f32 1e-05, %v6784_v9  ;;  %v11390_v16 = vpop.f32.mrb[21].mxu0  ;;  %v12984_v9 = vld [vmem:[%s17371_s9 + $0x73c] ss:$28 sps:$4 sm:$0xff]  }
 0x4fc   :  { %v6792_v20 = vadd.f32 1e-05, %v6785_v11  ;;  %v16502_v17 = vadd.f32 %v11390_v16, %v11389_v14  ;;  %v11392_v23 = vpop.f32.mrb[22].mxu0  ;;  %v12987_v11 = vld [vmem:[%s17371_s9 + $0x744] ss:$28 sps:$4 sm:$0xff]   ;;  %v16551_v14 = vpack.c.bf16 %v6931_v53, %v6931_v53 }
 0x4fd   :  { %13304 = vrsqrt.f32 %v6791_v12  ;;  %v11393_v27 = vpop.f32.mrb[23].mxu0  ;;  %v12982_v12 = vld [vmem:[%s17371_s9 + $0x738] ss:$28 sps:$4 sm:$0xff]   ;;  %v12985_v16 = vld [vmem:[%s17371_s9 + $0x740] ss:$28 sps:$4 sm:$0xff]  }
 0x4fe   :  { %13306 = vrsqrt.f32 %v6792_v20  ;;  %v6765_v20 = vrot.slane %v6764_v7, 2  ;;  %v12990_v23 = vld [vmem:[%s17371_s9 + $0x774] ss:$28 sps:$4 sm:$0xff]   ;;  %v13024_v53 = vld [vmem:[%s17371_s9 + $0x8c0] ss:$28 sps:$4 sm:$0xff]  }
 0x500   :  { %v6766_v28 = vadd.f32 %v6765_v20, %v6764_v7  ;;  %v13035_v7 = vld [vmem:[%s17371_s9 + $0x904] ss:$28 sps:$4 sm:$0xff]  }
 0x507   :  { %v13305_v37 = vpop.eup %13304 }
 0x508   :  { %v13307_v48 = vpop.eup %13306  ;;  %v6805_v42 = vmul.f32 %v13305_v37, %v6727_v59  ;;  %v12999_v37 = vld [vmem:[%s17371_s9 + $0x7b4] ss:$28 sps:$4 sm:$0xff]  }
 0x509   :  { %v6806_v43 = vmul.f32 %v13307_v48, %v6728_v2  ;;  %v12994_v48 = vld [vmem:[%s17371_s9 + $0x7a8] ss:$28 sps:$4 sm:$0xff]  }
 0x50a   :  { %v6849_v38 = vmul.f32 %v6823_v35, %v6805_v42  ;;  %v12996_v35 = vld [vmem:[%s17371_s9 + $0x7ac] ss:$28 sps:$4 sm:$0xff]   ;;  %v6767_v42 = vrot.slane %v6766_v28, 1 }
 0x50b   :  { %v6850_v46 = vmul.f32 %v6827_v5, %v6806_v43  ;;  %v13000_v43 = vld [vmem:[%s17371_s9 + $0x7e0] ss:$28 sps:$4 sm:$0xff]  }
 0x50c   :  { %v6893_v47 = vadd.f32 %v6867_v55, %v6849_v38  ;;  %v13002_v55 = vld [vmem:[%s17371_s9 + $0x7e4] ss:$28 sps:$4 sm:$0xff]   ;;  %v6768_v38 = vadd.f32 %v6767_v42, %v6766_v28  ;;  %v13047_v28 = vld [vmem:[%s17371_s9 + $0x974] ss:$28 sps:$4 sm:$0xff]  }
 0x50d   :  { %v6894_v36 = vadd.f32 %v6871_v32, %v6850_v46  ;;  %v13003_v32 = vld [vmem:[%s17371_s9 + $0x7e8] ss:$28 sps:$4 sm:$0xff]   ;;  %v13008_v46 = vld [vmem:[%s17371_s9 + $0x81c] ss:$28 sps:$4 sm:$0xff]   ;;  %v13045_v42 = vld [vmem:[%s17371_s9 + $0x970] ss:$28 sps:$4 sm:$0xff]  }
 0x50e   :  { %vm6900_vm12 = vcmp.gt.f32.partialorder %v6893_v47, 0.0  ;;  %v6907_v59 = vmul.f32 0.2, %v6893_v47 }
 0x50f   :  { %vm6901_vm13 = vcmp.gt.f32.partialorder %v6894_v36, 0.0  ;;  %v6908_v2 = vmul.f32 0.2, %v6894_v36 }
 0x510   :  { %v6914_v63 = vsel %vm6900_vm12, %v6893_v47, %v6907_v59  ;;  %v13011_v47 = vld [vmem:[%s17371_s9 + $0x824] ss:$28 sps:$4 sm:$0xff]   ;;  %v13014_v59 = vld [vmem:[%s17371_s9 + $0x854] ss:$28 sps:$4 sm:$0xff]  }
 0x511   :  { %v6915_v58 = vsel %vm6901_vm13, %v6894_v36, %v6908_v2  ;;  %v6928_v51 = vmul.f32 %v6921_v29, %v6914_v63  ;;  %v6786_v36 = vmul.f32 0.125, %v6768_v38  ;;  %v13017_v29 = vld [vmem:[%s17371_s9 + $0x85c] ss:$28 sps:$4 sm:$0xff]   ;;  %v13012_v2 = vld [vmem:[%s17371_s9 + $0x850] ss:$28 sps:$4 sm:$0xff]  }
 0x512   :  { %v6929_v60 = vmul.f32 %v6922_v50, %v6915_v58  ;;  %v13015_v50 = vld [vmem:[%s17371_s9 + $0x858] ss:$28 sps:$4 sm:$0xff]   ;;  %v13021_v58 = vld [vmem:[%s17371_s9 + $0x890] ss:$28 sps:$4 sm:$0xff]  }
 0x513   :  { %v16539_v19 = vpack.c.bf16 %v6928_v51, %v6928_v51  ;;  %v6793_v63 = vadd.f32 1e-05, %v6786_v36  ;;  %v13026_v51 = vld [vmem:[%s17371_s9 + $0x8c4] ss:$28 sps:$4 sm:$0xff]  }
 0x514   :  { %v16531_v24 = vpack.c.bf16 %v6929_v60, %v6929_v60  ;;  %v13029_v60 = vld [vmem:[%s17371_s9 + $0x8cc] ss:$28 sps:$4 sm:$0xff]   ;;  %v13057_v36 = vld [vmem:[%s17371_s9 + $0x9e0] ss:$28 sps:$4 sm:$0xff]  }
 0x515   :  { %13308 = vrsqrt.f32 %v6793_v63 }
 0x516   :  { %9216 = vmatprep.mubr.bf16.mxu1 %v16531_v24  ;;  %9380 = vmatprep.mubr.bf16.mxu0 %v16531_v24 }
 0x517   :  { %9217 = vmatmul.mubr.bf16.vlgmr.msra.gmra.mrb[28].mxu1 %v16539_v19  ;;  %9381 = vmatmul.mubr.bf16.vlgmr.msra.gmra.mrb[32].mxu0 %v16539_v19 }
 0x518   :  { %9226 = vmatpush1.bf16.msra.mxu1 %v12976_v62  ;;  %9390 = vmatpush1.bf16.msra.mxu0 %v12979_v0  ;;  %v13027_v62 = vld [vmem:[%s17371_s9 + $0x8c8] ss:$28 sps:$4 sm:$0xff]   ;;  %v13032_v0 = vld [vmem:[%s17371_s9 + $0x8fc] ss:$28 sps:$4 sm:$0xff]  }
 0x519   :  { %9257 = vmatprep.mubr.bf16.mxu1 %v16551_v14  ;;  %9421 = vmatprep.mubr.bf16.mxu0 %v16551_v14 }
 0x51a   :  { %v11411_v26 = vpop.f32.mrb[24].mxu0  ;;  %9227 = vmatprep.subr.bf16.mxu1 %v12984_v9  ;;  %9391 = vmatprep.subr.bf16.mxu0 %v12987_v11  ;;  %v13030_v9 = vld [vmem:[%s17371_s9 + $0x8f8] ss:$28 sps:$4 sm:$0xff]   ;;  %v13033_v11 = vld [vmem:[%s17371_s9 + $0x900] ss:$28 sps:$4 sm:$0xff]  }
 0x51b   :  { %v11412_v27 = vpop.f32.mrb[25].mxu0 }
 0x51c   :  { %v11413_v31 = vadd.f32 %v11412_v27, %v11411_v26  ;;  %v11414_v21 = vpop.f32.mrb[26].mxu0  ;;  %9228 = vmatpush1.bf16.msra.mxu1 %v12982_v12  ;;  %9392 = vmatpush1.bf16.msra.mxu0 %v12985_v16  ;;  %v13038_v12 = vld [vmem:[%s17371_s9 + $0x934] ss:$28 sps:$4 sm:$0xff]   ;;  %v13041_v16 = vld [vmem:[%s17371_s9 + $0x93c] ss:$28 sps:$4 sm:$0xff]  }
 0x51d   :  { %v11415_v18 = vpop.f32.mrb[27].mxu0  ;;  %9229 = vmatprep.subr.bf16.mxu1 %v12990_v23  ;;  %9393 = vmatprep.subr.bf16.mxu0 %v12993_v13  ;;  %v13039_v21 = vld [vmem:[%s17371_s9 + $0x938] ss:$28 sps:$4 sm:$0xff]  }
 0x51e   :  { %v16580_v5 = vadd.f32 %v11413_v31, %v16502_v17  ;;  %v13005_v17 = vld [vmem:[%s17371_s9 + $0x7ec] ss:$28 sps:$4 sm:$0xff]  }
 0x51f   :  { %v13309_v23 = vpop.eup %13308  ;;  %v13036_v31 = vld [vmem:[%s17371_s9 + $0x930] ss:$28 sps:$4 sm:$0xff]  }
 0x520   :  { %9230 = vmatpush1.bf16.msra.mxu1 %v12988_v33  ;;  %9394 = vmatpush1.bf16.msra.mxu0 %v12991_v34  ;;  %v13044_v34 = vld [vmem:[%s17371_s9 + $0x96c] ss:$28 sps:$4 sm:$0xff]   ;;  %v6807_v18 = vmul.f32 %v13309_v23, %v16516_v22  ;;  %v13072_v23 = vld [vmem:[%s17371_s9 + $0xa80] ss:$28 sps:$4 sm:$0xff]  }
 0x521   :  { %9231 = vmatprep.subr.bf16.mxu1 %v12996_v35  ;;  %9395 = vmatprep.subr.bf16.mxu0 %v12999_v37  ;;  %v6831_v35 = vrot.slane %v16104_v25, %v15238_v52  ;;  %v13050_v25 = vld [vmem:[%s17371_s9 + $0x9a4] ss:$28 sps:$4 sm:$0xff]  }
 0x523   :  { %v6851_v22 = vmul.f32 %v6831_v35, %v6807_v18  ;;  %v13081_v18 = vld [vmem:[%s17371_s9 + $0xac0] ss:$28 sps:$4 sm:$0xff]   ;;  %v13086_v35 = vld [vmem:[%s17371_s9 + $0x14] ss:$28 sps:$4 sm:$0xff]  }
 0x524   :  { %9232 = vmatpush1.bf16.msra.mxu1 %v12994_v48  ;;  %9396 = vmatpush1.bf16.msra.mxu0 %v12997_v40  ;;  %v13042_v40 = vld [vmem:[%s17371_s9 + $0x968] ss:$28 sps:$4 sm:$0xff]  }
 0x525   :  { %9233 = vmatprep.subr.bf16.mxu1 %v13002_v55  ;;  %9397 = vmatprep.subr.bf16.mxu0 %v13005_v17 }
 0x528   :  { %9234 = vmatpush1.bf16.msra.mxu1 %v13000_v43  ;;  %9398 = vmatpush1.bf16.msra.mxu0 %v13003_v32  ;;  %v13048_v43 = vld [vmem:[%s17371_s9 + $0x9a0] ss:$28 sps:$4 sm:$0xff]   ;;  %v13051_v32 = vld [vmem:[%s17371_s9 + $0x9a8] ss:$28 sps:$4 sm:$0xff]  }
 0x529   :  { %9235 = vmatprep.subr.bf16.mxu1 %v13008_v46  ;;  %9399 = vmatprep.subr.bf16.mxu0 %v13011_v47  ;;  %v13059_v46 = vld [vmem:[%s17371_s9 + $0x9e4] ss:$28 sps:$4 sm:$0xff]  }
 0x52c   :  { %9236 = vmatpush1.bf16.msra.mxu1 %v13006_v49  ;;  %9400 = vmatpush1.bf16.msra.mxu0 %v13009_v10  ;;  %v13054_v10 = vld [vmem:[%s17371_s9 + $0x9d8] ss:$28 sps:$4 sm:$0xff]  }
 0x52d   :  { %9237 = vmatprep.subr.bf16.mxu1 %v13014_v59  ;;  %9401 = vmatprep.subr.bf16.mxu0 %v13017_v29  ;;  %v13062_v29 = vld [vmem:[%s17371_s9 + $0xa14] ss:$28 sps:$4 sm:$0xff]  }
 0x530   :  { %9238 = vmatpush1.bf16.msra.mxu1 %v13012_v2  ;;  %9402 = vmatpush1.bf16.msra.mxu0 %v13015_v50  ;;  %v13065_v2 = vld [vmem:[%s17371_s9 + $0xa1c] ss:$28 sps:$4 sm:$0xff]  }
 0x531   :  { %9239 = vmatprep.subr.bf16.mxu1 %v13020_v15  ;;  %9403 = vmatprep.subr.bf16.mxu0 %v13023_v57  ;;  %v13060_v15 = vld [vmem:[%s17371_s9 + $0xa10] ss:$28 sps:$4 sm:$0xff]   ;;  %v13063_v57 = vld [vmem:[%s17371_s9 + $0xa18] ss:$28 sps:$4 sm:$0xff]  }
 0x534   :  { %9240 = vmatpush1.bf16.msra.mxu1 %v13018_v3  ;;  %9404 = vmatpush1.bf16.msra.mxu0 %v13021_v58  ;;  %v13068_v58 = vld [vmem:[%s17371_s9 + $0xa4c] ss:$28 sps:$4 sm:$0xff]  }
 0x535   :  { %9241 = vmatprep.subr.bf16.mxu1 %v13026_v51  ;;  %9405 = vmatprep.subr.bf16.mxu0 %v13029_v60  ;;  %v13071_v51 = vld [vmem:[%s17371_s9 + $0xa54] ss:$28 sps:$4 sm:$0xff]  }
 0x538   :  { %9242 = vmatpush1.bf16.msra.mxu1 %v13024_v53  ;;  %9406 = vmatpush1.bf16.msra.mxu0 %v13027_v62  ;;  %v6923_v53 = vld [vmem:[%s17374_s8 + $0x20] sm:$0xff] }
 0x539   :  { %9243 = vmatprep.subr.bf16.mxu1 %v13032_v0  ;;  %9407 = vmatprep.subr.bf16.mxu0 %v13035_v7  ;;  %v13066_v0 = vld [vmem:[%s17371_s9 + $0xa48] ss:$28 sps:$4 sm:$0xff]   ;;  %v13069_v7 = vld [vmem:[%s17371_s9 + $0xa50] ss:$28 sps:$4 sm:$0xff]  }
 0x53a   :  { %v11433_v20 = vpop.f32.mrb[28].mxu0 }
 0x53b   :  { %v11434_v13 = vpop.f32.mrb[29].mxu0 }
 0x53c   :  { %v11435_v26 = vadd.f32 %v11434_v13, %v11433_v20  ;;  %v11436_v27 = vpop.f32.mrb[30].mxu0  ;;  %9244 = vmatpush1.bf16.msra.mxu1 %v13030_v9  ;;  %9408 = vmatpush1.bf16.msra.mxu0 %v13033_v11  ;;  %v13075_v13 = vld [vmem:[%s17371_s9 + $0xa88] ss:$28 sps:$4 sm:$0xff]  }
 0x53d   :  { %v11437_v33 = vpop.f32.mrb[31].mxu0  ;;  %9245 = vmatprep.subr.bf16.mxu1 %v13038_v12  ;;  %9409 = vmatprep.subr.bf16.mxu0 %v13041_v16  ;;  %v13074_v12 = vld [vmem:[%s17371_s9 + $0xa84] ss:$28 sps:$4 sm:$0xff]   ;;  %v13077_v16 = vld [vmem:[%s17371_s9 + $0xa8c] ss:$28 sps:$4 sm:$0xff]  }
 0x53e   :  { %v6630_v37 = vadd.f32 %v11435_v26, %v16580_v5  ;;  %v6875_v5 = vrot.slane %v16112_v8, %v15238_v52  ;;  %v13056_v8 = vld [vmem:[%s17371_s9 + $0x9dc] ss:$28 sps:$4 sm:$0xff]  }
 0x540   :  { %v6670_v48 = vadd.f32 %v16431_v39, %v6630_v37  ;;  %9246 = vmatpush1.bf16.msra.mxu1 %v13036_v31  ;;  %9410 = vmatpush1.bf16.msra.mxu0 %v13039_v21  ;;  %v13053_v39 = vld [vmem:[%s17371_s9 + $0x9ac] ss:$28 sps:$4 sm:$0xff]   ;;  %v6895_v47 = vadd.f32 %v6875_v5, %v6851_v22  ;;  %v13080_v31 = vld [vmem:[%s17371_s9 + $0xabc] ss:$28 sps:$4 sm:$0xff]   ;;  %v13083_v21 = vld [vmem:[%s17371_s9 + $0xac4] ss:$28 sps:$4 sm:$0xff]  }
 0x541   :  { %9247 = vmatprep.subr.bf16.mxu1 %v13044_v34  ;;  %9411 = vmatprep.subr.bf16.mxu0 %v13047_v28  ;;  %v13078_v28 = vld [vmem:[%s17371_s9 + $0xab8] ss:$28 sps:$4 sm:$0xff]   ;;  %v13326_v5 = vld [vmem:[%s17372_s6] sm:$0x7f] }
 0x542   :  { %v6711_v55 = vsel %vm3589_vm4, %v6670_v48, 0.0  ;;  %v6909_v50 = vmul.f32 0.2, %v6895_v47  ;;  %vm6902_vm14 = vcmp.gt.f32.partialorder %v6895_v47, 0.0  ;;  %v13087_v37 = vld [vmem:[%s17371_s9 + $0x1d8] ss:$28 sps:$4 sm:$0xff]  }
 0x543   :  { %v6712_v17 = vrot.slane %v6711_v55, 4 }
 0x544   :  { %9248 = vmatpush1.bf16.msra.mxu1 %v13042_v40  ;;  %9412 = vmatpush1.bf16.msra.mxu0 %v13045_v42  ;;  %v6916_v60 = vsel %vm6902_vm14, %v6895_v47, %v6909_v50  ;;  %v13091_v50 = vld [vmem:[%s17371_s9 + $0x4c] ss:$28 sps:$4 sm:$0xff]  }
 0x545   :  { %v6713_v38 = vadd.f32 %v6712_v17, %v6711_v55  ;;  %9249 = vmatprep.subr.bf16.mxu1 %v13050_v25  ;;  %9413 = vmatprep.subr.bf16.mxu0 %v13053_v39  ;;  %v6930_v11 = vmul.f32 %v6923_v53, %v6916_v60  ;;  %v6839_v55 = vrot.slane %v13326_v5, %v15307_v6  ;;  %v13101_v60 = vld [vmem:[%s17371_s9 + $0xbc] ss:$28 sps:$4 sm:$0xff]   ;;  %v13133_v5 = vld [vmem:[%s17371_s9 + $0x3d0] ss:$28 sps:$4 sm:$0xff]  }
 0x546   :  { %v13102_v53 = vld [vmem:[%s17371_s9 + $0x280] ss:$28 sps:$4 sm:$0xff]  }
 0x547   :  { %v6714_v49 = vrot.slane %v6713_v38, 2  ;;  %v16756_v27 = vpack.c.bf16 %v6930_v11, %v6930_v11  ;;  %v13104_v11 = vld [vmem:[%s17371_s9 + $0xf0] ss:$28 sps:$4 sm:$0xff]  }
 0x548   :  { %9250 = vmatpush1.bf16.msra.mxu1 %v13048_v43  ;;  %9414 = vmatpush1.bf16.msra.mxu0 %v13051_v32  ;;  %v13327_v32 = vld [vmem:[%s17373_s7] sm:$0x7f] }
 0x549   :  { %v6715_v59 = vadd.f32 %v6714_v49, %v6713_v38  ;;  %9251 = vmatprep.subr.bf16.mxu1 %v13056_v8  ;;  %9415 = vmatprep.subr.bf16.mxu0 %v13059_v46  ;;  %v6883_v38 = vrot.slane %v13327_v32, %v15307_v6  ;;  %v6925_v49 = vld [vmem:[%s17374_s8 + $0x30] sm:$0xff]  ;;  %v13138_v32 = vld [vmem:[%s17371_s9 + $0x408] ss:$28 sps:$4 sm:$0xff]  }
 0x54b   :  { %v6716_v63 = vrot.slane %v6715_v59, 1 }
 0x54c   :  { %9252 = vmatpush1.bf16.msra.mxu1 %v13054_v10  ;;  %9416 = vmatpush1.bf16.msra.mxu0 %v13057_v36 }
 0x54d   :  { %v6717_v3 = vadd.f32 %v6716_v63, %v6715_v59  ;;  %9253 = vmatprep.subr.bf16.mxu1 %v13062_v29  ;;  %9417 = vmatprep.subr.bf16.mxu0 %v13065_v2  ;;  %v13084_v59 = vld [vmem:[%s17371_s9 + $0x10] ss:$28 sps:$4 sm:$0xff]   ;;  %v13088_v29 = vld [vmem:[%s17371_s9 + $0x18] ss:$28 sps:$4 sm:$0xff]  }
 0x54e   :  { %v13092_v63 = vld [vmem:[%s17371_s9 + $0x210] ss:$28 sps:$4 sm:$0xff]  }
 0x54f   :  { %v6724_v62 = vmul.f32 0.125, %v6717_v3  ;;  %v13096_v3 = vld [vmem:[%s17371_s9 + $0x84] ss:$28 sps:$4 sm:$0xff]  }
 0x550   :  { %9254 = vmatpush1.bf16.msra.mxu1 %v13060_v15  ;;  %9418 = vmatpush1.bf16.msra.mxu0 %v13063_v57  ;;  %v13089_v15 = vld [vmem:[%s17371_s9 + $0x48] ss:$28 sps:$4 sm:$0xff]   ;;  %v13093_v57 = vld [vmem:[%s17371_s9 + $0x50] ss:$28 sps:$4 sm:$0xff]  }
 0x551   :  { %v6731_v9 = vsub.f32 %v6670_v48, %v6724_v62  ;;  %9255 = vmatprep.subr.bf16.mxu1 %v13068_v58  ;;  %9419 = vmatprep.subr.bf16.mxu0 %v13071_v51  ;;  %v13097_v58 = vld [vmem:[%s17371_s9 + $0x248] ss:$28 sps:$4 sm:$0xff]   ;;  %v13094_v51 = vld [vmem:[%s17371_s9 + $0x80] ss:$28 sps:$4 sm:$0xff]   ;;  %v13099_v62 = vld [vmem:[%s17371_s9 + $0xb8] ss:$28 sps:$4 sm:$0xff]  }
 0x553   :  { %v6738_v20 = vmul.f32 %v6731_v9, %v6731_v9 }
 0x554   :  { %9256 = vmatpush1.bf16.msra.mxu1 %v13066_v0  ;;  %9420 = vmatpush1.bf16.msra.mxu0 %v13069_v7  ;;  %v13103_v0 = vld [vmem:[%s17371_s9 + $0xc0] ss:$28 sps:$4 sm:$0xff]   ;;  %v13106_v7 = vld [vmem:[%s17371_s9 + $0xf4] ss:$28 sps:$4 sm:$0xff]  }
 0x555   :  { %v6775_v26 = vsel %vm3589_vm4, %v6738_v20, 0.0  ;;  %9266 = vmatprep.subr.bf16.mxu1 %v13074_v12  ;;  %9430 = vmatprep.subr.bf16.mxu0 %v13077_v16  ;;  %v13108_v12 = vld [vmem:[%s17371_s9 + $0xf8] ss:$28 sps:$4 sm:$0xff]   ;;  %v13111_v16 = vld [vmem:[%s17371_s9 + $0x12c] ss:$28 sps:$4 sm:$0xff]  }
 0x556   :  { %v6776_v33 = vrot.slane %v6775_v26, 4  ;;  %v13112_v20 = vld [vmem:[%s17371_s9 + $0x2f0] ss:$28 sps:$4 sm:$0xff]  }
 0x557   :  { %9258 = vmatmul.mubr.bf16.vlgmr.msra.gmra.mrb[28].mxu1 %v16756_v27  ;;  %9422 = vmatmul.mubr.bf16.vlgmr.msra.gmra.mrb[32].mxu0 %v16756_v27 }
 0x558   :  { %v6777_v34 = vadd.f32 %v6776_v33, %v6775_v26  ;;  %9267 = vmatpush1.bf16.msra.mxu1 %v13072_v23  ;;  %9431 = vmatpush1.bf16.msra.mxu0 %v13075_v13  ;;  %v13109_v23 = vld [vmem:[%s17371_s9 + $0x128] ss:$28 sps:$4 sm:$0xff]   ;;  %v13113_v13 = vld [vmem:[%s17371_s9 + $0x130] ss:$28 sps:$4 sm:$0xff]  }
 0x559   :  { %9268 = vmatprep.subr.bf16.mxu1 %v13080_v31  ;;  %9432 = vmatprep.subr.bf16.mxu0 %v13083_v21  ;;  %v13116_v26 = vld [vmem:[%s17371_s9 + $0x164] ss:$28 sps:$4 sm:$0xff]  }
 0x55a   :  { %v6778_v48 = vrot.slane %v6777_v34, 2  ;;  %9298 = vmatprep.mubr.bf16.mxu1 %v13328_v56  ;;  %9462 = vmatprep.mubr.bf16.mxu0 %v13328_v56  ;;  %v13117_v31 = vld [vmem:[%s17371_s9 + $0x328] ss:$28 sps:$4 sm:$0xff]   ;;  %v13114_v21 = vld [vmem:[%s17371_s9 + $0x160] ss:$28 sps:$4 sm:$0xff]  }
 0x55b   :  { %v13118_v33 = vld [vmem:[%s17371_s9 + $0x168] ss:$28 sps:$4 sm:$0xff]  }
 0x55c   :  { %v6779_v40 = vadd.f32 %v6778_v48, %v6777_v34  ;;  %9269 = vmatpush1.bf16.msra.mxu1 %v13078_v28  ;;  %9433 = vmatpush1.bf16.msra.mxu0 %v13081_v18  ;;  %v13121_v34 = vld [vmem:[%s17371_s9 + $0x19c] ss:$28 sps:$4 sm:$0xff]  }
 0x55d   :  { %9471 = vmatprep.subr.bf16.mxu1 %v13086_v35  ;;  %11442 = vmatprep.subr.bf16.mxu0 %v13087_v37  ;;  %v13122_v28 = vld [vmem:[%s17371_s9 + $0x360] ss:$28 sps:$4 sm:$0xff]   ;;  %v13119_v18 = vld [vmem:[%s17371_s9 + $0x198] ss:$28 sps:$4 sm:$0xff]  }
 0x55e   :  { %v6780_v42 = vrot.slane %v6779_v40, 1  ;;  %v13123_v35 = vld [vmem:[%s17371_s9 + $0x1a0] ss:$28 sps:$4 sm:$0xff]   ;;  %v13126_v37 = vld [vmem:[%s17371_s9 + $0x1d4] ss:$28 sps:$4 sm:$0xff]  }
 0x55f   :  { %v13127_v48 = vld [vmem:[%s17371_s9 + $0x558] ss:$28 sps:$4 sm:$0xff]  }
 0x560   :  { %v6781_v25 = vadd.f32 %v6780_v42, %v6779_v40  ;;  %v13124_v40 = vld [vmem:[%s17371_s9 + $0x1d0] ss:$28 sps:$4 sm:$0xff]   ;;  %v13128_v42 = vld [vmem:[%s17371_s9 + $0x398] ss:$28 sps:$4 sm:$0xff]  }
 0x562   :  { %v6788_v39 = vmul.f32 0.125, %v6781_v25  ;;  %v13131_v25 = vld [vmem:[%s17371_s9 + $0x20c] ss:$28 sps:$4 sm:$0xff]  }
 0x564   :  { %v6795_v22 = vadd.f32 1e-05, %v6788_v39  ;;  %v13132_v39 = vld [vmem:[%s17371_s9 + $0x590] ss:$28 sps:$4 sm:$0xff]  }
 0x566   :  { %13310 = vrsqrt.f32 %v6795_v22  ;;  %v13129_v22 = vld [vmem:[%s17371_s9 + $0x208] ss:$28 sps:$4 sm:$0xff]  }
 0x570   :  { %v13311_v17 = vpop.eup %13310 }
 0x571   :  { %v6809_v43 = vmul.f32 %v13311_v17, %v6731_v9  ;;  %v13107_v9 = vld [vmem:[%s17371_s9 + $0x2b8] ss:$28 sps:$4 sm:$0xff]   ;;  %v13137_v17 = vld [vmem:[%s17371_s9 + $0x5c8] ss:$28 sps:$4 sm:$0xff]  }
 0x573   :  { %v6853_v8 = vmul.f32 %v6839_v55, %v6809_v43  ;;  %v13136_v55 = vld [vmem:[%s17371_s9 + $0x244] ss:$28 sps:$4 sm:$0xff]  }
 0x574   :  { %v13134_v43 = vld [vmem:[%s17371_s9 + $0x240] ss:$28 sps:$4 sm:$0xff]  }
 0x575   :  { %v6897_v46 = vadd.f32 %v6883_v38, %v6853_v8  ;;  %v13141_v38 = vld [vmem:[%s17371_s9 + $0x27c] ss:$28 sps:$4 sm:$0xff]  }
 0x576   :  { %v13142_v8 = vld [vmem:[%s17371_s9 + $0x600] ss:$28 sps:$4 sm:$0xff]  }
 0x577   :  { %v6911_v47 = vmul.f32 0.2, %v6897_v46  ;;  %vm6904_vm15 = vcmp.gt.f32.partialorder %v6897_v46, 0.0 }
 0x579   :  { %v6918_v10 = vsel %vm6904_vm15, %v6897_v46, %v6911_v47  ;;  %v13139_v46 = vld [vmem:[%s17371_s9 + $0x278] ss:$28 sps:$4 sm:$0xff]   ;;  %v13143_v47 = vld [vmem:[%s17371_s9 + $0x440] ss:$28 sps:$4 sm:$0xff]  }
 0x57a   :  { %v6932_v36 = vmul.f32 %v6925_v49, %v6918_v10  ;;  %v13146_v49 = vld [vmem:[%s17371_s9 + $0x2b4] ss:$28 sps:$4 sm:$0xff]  }
 0x57b   :  { %v13147_v10 = vld [vmem:[%s17371_s9 + $0x638] ss:$28 sps:$4 sm:$0xff]  }
 0x57c   :  { %v16797_v2 = vpack.c.bf16 %v6932_v36, %v6932_v36  ;;  %v13144_v36 = vld [vmem:[%s17371_s9 + $0x2b0] ss:$28 sps:$4 sm:$0xff]  }
 0x57e   :  { %11280 = vmatmul.mubr.msk.bf16.vlgmr.msra.gmra.mrb[28].mxu1 %vm3589_vm4, %v16797_v2  ;;  %11281 = vmatmul.mubr.msk.bf16.vlgmr.msra.gmra.mrb[32].mxu0 %vm3589_vm4, %v16797_v2 }
 0x57f   :  { %9472 = vmatpush1.bf16.msra.mxu1 %v13084_v59  ;;  %11443 = vmatpush3.bf16.msra.mxu0 %v13088_v29  ;;  %v13148_v59 = vld [vmem:[%s17371_s9 + $0x478] ss:$28 sps:$4 sm:$0xff]   ;;  %v13151_v29 = vld [vmem:[%s17371_s9 + $0x2ec] ss:$28 sps:$4 sm:$0xff]  }
 0x580   :  { %9503 = vmatprep.mubr.bf16.mxu1 %v16156_v30  ;;  %9667 = vmatprep.mubr.bf16.mxu0 %v16156_v30  ;;  %v13098_v30 = vld [vmem:[%s17371_s9 + $0x88] ss:$28 sps:$4 sm:$0xff]  }
 0x581   :  { %9473 = vmatprep.subr.bf16.mxu1 %v13091_v50  ;;  %11444 = vmatprep.subr.bf16.mxu0 %v13092_v63  ;;  %v13152_v50 = vld [vmem:[%s17371_s9 + $0x670] ss:$28 sps:$4 sm:$0xff]   ;;  %v13149_v63 = vld [vmem:[%s17371_s9 + $0x2e8] ss:$28 sps:$4 sm:$0xff]  }
 0x583   :  { %9474 = vmatpush1.bf16.msra.mxu1 %v13089_v15  ;;  %11445 = vmatpush3.bf16.msra.mxu0 %v13093_v57  ;;  %v13153_v15 = vld [vmem:[%s17371_s9 + $0x4b0] ss:$28 sps:$4 sm:$0xff]   ;;  %v13156_v57 = vld [vmem:[%s17371_s9 + $0x324] ss:$28 sps:$4 sm:$0xff]  }
 0x584   :  { %9475 = vmatprep.subr.bf16.mxu1 %v13096_v3  ;;  %11446 = vmatprep.subr.bf16.mxu0 %v13097_v58  ;;  %v13157_v3 = vld [vmem:[%s17371_s9 + $0x6a8] ss:$28 sps:$4 sm:$0xff]   ;;  %v13154_v58 = vld [vmem:[%s17371_s9 + $0x320] ss:$28 sps:$4 sm:$0xff]  }
 0x587   :  { %9476 = vmatpush1.bf16.msra.mxu1 %v13094_v51  ;;  %11447 = vmatpush3.bf16.msra.mxu0 %v13098_v30  ;;  %v13158_v51 = vld [vmem:[%s17371_s9 + $0x4e8] ss:$28 sps:$4 sm:$0xff]   ;;  %v13161_v30 = vld [vmem:[%s17371_s9 + $0x35c] ss:$28 sps:$4 sm:$0xff]  }
 0x588   :  { %9477 = vmatprep.subr.bf16.mxu1 %v13101_v60  ;;  %11448 = vmatprep.subr.bf16.mxu0 %v13102_v53  ;;  %v13162_v60 = vld [vmem:[%s17371_s9 + $0x6e0] ss:$28 sps:$4 sm:$0xff]   ;;  %v13159_v53 = vld [vmem:[%s17371_s9 + $0x358] ss:$28 sps:$4 sm:$0xff]  }
 0x58b   :  { %9478 = vmatpush1.bf16.msra.mxu1 %v13099_v62  ;;  %11449 = vmatpush3.bf16.msra.mxu0 %v13103_v0  ;;  %v13163_v62 = vld [vmem:[%s17371_s9 + $0x520] ss:$28 sps:$4 sm:$0xff]   ;;  %v13166_v0 = vld [vmem:[%s17371_s9 + $0x394] ss:$28 sps:$4 sm:$0xff]  }
 0x58c   :  { %9479 = vmatprep.subr.bf16.mxu1 %v13106_v7  ;;  %11450 = vmatprep.subr.bf16.mxu0 %v13107_v9  ;;  %v13167_v7 = vld [vmem:[%s17371_s9 + $0x8d8] ss:$28 sps:$4 sm:$0xff]   ;;  %v13164_v9 = vld [vmem:[%s17371_s9 + $0x390] ss:$28 sps:$4 sm:$0xff]  }
 0x58f   :  { %9480 = vmatpush1.bf16.msra.mxu1 %v13104_v11  ;;  %11451 = vmatpush3.bf16.msra.mxu0 %v13108_v12  ;;  %v13168_v11 = vld [vmem:[%s17371_s9 + $0x718] ss:$28 sps:$4 sm:$0xff]   ;;  %v13171_v12 = vld [vmem:[%s17371_s9 + $0x3cc] ss:$28 sps:$4 sm:$0xff]  }
 0x590   :  { %9481 = vmatprep.subr.bf16.mxu1 %v13111_v16  ;;  %11452 = vmatprep.subr.bf16.mxu0 %v13112_v20  ;;  %v13172_v16 = vld [vmem:[%s17371_s9 + $0x910] ss:$28 sps:$4 sm:$0xff]   ;;  %v13169_v20 = vld [vmem:[%s17371_s9 + $0x3c8] ss:$28 sps:$4 sm:$0xff]  }
 0x593   :  { %9482 = vmatpush1.bf16.msra.mxu1 %v13109_v23  ;;  %11453 = vmatpush3.bf16.msra.mxu0 %v13113_v13  ;;  %v13173_v23 = vld [vmem:[%s17371_s9 + $0x750] ss:$28 sps:$4 sm:$0xff]   ;;  %v13174_v13 = vld [vmem:[%s17371_s9 + $0x400] ss:$28 sps:$4 sm:$0xff]  }
 0x594   :  { %9483 = vmatprep.subr.bf16.mxu1 %v13116_v26  ;;  %11454 = vmatprep.subr.bf16.mxu0 %v13117_v31  ;;  %v13178_v26 = vld [vmem:[%s17371_s9 + $0x788] ss:$28 sps:$4 sm:$0xff]   ;;  %v13181_v31 = vld [vmem:[%s17371_s9 + $0x43c] ss:$28 sps:$4 sm:$0xff]  }
 0x597   :  { %9484 = vmatpush1.bf16.msra.mxu1 %v13114_v21  ;;  %11455 = vmatpush3.bf16.msra.mxu0 %v13118_v33  ;;  %v13182_v21 = vld [vmem:[%s17371_s9 + $0x980] ss:$28 sps:$4 sm:$0xff]   ;;  %v13179_v33 = vld [vmem:[%s17371_s9 + $0x438] ss:$28 sps:$4 sm:$0xff]  }
 0x598   :  { %9485 = vmatprep.subr.bf16.mxu1 %v13121_v34  ;;  %11456 = vmatprep.subr.bf16.mxu0 %v13122_v28  ;;  %v13183_v34 = vld [vmem:[%s17371_s9 + $0x7c0] ss:$28 sps:$4 sm:$0xff]   ;;  %v13186_v28 = vld [vmem:[%s17371_s9 + $0x474] ss:$28 sps:$4 sm:$0xff]  }
 0x59b   :  { %9486 = vmatpush1.bf16.msra.mxu1 %v13119_v18  ;;  %11457 = vmatpush3.bf16.msra.mxu0 %v13123_v35  ;;  %v13187_v18 = vld [vmem:[%s17371_s9 + $0x9b8] ss:$28 sps:$4 sm:$0xff]   ;;  %v13184_v35 = vld [vmem:[%s17371_s9 + $0x470] ss:$28 sps:$4 sm:$0xff]  }
 0x59c   :  { %9487 = vmatprep.subr.bf16.mxu1 %v13126_v37  ;;  %11464 = vmatprep.subr.bf16.mxu0 %v13127_v48  ;;  %v13188_v37 = vld [vmem:[%s17371_s9 + $0x7f8] ss:$28 sps:$4 sm:$0xff]   ;;  %v13191_v48 = vld [vmem:[%s17371_s9 + $0x4ac] ss:$28 sps:$4 sm:$0xff]  }
 0x59e   :  { %9668 = vmatmul.mubr.bf16.vlgmr.msra.gmra.mrb[36].mxu0 %v16158_v45 }
 0x59f   :  { %9488 = vmatpush1.bf16.msra.mxu1 %v13124_v40  ;;  %11465 = vmatpush3.bf16.msra.mxu0 %v13128_v42  ;;  %v13192_v40 = vld [vmem:[%s17371_s9 + $0x9f0] ss:$28 sps:$4 sm:$0xff]   ;;  %v13189_v42 = vld [vmem:[%s17371_s9 + $0x4a8] ss:$28 sps:$4 sm:$0xff]  }
 0x5a0   :  { %9707 = vmatprep.mubr.bf16.mxu0 %v16531_v24  ;;  %9489 = vmatprep.subr.bf16.mxu1 %v13131_v25  ;;  %v13193_v25 = vld [vmem:[%s17371_s9 + $0x830] ss:$28 sps:$4 sm:$0xff]  }
 0x5a1   :  { %11466 = vmatprep.subr.bf16.mxu0 %v13132_v39  ;;  %v13196_v39 = vld [vmem:[%s17371_s9 + $0x4e4] ss:$28 sps:$4 sm:$0xff]  }
 0x5a3   :  { %9490 = vmatpush1.bf16.msra.mxu1 %v13129_v22  ;;  %11467 = vmatpush3.bf16.msra.mxu0 %v13133_v5  ;;  %v13197_v22 = vld [vmem:[%s17371_s9 + $0xa28] ss:$28 sps:$4 sm:$0xff]   ;;  %v13194_v5 = vld [vmem:[%s17371_s9 + $0x4e0] ss:$28 sps:$4 sm:$0xff]  }
 0x5a4   :  { %9491 = vmatprep.subr.bf16.mxu1 %v13136_v55  ;;  %11468 = vmatprep.subr.bf16.mxu0 %v13137_v17  ;;  %v13198_v55 = vld [vmem:[%s17371_s9 + $0x868] ss:$28 sps:$4 sm:$0xff]   ;;  %v13201_v17 = vld [vmem:[%s17371_s9 + $0x51c] ss:$28 sps:$4 sm:$0xff]  }
 0x5a7   :  { %9492 = vmatpush1.bf16.msra.mxu1 %v13134_v43  ;;  %11469 = vmatpush3.bf16.msra.mxu0 %v13138_v32  ;;  %v13202_v43 = vld [vmem:[%s17371_s9 + $0xa60] ss:$28 sps:$4 sm:$0xff]   ;;  %v13199_v32 = vld [vmem:[%s17371_s9 + $0x518] ss:$28 sps:$4 sm:$0xff]  }
 0x5a8   :  { %9493 = vmatprep.subr.bf16.mxu1 %v13141_v38  ;;  %11470 = vmatprep.subr.bf16.mxu0 %v13142_v8  ;;  %v13203_v38 = vld [vmem:[%s17371_s9 + $0x8a0] ss:$28 sps:$4 sm:$0xff]   ;;  %v13206_v8 = vld [vmem:[%s17371_s9 + $0x554] ss:$28 sps:$4 sm:$0xff]  }
 0x5ab   :  { %9494 = vmatpush1.bf16.msra.mxu1 %v13139_v46  ;;  %11471 = vmatpush3.bf16.msra.mxu0 %v13143_v47  ;;  %v13204_v46 = vld [vmem:[%s17371_s9 + $0x550] ss:$28 sps:$4 sm:$0xff]   ;;  %v13207_v47 = vld [vmem:[%s17371_s9 + $0xa98] ss:$28 sps:$4 sm:$0xff]  }
 0x5ac   :  { %9495 = vmatprep.subr.bf16.mxu1 %v13146_v49  ;;  %11472 = vmatprep.subr.bf16.mxu0 %v13147_v10  ;;  %v13210_v49 = vld [vmem:[%s17371_s9 + $0x58c] ss:$28 sps:$4 sm:$0xff]  }
 0x5ad   :  { %v13208_v10 = vld [vmem:[%s17371_s9 + $0x588] ss:$28 sps:$4 sm:$0xff]  }
 0x5af   :  { %9496 = vmatpush1.bf16.msra.mxu1 %v13144_v36  ;;  %11473 = vmatpush3.bf16.msra.mxu0 %v13148_v59  ;;  %v13211_v36 = vld [vmem:[%s17371_s9 + $0xad0] ss:$28 sps:$4 sm:$0xff]   ;;  %v13214_v59 = vld [vmem:[%s17371_s9 + $0x5c4] ss:$28 sps:$4 sm:$0xff]  }
 0x5b0   :  { %9497 = vmatprep.subr.bf16.mxu1 %v13151_v29  ;;  %11474 = vmatprep.subr.bf16.mxu0 %v13152_v50  ;;  %v13212_v29 = vld [vmem:[%s17371_s9 + $0x5c0] ss:$28 sps:$4 sm:$0xff]  }
 0x5b1   :  { %v13217_v50 = vld [vmem:[%s17371_s9 + $0x5fc] ss:$28 sps:$4 sm:$0xff]  }
 0x5b3   :  { %9498 = vmatpush1.bf16.msra.mxu1 %v13149_v63  ;;  %11475 = vmatpush3.bf16.msra.mxu0 %v13153_v15  ;;  %v13215_v63 = vld [vmem:[%s17371_s9 + $0x5f8] ss:$28 sps:$4 sm:$0xff]   ;;  %v13218_v15 = vld [vmem:[%s17371_s9 + $0x630] ss:$28 sps:$4 sm:$0xff]  }
 0x5b4   :  { %9499 = vmatprep.subr.bf16.mxu1 %v13156_v57  ;;  %11476 = vmatprep.subr.bf16.mxu0 %v13157_v3  ;;  %v13223_v57 = vld [vmem:[%s17371_s9 + $0x66c] ss:$28 sps:$4 sm:$0xff]  }
 0x5b5   :  { %v13221_v3 = vld [vmem:[%s17371_s9 + $0x668] ss:$28 sps:$4 sm:$0xff]  }
 0x5b7   :  { %9500 = vmatpush1.bf16.msra.mxu1 %v13154_v58  ;;  %11477 = vmatpush3.bf16.msra.mxu0 %v13158_v51  ;;  %v13226_v58 = vld [vmem:[%s17371_s9 + $0x6a4] ss:$28 sps:$4 sm:$0xff]  }
 0x5b8   :  { %9501 = vmatprep.subr.bf16.mxu1 %v13161_v30  ;;  %11478 = vmatprep.subr.bf16.mxu0 %v13162_v60  ;;  %v13224_v51 = vld [vmem:[%s17371_s9 + $0x6a0] ss:$28 sps:$4 sm:$0xff]   ;;  %v13227_v60 = vld [vmem:[%s17371_s9 + $0x6d8] ss:$28 sps:$4 sm:$0xff]  }
 0x5b9   :  { %v13229_v30 = vld [vmem:[%s17371_s9 + $0x6dc] ss:$28 sps:$4 sm:$0xff]  }
 0x5bb   :  { %9502 = vmatpush1.bf16.msra.mxu1 %v13159_v53  ;;  %11479 = vmatpush3.bf16.msra.mxu0 %v13163_v62  ;;  %v13232_v53 = vld [vmem:[%s17371_s9 + $0x714] ss:$28 sps:$4 sm:$0xff]  }
 0x5bc   :  { %9512 = vmatprep.subr.bf16.mxu1 %v13166_v0  ;;  %11486 = vmatprep.subr.bf16.mxu0 %v13167_v7  ;;  %v13230_v62 = vld [vmem:[%s17371_s9 + $0x710] ss:$28 sps:$4 sm:$0xff]   ;;  %v13233_v7 = vld [vmem:[%s17371_s9 + $0x748] ss:$28 sps:$4 sm:$0xff]  }
 0x5bd   :  { %v13235_v0 = vld [vmem:[%s17371_s9 + $0x74c] ss:$28 sps:$4 sm:$0xff]  }
 0x5be   :  { %9504 = vmatmul.mubr.bf16.vlgmr.msra.gmra.mrb[32].mxu1 %v16158_v45  ;;  %9708 = vmatmul.mubr.bf16.vlgmr.msra.gmra.mrb[40].mxu0 %v16539_v19  ;;  %v13176_v45 = vld [vmem:[%s17371_s9 + $0x404] ss:$28 sps:$4 sm:$0xff]  }
 0x5bf   :  { %9513 = vmatpush1.bf16.msra.mxu1 %v13164_v9  ;;  %9544 = vmatprep.mubr.bf16.mxu1 %v16531_v24  ;;  %v13177_v24 = vld [vmem:[%s17371_s9 + $0x948] ss:$28 sps:$4 sm:$0xff]  }
 0x5c0   :  { %11487 = vmatpush3.bf16.msra.mxu0 %v13168_v11  ;;  %9747 = vmatprep.mubr.bf16.mxu0 %v16551_v14  ;;  %v13238_v9 = vld [vmem:[%s17371_s9 + $0x784] ss:$28 sps:$4 sm:$0xff]  }
 0x5c1   :  { %9514 = vmatprep.subr.bf16.mxu1 %v13171_v12  ;;  %11488 = vmatprep.subr.bf16.mxu0 %v13172_v16  ;;  %v13236_v11 = vld [vmem:[%s17371_s9 + $0x780] ss:$28 sps:$4 sm:$0xff]   ;;  %v13244_v12 = vld [vmem:[%s17371_s9 + $0x7f4] ss:$28 sps:$4 sm:$0xff]  }
 0x5c2   :  { %v13242_v16 = vld [vmem:[%s17371_s9 + $0x7f0] ss:$28 sps:$4 sm:$0xff]  }
 0x5c3   :  { %9515 = vmatpush1.bf16.msra.mxu1 %v13169_v20  ;;  %v13247_v20 = vld [vmem:[%s17371_s9 + $0x82c] ss:$28 sps:$4 sm:$0xff]  }
 0x5c4   :  { %11489 = vmatpush3.bf16.msra.mxu0 %v13173_v23  ;;  %9516 = vmatprep.subr.bf16.mxu1 %v13176_v45  ;;  %v13245_v23 = vld [vmem:[%s17371_s9 + $0x828] ss:$28 sps:$4 sm:$0xff]  }
 0x5c5   :  { %11490 = vmatprep.subr.bf16.mxu0 %v13177_v24  ;;  %v13250_v45 = vld [vmem:[%s17371_s9 + $0x864] ss:$28 sps:$4 sm:$0xff]  }
 0x5c6   :  { %v13248_v24 = vld [vmem:[%s17371_s9 + $0x860] ss:$28 sps:$4 sm:$0xff]  }
 0x5c7   :  { %9517 = vmatpush1.bf16.msra.mxu1 %v13174_v13  ;;  %v13253_v13 = vld [vmem:[%s17371_s9 + $0x89c] ss:$28 sps:$4 sm:$0xff]  }
 0x5c8   :  { %11491 = vmatpush3.bf16.msra.mxu0 %v13178_v26  ;;  %9518 = vmatprep.subr.bf16.mxu1 %v13181_v31  ;;  %v13251_v26 = vld [vmem:[%s17371_s9 + $0x898] ss:$28 sps:$4 sm:$0xff]  }
 0x5c9   :  { %11492 = vmatprep.subr.bf16.mxu0 %v13182_v21  ;;  %v13256_v31 = vld [vmem:[%s17371_s9 + $0x8d4] ss:$28 sps:$4 sm:$0xff]  }
 0x5ca   :  { %v13254_v21 = vld [vmem:[%s17371_s9 + $0x8d0] ss:$28 sps:$4 sm:$0xff]  }
 0x5cb   :  { %9519 = vmatpush1.bf16.msra.mxu1 %v13179_v33  ;;  %v13259_v33 = vld [vmem:[%s17371_s9 + $0x90c] ss:$28 sps:$4 sm:$0xff]  }
 0x5cc   :  { %11493 = vmatpush3.bf16.msra.mxu0 %v13183_v34  ;;  %9520 = vmatprep.subr.bf16.mxu1 %v13186_v28  ;;  %v13257_v34 = vld [vmem:[%s17371_s9 + $0x908] ss:$28 sps:$4 sm:$0xff]  }
 0x5cd   :  { %11494 = vmatprep.subr.bf16.mxu0 %v13187_v18  ;;  %v13262_v28 = vld [vmem:[%s17371_s9 + $0x944] ss:$28 sps:$4 sm:$0xff]  }
 0x5ce   :  { %v13260_v18 = vld [vmem:[%s17371_s9 + $0x940] ss:$28 sps:$4 sm:$0xff]  }
 0x5cf   :  { %9521 = vmatpush1.bf16.msra.mxu1 %v13184_v35  ;;  %v13265_v35 = vld [vmem:[%s17371_s9 + $0x97c] ss:$28 sps:$4 sm:$0xff]  }
 0x5d0   :  { %11495 = vmatpush3.bf16.msra.mxu0 %v13188_v37  ;;  %9522 = vmatprep.subr.bf16.mxu1 %v13191_v48  ;;  %v13263_v37 = vld [vmem:[%s17371_s9 + $0x978] ss:$28 sps:$4 sm:$0xff]  }
 0x5d1   :  { %11496 = vmatprep.subr.bf16.mxu0 %v13192_v40  ;;  %v13268_v48 = vld [vmem:[%s17371_s9 + $0x9b4] ss:$28 sps:$4 sm:$0xff]  }
 0x5d2   :  { %v13266_v40 = vld [vmem:[%s17371_s9 + $0x9b0] ss:$28 sps:$4 sm:$0xff]  }
 0x5d3   :  { %9523 = vmatpush1.bf16.msra.mxu1 %v13189_v42  ;;  %v13271_v42 = vld [vmem:[%s17371_s9 + $0x9ec] ss:$28 sps:$4 sm:$0xff]  }
 0x5d4   :  { %11497 = vmatpush3.bf16.msra.mxu0 %v13193_v25  ;;  %9524 = vmatprep.subr.bf16.mxu1 %v13196_v39  ;;  %v13269_v25 = vld [vmem:[%s17371_s9 + $0x9e8] ss:$28 sps:$4 sm:$0xff]  }
 0x5d5   :  { %11498 = vmatprep.subr.bf16.mxu0 %v13197_v22  ;;  %v13274_v39 = vld [vmem:[%s17371_s9 + $0xa24] ss:$28 sps:$4 sm:$0xff]  }
 0x5d6   :  { %v13272_v22 = vld [vmem:[%s17371_s9 + $0xa20] ss:$28 sps:$4 sm:$0xff]  }
 0x5d7   :  { %9525 = vmatpush1.bf16.msra.mxu1 %v13194_v5  ;;  %v13277_v5 = vld [vmem:[%s17371_s9 + $0xa5c] ss:$28 sps:$4 sm:$0xff]  }
 0x5d8   :  { %11499 = vmatpush3.bf16.msra.mxu0 %v13198_v55  ;;  %9526 = vmatprep.subr.bf16.mxu1 %v13201_v17  ;;  %v13275_v55 = vld [vmem:[%s17371_s9 + $0xa58] ss:$28 sps:$4 sm:$0xff]  }
 0x5d9   :  { %11500 = vmatprep.subr.bf16.mxu0 %v13202_v43  ;;  %v13280_v17 = vld [vmem:[%s17371_s9 + $0xa94] ss:$28 sps:$4 sm:$0xff]  }
 0x5da   :  { %v13278_v43 = vld [vmem:[%s17371_s9 + $0xa90] ss:$28 sps:$4 sm:$0xff]  }
 0x5db   :  { %9527 = vmatpush1.bf16.msra.mxu1 %v13199_v32  ;;  %v13283_v32 = vld [vmem:[%s17371_s9 + $0xacc] ss:$28 sps:$4 sm:$0xff]  }
 0x5dc   :  { %11501 = vmatpush3.bf16.msra.mxu0 %v13203_v38  ;;  %9528 = vmatprep.subr.bf16.mxu1 %v13206_v8  ;;  %v13281_v38 = vld [vmem:[%s17371_s9 + $0xac8] ss:$28 sps:$4 sm:$0xff]  }
 0x5dd   :  { %11519 = vmatprep.subr.bf16.mxu0 %v13329_v41 }
 0x5df   :  { %9748 = vmatmul.mubr.bf16.vlgmr.msra.gmra.mrb[44].mxu0 %v16756_v27  ;;  %9529 = vmatpush1.bf16.msra.mxu1 %v13204_v46 }
 0x5e0   :  { %11520 = vmatpush3.bf16.msra.mxu0 %v13207_v47  ;;  %9530 = vmatprep.subr.bf16.mxu1 %v13210_v49 }
 0x5e1   :  { %11521 = vmatprep.subr.bf16.mxu0 %v13329_v41  ;;  %11523 = vmatprep.mubr.msk.bf16.mxu0 %vm13330_vm8, %v13329_v41  ;;  %v13220_v41 = vld [vmem:[%s17371_s9 + $0x634] ss:$28 sps:$4 sm:$0xff]   ;;  %vm10114_vm8 = vcmask 7168  }
 0x5e3   :  { %9531 = vmatpush1.bf16.msra.mxu1 %v13208_v10 }
 0x5e4   :  { %11522 = vmatpush3.bf16.msra.mxu0 %v13211_v36  ;;  %9532 = vmatprep.subr.bf16.mxu1 %v13214_v59 }
 0x5e7   :  { %11524 = vmatmul.mubr.msk.bf16.vlgmr.msra.gmra.mrb[48].mxu0 %vm3589_vm4, %v16797_v2  ;;  %9533 = vmatpush1.bf16.msra.mxu1 %v13212_v29 }
 0x5e8   :  { %9534 = vmatprep.subr.bf16.mxu1 %v13217_v50 }
 0x5eb   :  { %9535 = vmatpush1.bf16.msra.mxu1 %v13215_v63 }
 0x5ec   :  { %9536 = vmatprep.subr.bf16.mxu1 %v13220_v41 }
 0x5ef   :  { %9537 = vmatpush1.bf16.msra.mxu1 %v13218_v15 }
 0x5f0   :  { %9538 = vmatprep.subr.bf16.mxu1 %v13223_v57 }
 0x5f3   :  { %9539 = vmatpush1.bf16.msra.mxu1 %v13221_v3 }
 0x5f4   :  { %9540 = vmatprep.subr.bf16.mxu1 %v13226_v58 }
 0x5f7   :  { %9541 = vmatpush1.bf16.msra.mxu1 %v13224_v51 }
 0x5f8   :  { %9542 = vmatprep.subr.bf16.mxu1 %v13229_v30 }
 0x5fb   :  { %9543 = vmatpush1.bf16.msra.mxu1 %v13227_v60 }
 0x5fc   :  { %9553 = vmatprep.subr.bf16.mxu1 %v13232_v53 }
 0x5fe   :  { %9545 = vmatmul.mubr.bf16.vlgmr.msra.gmra.mrb[32].mxu1 %v16539_v19  ;;  %v13241_v19 = vld [vmem:[%s17371_s9 + $0x7bc] ss:$28 sps:$4 sm:$0xff]  }
 0x5ff   :  { %9554 = vmatpush1.bf16.msra.mxu1 %v13230_v62  ;;  %9585 = vmatprep.mubr.bf16.mxu1 %v16551_v14  ;;  %v13239_v14 = vld [vmem:[%s17371_s9 + $0x7b8] ss:$28 sps:$4 sm:$0xff]  }
 0x600   :  { %9555 = vmatprep.subr.bf16.mxu1 %v13235_v0 }
 0x603   :  { %9556 = vmatpush1.bf16.msra.mxu1 %v13233_v7 }
 0x604   :  { %9557 = vmatprep.subr.bf16.mxu1 %v13238_v9 }
 0x607   :  { %9558 = vmatpush1.bf16.msra.mxu1 %v13236_v11 }
 0x608   :  { %9559 = vmatprep.subr.bf16.mxu1 %v13241_v19 }
 0x60b   :  { %9560 = vmatpush1.bf16.msra.mxu1 %v13239_v14 }
 0x60c   :  { %9561 = vmatprep.subr.bf16.mxu1 %v13244_v12 }
 0x60f   :  { %9562 = vmatpush1.bf16.msra.mxu1 %v13242_v16 }
 0x610   :  { %9563 = vmatprep.subr.bf16.mxu1 %v13247_v20 }
 0x613   :  { %9564 = vmatpush1.bf16.msra.mxu1 %v13245_v23 }
 0x614   :  { %9565 = vmatprep.subr.bf16.mxu1 %v13250_v45 }
 0x617   :  { %9566 = vmatpush1.bf16.msra.mxu1 %v13248_v24 }
 0x618   :  { %9567 = vmatprep.subr.bf16.mxu1 %v13253_v13 }
 0x61b   :  { %9568 = vmatpush1.bf16.msra.mxu1 %v13251_v26 }
 0x61c   :  { %9569 = vmatprep.subr.bf16.mxu1 %v13256_v31 }
 0x61f   :  { %9570 = vmatpush1.bf16.msra.mxu1 %v13254_v21 }
 0x620   :  { %9571 = vmatprep.subr.bf16.mxu1 %v13259_v33 }
 0x623   :  { %9572 = vmatpush1.bf16.msra.mxu1 %v13257_v34 }
 0x624   :  { %9573 = vmatprep.subr.bf16.mxu1 %v13262_v28 }
 0x627   :  { %9574 = vmatpush1.bf16.msra.mxu1 %v13260_v18 }
 0x628   :  { %9575 = vmatprep.subr.bf16.mxu1 %v13265_v35 }
 0x62b   :  { %9576 = vmatpush1.bf16.msra.mxu1 %v13263_v37 }
 0x62c   :  { %9577 = vmatprep.subr.bf16.mxu1 %v13268_v48 }
 0x62f   :  { %9578 = vmatpush1.bf16.msra.mxu1 %v13266_v40 }
 0x630   :  { %9579 = vmatprep.subr.bf16.mxu1 %v13271_v42 }
 0x633   :  { %9580 = vmatpush1.bf16.msra.mxu1 %v13269_v25 }
 0x634   :  { %9581 = vmatprep.subr.bf16.mxu1 %v13274_v39 }
 0x637   :  { %9582 = vmatpush1.bf16.msra.mxu1 %v13272_v22 }
 0x638   :  { %9583 = vmatprep.subr.bf16.mxu1 %v13277_v5 }
 0x63b   :  { %9584 = vmatpush1.bf16.msra.mxu1 %v13275_v55 }
 0x63c   :  { %9594 = vmatprep.subr.bf16.mxu1 %v13280_v17 }
 0x63e   :  { %9586 = vmatmul.mubr.bf16.vlgmr.msra.gmra.mrb[32].mxu1 %v16756_v27 }
 0x63f   :  { %9595 = vmatpush1.bf16.msra.mxu1 %v13278_v43  ;;  %9626 = vmatprep.mubr.bf16.mxu1 %v13328_v56 }
 0x640   :  { %9596 = vmatprep.subr.bf16.mxu1 %v13283_v32 }
 0x643   :  { %9597 = vmatpush1.bf16.msra.mxu1 %v13281_v38 }
 0x64a   :  { %11282 = vmatmul.mubr.msk.bf16.vlgmr.msra.gmra.mrb[32].mxu1 %vm3589_vm4, %v16797_v2 }
 0x651   :  { %v9300_v8 = vpop.f32.mrb[28].mxu1  ;;  %v9464_v46 = vpop.f32.mrb[32].mxu0 }
 0x652   :  { %v9795_v47 = vrot.slane %v9300_v8, 4  ;;  %v9807_v49 = vrot.slane %v9464_v46, 4  ;;  %v9302_v10 = vpop.f32.mrb[29].mxu1  ;;  %v9466_v36 = vpop.f32.mrb[33].mxu0 }
 0x653   :  { %v9801_v59 = vrot.slane %v9302_v10, 4  ;;  %v9813_v27 = vrot.slane %v9466_v36, 4  ;;  %v9304_v29 = vpop.f32.mrb[30].mxu1  ;;  %v9468_v50 = vpop.f32.mrb[34].mxu0 }
 0x654   :  { %v9796_v63 = vadd.f32 %v9795_v47, %v9300_v8  ;;  %v9808_v41 = vadd.f32 %v9807_v49, %v9464_v46  ;;  %v9305_v15 = vpop.f32.mrb[31].mxu1  ;;  %v9469_v57 = vpop.f32.mrb[35].mxu0 }
 0x655   :  { %v9802_v56 = vadd.f32 %v9801_v59, %v9302_v10  ;;  %v9814_v3 = vadd.f32 %v9813_v27, %v9466_v36 }
 0x656   :  { %v9797_v58 = vrot.slane %v9796_v63, 2  ;;  %v9809_v51 = vrot.slane %v9808_v41, 2 }
 0x657   :  { %v9803_v30 = vrot.slane %v9802_v56, 2  ;;  %v9815_v2 = vrot.slane %v9814_v3, 2 }
 0x658   :  { %v9798_v60 = vadd.f32 %v9797_v58, %v9796_v63  ;;  %v9810_v53 = vadd.f32 %v9809_v51, %v9808_v41 }
 0x659   :  { %v9804_v62 = vadd.f32 %v9803_v30, %v9802_v56  ;;  %v9816_v0 = vadd.f32 %v9815_v2, %v9814_v3 }
 0x65a   :  { %v9799_v7 = vrot.slane %v9798_v60, 1  ;;  %v9811_v9 = vrot.slane %v9810_v53, 1 }
 0x65b   :  { %v9805_v11 = vrot.slane %v9804_v62, 1  ;;  %v9817_v19 = vrot.slane %v9816_v0, 1 }
 0x65c   :  { %v9800_v14 = vadd.f32 %v9799_v7, %v9798_v60  ;;  %v9812_v12 = vadd.f32 %v9811_v9, %v9810_v53  ;;  %v17275_v7 = vld [vmem:[%s17375_s10] sm:$0x7f] }
 0x65d   :  { %v9806_v16 = vadd.f32 %v9805_v11, %v9804_v62  ;;  %v9818_v20 = vadd.f32 %v9817_v19, %v9816_v0  ;;  %v17280_v9 = vld [vmem:[%s17376_s11] sm:$0x7f]  ;;  %v9935_v11 = vrot.slane %v17275_v7, %v14894_v61 }
 0x65e   :  { %v9838_v23 = vmul.f32 0.125, %v9800_v14  ;;  %v9840_v45 = vmul.f32 0.125, %v9812_v12  ;;  %v9943_v14 = vrot.slane %v17275_v7, %v15070_v44 }
 0x65f   :  { %v9839_v24 = vmul.f32 0.125, %v9806_v16  ;;  %v9841_v13 = vmul.f32 0.125, %v9818_v20  ;;  %v9979_v20 = vrot.slane %v17280_v9, %v14894_v61 }
 0x660   :  { %v9845_v26 = vsub.f32 %v9300_v8, %v9838_v23  ;;  %v9847_v31 = vsub.f32 %v9464_v46, %v9840_v45  ;;  %v9939_v23 = vrot.slane %v17275_v7, %v14900_v1 }
 0x661   :  { %v17262_v21 = vsub.f32 %v9302_v10, %v9839_v24  ;;  %v17264_v33 = vsub.f32 %v9466_v36, %v9841_v13  ;;  %v9987_v13 = vrot.slane %v17280_v9, %v15070_v44 }
 0x662   :  { %v9852_v34 = vmul.f32 %v9845_v26, %v9845_v26  ;;  %v9854_v28 = vmul.f32 %v9847_v31, %v9847_v31 }
 0x663   :  { %v9853_v18 = vmul.f32 %v17262_v21, %v17262_v21  ;;  %v9855_v35 = vmul.f32 %v17264_v33, %v17264_v33 }
 0x664   :  { %v9859_v37 = vrot.slane %v9852_v34, 4  ;;  %v9871_v48 = vrot.slane %v9854_v28, 4 }
 0x665   :  { %v9865_v40 = vrot.slane %v9853_v18, 4  ;;  %v9877_v42 = vrot.slane %v9855_v35, 4 }
 0x666   :  { %v9860_v25 = vadd.f32 %v9859_v37, %v9852_v34  ;;  %v9872_v39 = vadd.f32 %v9871_v48, %v9854_v28  ;;  %v9947_v34 = vrot.slane %v17275_v7, %v14903_v4 }
 0x667   :  { %v9866_v22 = vadd.f32 %v9865_v40, %v9853_v18  ;;  %v9878_v5 = vadd.f32 %v9877_v42, %v9855_v35  ;;  %v9991_v40 = vrot.slane %v17280_v9, %v14903_v4 }
 0x668   :  { %v9861_v55 = vrot.slane %v9860_v25, 2  ;;  %v9873_v17 = vrot.slane %v9872_v39, 2 }
 0x669   :  { %v9867_v43 = vrot.slane %v9866_v22, 2  ;;  %v9879_v32 = vrot.slane %v9878_v5, 2 }
 0x66a   :  { %v9862_v38 = vadd.f32 %v9861_v55, %v9860_v25  ;;  %v9874_v8 = vadd.f32 %v9873_v17, %v9872_v39  ;;  %v17303_v25 = vld [vmem:[%s17377_s13] sm:$0x7f] }
 0x66b   :  { %v9868_v46 = vadd.f32 %v9867_v43, %v9866_v22  ;;  %v9880_v47 = vadd.f32 %v9879_v32, %v9878_v5  ;;  %v10039_v55 = vld [vmem:[%s17378_s12] sm:$0xff]  ;;  %v10058_v43 = vrot.slane %v17303_v25, %v14894_v61  ;;  %v10042_v61 = vld [vmem:[%s17378_s12 + $0x18] sm:$0xff] }
 0x66c   :  { %v9863_v49 = vrot.slane %v9862_v38, 1  ;;  %v9875_v10 = vrot.slane %v9874_v8, 1 }
 0x66d   :  { %v9869_v36 = vrot.slane %v9868_v46, 1  ;;  %v9881_v59 = vrot.slane %v9880_v47, 1 }
 0x66e   :  { %v9864_v27 = vadd.f32 %v9863_v49, %v9862_v38  ;;  %v9876_v29 = vadd.f32 %v9875_v10, %v9874_v8  ;;  %v10040_v8 = vld [vmem:[%s17378_s12 + $0x8] sm:$0xff] }
 0x66f   :  { %v9870_v50 = vadd.f32 %v9869_v36, %v9868_v46  ;;  %v9882_v63 = vadd.f32 %v9881_v59, %v9880_v47  ;;  %v10041_v46 = vld [vmem:[%s17378_s12 + $0x10] sm:$0xff]  ;;  %v10062_v47 = vrot.slane %v17303_v25, %v14900_v1 }
 0x670   :  { %v9902_v41 = vmul.f32 0.125, %v9864_v27  ;;  %v9904_v15 = vmul.f32 0.125, %v9876_v29  ;;  %v10066_v27 = vrot.slane %v17303_v25, %v15070_v44 }
 0x671   :  { %v9903_v57 = vmul.f32 0.125, %v9870_v50  ;;  %v9905_v56 = vmul.f32 0.125, %v9882_v63  ;;  %v11458_v3 = vpop.f32.mrb[36].mxu0 }
 0x672   :  { %v9909_v58 = vadd.f32 1e-05, %v9902_v41  ;;  %v9911_v51 = vadd.f32 1e-05, %v9904_v15  ;;  %v11459_v30 = vpop.f32.mrb[37].mxu0 }
 0x673   :  { %v9910_v2 = vadd.f32 1e-05, %v9903_v57  ;;  %v9912_v60 = vadd.f32 1e-05, %v9905_v56  ;;  %v17270_v53 = vadd.f32 %v11459_v30, %v11458_v3  ;;  %v11461_v62 = vpop.f32.mrb[38].mxu0 }
 0x674   :  { %13312 = vrsqrt.f32 %v9909_v58  ;;  %v11462_v0 = vpop.f32.mrb[39].mxu0 }
 0x675   :  { %13314 = vrsqrt.f32 %v9911_v51 }
 0x676   :  { %13316 = vrsqrt.f32 %v9910_v2 }
 0x677   :  { %13318 = vrsqrt.f32 %v9912_v60 }
 0x67e   :  { %v13313_v19 = vpop.eup %13312 }
 0x67f   :  { %v13315_v12 = vpop.eup %13314  ;;  %v9923_v16 = vmul.f32 %v13313_v19, %v9845_v26  ;;  %v9983_v26 = vrot.slane %v17280_v9, %v14900_v1  ;;  %v10070_v1 = vrot.slane %v17303_v25, %v14903_v4 }
 0x680   :  { %v13317_v45 = vpop.eup %13316  ;;  %v9925_v24 = vmul.f32 %v13315_v12, %v9847_v31 }
 0x681   :  { %v13319_v28 = vpop.eup %13318  ;;  %v9967_v18 = vmul.f32 %v9935_v11, %v9923_v16  ;;  %v9924_v35 = vmul.f32 %v13317_v45, %v17262_v21 }
 0x682   :  { %v9969_v37 = vmul.f32 %v9943_v14, %v9925_v24  ;;  %v9926_v48 = vmul.f32 %v13319_v28, %v17264_v33  ;;  %v20_v28 = vstv %s17379_s14 }
 0x683   :  { %v10011_v31 = vadd.f32 %v9979_v20, %v9967_v18  ;;  %v9968_v42 = vmul.f32 %v9939_v23, %v9924_v35  ;;  %21 = vst [vmem:[#allocation2] sm:$0x1] %v20_v28 }
 0x684   :  { %v10013_v39 = vadd.f32 %v9987_v13, %v9969_v37  ;;  %v9970_v22 = vmul.f32 %v9947_v34, %v9926_v48 }
 0x685   :  { %vm10018_vm0 = vcmp.gt.f32.partialorder %v10011_v31, 0.0  ;;  %v10025_v21 = vmul.f32 0.2, %v10011_v31  ;;  %v10012_v5 = vadd.f32 %v9983_v26, %v9968_v42 }
 0x686   :  { %vm10020_vm1 = vcmp.gt.f32.partialorder %v10013_v39, 0.0  ;;  %v10027_v33 = vmul.f32 0.2, %v10013_v39  ;;  %v10014_v17 = vadd.f32 %v9991_v40, %v9970_v22 }
 0x687   :  { %v10032_v32 = vsel %vm10018_vm0, %v10011_v31, %v10025_v21  ;;  %vm10019_vm2 = vcmp.gt.f32.partialorder %v10012_v5, 0.0  ;;  %v10026_v38 = vmul.f32 0.2, %v10012_v5 }
 0x688   :  { %v10028_v49 = vmul.f32 0.2, %v10014_v17  ;;  %vm10021_vm3 = vcmp.gt.f32.partialorder %v10014_v17, 0.0  ;;  %v10034_v10 = vsel %vm10020_vm1, %v10013_v39, %v10027_v33  ;;  %v10046_v36 = vmul.f32 %v10039_v55, %v10032_v32 }
 0x689   :  { %v10033_v59 = vsel %vm10019_vm2, %v10012_v5, %v10026_v38  ;;  %v10048_v63 = vmul.f32 %v10041_v46, %v10034_v10 }
 0x68a   :  { %v10035_v29 = vsel %vm10021_vm3, %v10014_v17, %v10028_v49  ;;  %v10047_v50 = vmul.f32 %v10040_v8, %v10033_v59  ;;  %v10090_v41 = vmul.f32 %v10058_v43, %v10046_v36 }
 0x68b   :  { %v10049_v15 = vmul.f32 %v10042_v61, %v10035_v29  ;;  %v10092_v56 = vmul.f32 %v10066_v27, %v10048_v63 }
 0x68c   :  { %v10091_v57 = vmul.f32 %v10062_v47, %v10047_v50 }
 0x68d   :  { %v10093_v58 = vmul.f32 %v10070_v1, %v10049_v15 }
 0x68e   :  { %v10097_v3 = vadd.f32 %v10091_v57, %v10090_v41 }
 0x690   :  { %v10098_v51 = vadd.f32 %v10097_v3, %v10092_v56 }
 0x691   :  { %v11480_v30 = vpop.f32.mrb[40].mxu0 }
 0x692   :  { %v11481_v2 = vpop.f32.mrb[41].mxu0  ;;  %v17325_v60 = vadd.f32 %v10098_v51, %v10093_v58 }
 0x693   :  { %v11482_v62 = vadd.f32 %v11481_v2, %v11480_v30  ;;  %v11483_v0 = vpop.f32.mrb[42].mxu0 }
 0x694   :  { %v11484_v44 = vpop.f32.mrb[43].mxu0 }
 0x695   :  { %v9710_v11 = vadd.f32 %v11482_v62, %v17270_v53 }
 0x6b2   :  { %v11502_v19 = vpop.f32.mrb[44].mxu0 }
 0x6b3   :  { %v11503_v14 = vpop.f32.mrb[45].mxu0 }
 0x6b4   :  { %v11504_v12 = vadd.f32 %v11503_v14, %v11502_v19  ;;  %v11505_v16 = vpop.f32.mrb[46].mxu0 }
 0x6b5   :  { %v11506_v20 = vpop.f32.mrb[47].mxu0 }
 0x6b6   :  { %v9750_v4 = vadd.f32 %v11504_v12, %v9710_v11 }
 0x6ba   :  { %v9789_v23 = vpop.f32.mrb[48].mxu0 }
 0x6bb   :  { %v9790_v45 = vadd.f32 %v9789_v23, %v9750_v4  ;;  %v11525_v24 = vpop.f32.mrb[49].mxu0 }
 0x6bc   :  { %v9792_v13 = vpop.f32.mrb[50].mxu0 }
 0x6bd   :  { %v11526_v34 = vpop.f32.mrb[51].mxu0  ;;  %v9831_v18 = vsel %vm3589_vm4, %v9790_v45, 0.0 }
 0x6be   :  { %v9832_v35 = vrot.slane %v9831_v18, 4 }
 0x6c0   :  { %v9833_v53 = vadd.f32 %v9832_v35, %v9831_v18 }
 0x6c2   :  { %v9834_v26 = vrot.slane %v9833_v53, 2 }
 0x6c4   :  { %v9835_v37 = vadd.f32 %v9834_v26, %v9833_v53  ;;  %v9959_v53 = vrot.slane %v17275_v7, %v15307_v6 }
 0x6c6   :  { %v9836_v48 = vrot.slane %v9835_v37, 1 }
 0x6c8   :  { %v9837_v40 = vadd.f32 %v9836_v48, %v9835_v37  ;;  %v10003_v37 = vrot.slane %v17280_v9, %v15307_v6 }
 0x6ca   :  { %v9844_v31 = vmul.f32 0.125, %v9837_v40  ;;  %v9951_v40 = vrot.slane %v17275_v7, %v15238_v52 }
 0x6cc   :  { %v9851_v42 = vsub.f32 %v9790_v45, %v9844_v31 }
 0x6ce   :  { %v9858_v39 = vmul.f32 %v9851_v42, %v9851_v42 }
 0x6d0   :  { %v9895_v22 = vsel %vm3589_vm4, %v9858_v39, 0.0  ;;  %v9955_v39 = vrot.slane %v17275_v7, %v15242_v54  ;;  %v10045_v7 = vld [vmem:[%s17378_s12 + $0x30] sm:$0xff] }
 0x6d1   :  { %v9896_v21 = vrot.slane %v9895_v22, 4 }
 0x6d3   :  { %v9897_v5 = vadd.f32 %v9896_v21, %v9895_v22 }
 0x6d5   :  { %v9898_v55 = vrot.slane %v9897_v5, 2 }
 0x6d7   :  { %v9899_v32 = vadd.f32 %v9898_v55, %v9897_v5  ;;  %v9999_v55 = vrot.slane %v17280_v9, %v15242_v54 }
 0x6d9   :  { %v9900_v36 = vrot.slane %v9899_v32, 1 }
 0x6db   :  { %v9901_v50 = vadd.f32 %v9900_v36, %v9899_v32 }
 0x6dd   :  { %v9908_v57 = vmul.f32 0.125, %v9901_v50 }
 0x6df   :  { %v9915_v30 = vadd.f32 1e-05, %v9908_v57 }
 0x6e1   :  { %13320 = vrsqrt.f32 %v9915_v30 }
 0x6eb   :  { %v13321_v13 = vpop.eup %13320 }
 0x6ec   :  { %v9929_v35 = vmul.f32 %v13321_v13, %v9851_v42  ;;  %v9995_v42 = vrot.slane %v17280_v9, %v15238_v52  ;;  %v10044_v9 = vld [vmem:[%s17378_s12 + $0x28] sm:$0xff] }
 0x6ee   :  { %v9973_v26 = vmul.f32 %v9959_v53, %v9929_v35 }
 0x6f0   :  { %v10017_v48 = vadd.f32 %v10003_v37, %v9973_v26 }
 0x6f2   :  { %vm10024_vm5 = vcmp.gt.f32.partialorder %v10017_v48, 0.0 }
 0x71d   :  { %v9628_v33 = vpop.f32.mrb[32].mxu1 }
 0x71e   :  { %v9819_v17 = vrot.slane %v9628_v33, 4  ;;  %v9630_v43 = vpop.f32.mrb[33].mxu1 }
 0x71f   :  { %v9825_v38 = vrot.slane %v9630_v43, 4  ;;  %v9632_v8 = vpop.f32.mrb[34].mxu1 }
 0x720   :  { %v9820_v46 = vadd.f32 %v9819_v17, %v9628_v33  ;;  %v9633_v47 = vpop.f32.mrb[35].mxu1 }
 0x721   :  { %v9826_v49 = vadd.f32 %v9825_v38, %v9630_v43  ;;  %v10043_v47 = vld [vmem:[%s17378_s12 + $0x20] sm:$0xff] }
 0x722   :  { %v9821_v10 = vrot.slane %v9820_v46, 2 }
 0x723   :  { %v9827_v59 = vrot.slane %v9826_v49, 2 }
 0x724   :  { %v9822_v61 = vadd.f32 %v9821_v10, %v9820_v46  ;;  %v10074_v10 = vrot.slane %v17303_v25, %v15238_v52 }
 0x725   :  { %v9828_v27 = vadd.f32 %v9827_v59, %v9826_v49 }
 0x726   :  { %v9823_v29 = vrot.slane %v9822_v61, 1 }
 0x727   :  { %v9829_v63 = vrot.slane %v9828_v27, 1 }
 0x728   :  { %v9824_v41 = vadd.f32 %v9823_v29, %v9822_v61  ;;  %v10078_v61 = vrot.slane %v17303_v25, %v15242_v54 }
 0x729   :  { %v9830_v15 = vadd.f32 %v9829_v63, %v9828_v27  ;;  %v10082_v27 = vrot.slane %v17303_v25, %v15307_v6 }
 0x72a   :  { %v9842_v1 = vmul.f32 0.125, %v9824_v41 }
 0x72b   :  { %v9843_v56 = vmul.f32 0.125, %v9830_v15 }
 0x72c   :  { %v9849_v3 = vsub.f32 %v9628_v33, %v9842_v1  ;;  %v10031_v33 = vmul.f32 0.2, %v10017_v48 }
 0x72d   :  { %v9850_v58 = vsub.f32 %v9630_v43, %v9843_v56 }
 0x72e   :  { %v9856_v51 = vmul.f32 %v9849_v3, %v9849_v3  ;;  %v10038_v8 = vsel %vm10024_vm5, %v10017_v48, %v10031_v33 }
 0x72f   :  { %v9857_v2 = vmul.f32 %v9850_v58, %v9850_v58  ;;  %v10052_v59 = vmul.f32 %v10045_v7, %v10038_v8 }
 0x730   :  { %v9883_v62 = vrot.slane %v9856_v51, 4 }
 0x731   :  { %v9889_v0 = vrot.slane %v9857_v2, 4  ;;  %v10096_v1 = vmul.f32 %v10082_v27, %v10052_v59 }
 0x732   :  { %v9884_v44 = vadd.f32 %v9883_v62, %v9856_v51 }
 0x733   :  { %v9890_v11 = vadd.f32 %v9889_v0, %v9857_v2 }
 0x734   :  { %v9885_v19 = vrot.slane %v9884_v44, 2 }
 0x735   :  { %v9891_v14 = vrot.slane %v9890_v11, 2 }
 0x736   :  { %v9886_v12 = vadd.f32 %v9885_v19, %v9884_v44 }
 0x737   :  { %v9892_v16 = vadd.f32 %v9891_v14, %v9890_v11 }
 0x738   :  { %v9887_v20 = vrot.slane %v9886_v12, 1 }
 0x739   :  { %v9893_v4 = vrot.slane %v9892_v16, 1 }
 0x73a   :  { %v9888_v23 = vadd.f32 %v9887_v20, %v9886_v12 }
 0x73b   :  { %v9894_v45 = vadd.f32 %v9893_v4, %v9892_v16 }
 0x73c   :  { %v9906_v24 = vmul.f32 0.125, %v9888_v23 }
 0x73d   :  { %v9907_v34 = vmul.f32 0.125, %v9894_v45 }
 0x73e   :  { %v9913_v28 = vadd.f32 1e-05, %v9906_v24 }
 0x73f   :  { %v9914_v18 = vadd.f32 1e-05, %v9907_v34 }
 0x740   :  { %13322 = vrsqrt.f32 %v9913_v28 }
 0x741   :  { %13324 = vrsqrt.f32 %v9914_v18 }
 0x74a   :  { %v13323_v31 = vpop.eup %13322 }
 0x74b   :  { %v13325_v22 = vpop.eup %13324  ;;  %v9927_v21 = vmul.f32 %v13323_v31, %v9849_v3  ;;  %v10102_v3 = vsel %vm3589_vm4, %v10096_v1, 0.0 }
 0x74c   :  { %v9928_v5 = vmul.f32 %v13325_v22, %v9850_v58  ;;  %v11284_v58 = vld [vmem:[#allocation2] ss:$0 sm:$0xff] }
 0x74d   :  { %v9971_v17 = vmul.f32 %v9951_v40, %v9927_v21 }
 0x74e   :  { %v9972_v43 = vmul.f32 %v9955_v39, %v9928_v5 }
 0x74f   :  { %v10015_v32 = vadd.f32 %v9995_v42, %v9971_v17 }
 0x750   :  { %v10016_v38 = vadd.f32 %v9999_v55, %v9972_v43 }
 0x751   :  { %vm10022_vm6 = vcmp.gt.f32.partialorder %v10015_v32, 0.0  ;;  %v10029_v46 = vmul.f32 0.2, %v10015_v32 }
 0x752   :  { %vm10023_vm7 = vcmp.gt.f32.partialorder %v10016_v38, 0.0  ;;  %v10030_v49 = vmul.f32 0.2, %v10016_v38 }
 0x753   :  { %v10036_v36 = vsel %vm10022_vm6, %v10015_v32, %v10029_v46 }
 0x754   :  { %v10037_v29 = vsel %vm10023_vm7, %v10016_v38, %v10030_v49  ;;  %v10050_v50 = vmul.f32 %v10043_v47, %v10036_v36 }
 0x755   :  { %v10051_v63 = vmul.f32 %v10044_v9, %v10037_v29 }
 0x756   :  { %v10094_v41 = vmul.f32 %v10074_v10, %v10050_v50 }
 0x757   :  { %v10095_v15 = vmul.f32 %v10078_v61, %v10051_v63 }
 0x758   :  { %v10100_v57 = vadd.f32 %v17325_v60, %v10094_v41 }
 0x75a   :  { %v10101_v56 = vadd.f32 %v10100_v57, %v10095_v15 }
 0x75c   :  { %v10103_v52 = vadd.f32 %v10102_v3, %v10101_v56 }
 0x75e   :  { %10104 = vadd.xlane.f32.xlu0 %v10103_v52 }
 0x7eb   :  { %v10105_v51 = vpop.xlane.xlu0 %10104 }
 0x7ec   :  { %v10113_v54 = vadd.f32 %v11284_v58, %v10105_v51 }
 0x7ee   :  { %10115 = vst.msk [vmem:[%s17380_s15] sm:$0xff] %vm10114_vm8, %v10113_v54 }

</bundles_post_ra>
